<compile_context>
chip_gen: v6e
topology: v6e:2x2x1
jax: 0.10.0
libtpu: 0.0.40
codegen_flags: <defaults>
</compile_context>

<pallas_src>
import functools

import jax
import jax.numpy as jnp
from jax import lax
from jax.experimental import pallas as pl
from jax.experimental.pallas import tpu as pltpu


def _round_up(x, m):
    return (x + m - 1) // m * m


_VMEM_LIMIT = 48 * 1024 * 1024       # under v7x's 64 MiB physical, above all defaults
_VMEM_BUDGET = 40 * 1024 * 1024      # target for the recurrence working set


# ---------------------------------------------------------------------------
# Kernel 1: row/lane-tiled matmul + bias.  Used for the final Linear.
# ---------------------------------------------------------------------------
def _matmul_bias_kernel(x_ref, w_ref, b_ref, o_ref):
    o_ref[...] = (jnp.dot(x_ref[...], w_ref[...],
                          preferred_element_type=jnp.float32)
                  + b_ref[...]).astype(o_ref.dtype)


def _matmul_bias(x, w, b, *, tm=512, tn=512, out_dtype=jnp.float32):
    """(M, K) @ (K, N) + (1, N) -> (M, N), M and N tiled over a parallel grid."""
    x = x.astype(w.dtype)                       # no-op when producer already emitted w.dtype
    M, K = x.shape
    N = w.shape[1]
    tm = min(tm, _round_up(M, 8))
    tn = min(tn, N)
    if N % tn != 0:
        tn = N
    M_p = _round_up(M, tm)
    if M_p != M:
        x = jnp.pad(x, ((0, M_p - M), (0, 0)))
    out = pl.pallas_call(
        _matmul_bias_kernel,
        out_shape=jax.ShapeDtypeStruct((M_p, N), out_dtype),
        grid_spec=pltpu.PrefetchScalarGridSpec(
            num_scalar_prefetch=0,
            grid=(M_p // tm, N // tn),
            in_specs=[pl.BlockSpec((tm, K), lambda i, j: (i, 0)),
                      pl.BlockSpec((K, tn), lambda i, j: (0, j)),
                      pl.BlockSpec((1, tn), lambda i, j: (0, j))],
            out_specs=pl.BlockSpec((tm, tn), lambda i, j: (i, j)),
        ),
        compiler_params=pltpu.CompilerParams(
            dimension_semantics=("parallel", "parallel"),
            vmem_limit_bytes=_VMEM_LIMIT),
    )(x, w, b)
    return out[:M]


# ---------------------------------------------------------------------------
# Kernel 2: the LSTM recurrence with the input projection fused in.
# One grid step == Tc time steps; h/c persist in VMEM scratch across chunks.
# ---------------------------------------------------------------------------
def _lstm_recurrence_kernel(x_ref, len_ref, wih_ref, whh_ref, b_ref, h_out_ref,
                            h_scr, c_scr, *, chunk, hidden, unroll):
    # grid = (batch_tiles, time_chunks); time (axis 1, LAST grid axis) is the
    # recurrence -- the scratch carry relies on it iterating fastest.
    @pl.when(pl.program_id(1) == 0)
    def _():
        h_scr[...] = jnp.zeros_like(h_scr)
        c_scr[...] = jnp.zeros_like(c_scr)

    t0 = pl.program_id(1) * chunk
    lens = len_ref[...]        # (Bt, 1) int32, resident
    wih = wih_ref[...]         # (E_p, 4H) fused-gate input weight, resident
    whh = whh_ref[...]         # (H_p, 4H) fused-gate recurrent weight, resident
    bias = b_ref[...]          # (1, 4H) f32, resident

    def step(s, carry):
        h, c = carry                                   # f32 (Bt, H_p)
        x_t = x_ref[s]                                  # (Bt, E_p), MXU dtype
        # Two wide MXU matmuls per step (input proj fused -> no x_proj HBM
        # round trip); f32 accumulation via preferred_element_type.
        gates = (jnp.dot(x_t, wih, preferred_element_type=jnp.float32)
                 + jnp.dot(h.astype(whh.dtype), whh,
                           preferred_element_type=jnp.float32)
                 + bias)
        # Gate split = static 128-aligned lane slices (i, f, g, o); f32 VPU/EUP.
        i_g = jax.nn.sigmoid(gates[:, 0 * hidden:1 * hidden])
        f_g = jax.nn.sigmoid(gates[:, 1 * hidden:2 * hidden])
        g_g = jnp.tanh(gates[:, 2 * hidden:3 * hidden])
        o_g = jax.nn.sigmoid(gates[:, 3 * hidden:4 * hidden])
        c_new = f_g * c + i_g * g_g
        h_new = o_g * jnp.tanh(c_new)
        # pack_padded_sequence: state frozen past each sequence's length.
        # pad_packed_sequence: padded outputs zero-filled before the Linear.
        m = (t0 + s) < lens                             # (Bt, 1) bool
        h_out_ref[s] = jnp.where(m, h_new, 0.0).astype(h_out_ref.dtype)
        return jnp.where(m, h_new, h), jnp.where(m, c_new, c)

    h, c = lax.fori_loop(0, chunk, step, (h_scr[...], c_scr[...]),
                         unroll=unroll)
    h_scr[...] = h
    c_scr[...] = c


def _recurrence_vmem_estimate(Tc, Bt, E_p, H_p, G, in_sz, out_sz):
    blocks = 2 * Tc * Bt * E_p * in_sz          # x chunk, double-buffered
    blocks += 2 * Tc * Bt * H_p * out_sz        # h_out chunk, double-buffered
    blocks += 2 * Bt * 4                        # lengths
    weights = 2 * (E_p + H_p) * G * in_sz + 2 * G * 4   # residents (conservatively x2)
    scratch = 2 * Bt * H_p * 4                  # f32 h/c state
    return blocks + weights + scratch


# ---------------------------------------------------------------------------
# Wrapper: embedding lookup (XLA glue), weight repacking, the two Pallas
# calls, and the slice back to PyTorch's (B, max_len, out_size) convention.
# ---------------------------------------------------------------------------
def lstm_forward(sents, lengths, params, max_len, *,
                 time_chunk=16, batch_tile=256, param_dtype=jnp.bfloat16):
    B, T = sents.shape
    E = params["embedding"].shape[1]
    H = params["w_hh"].shape[-1]
    O = params["w_lin"].shape[0]
    f32 = jnp.float32
    in_sz = jnp.dtype(param_dtype).itemsize

    # vreg-aligned sizes: batch -> sublanes (16 for packed bf16, 8 for f32),
    # feature dims -> lanes (128).
    sub = 16 if in_sz < 4 else 8
    B_p = _round_up(B, sub)
    E_p = _round_up(E, 128)
    H_p = _round_up(H, 128)
    O_p = _round_up(O, 128)
    G = 4 * H_p

    # Batch tile: fill the MXU input rows (>=128/256) when the batch allows.
    Bt = min(batch_tile, B_p)
    if B_p % Bt != 0:
        Bt = B_p

    # Time chunk: amortize per-grid-step overhead, then shrink to fit the
    # VMEM budget (v7x has 64 MiB total; keep the working set well under it).
    Tc = max(1, min(time_chunk, T))
    while Tc > 1 and _recurrence_vmem_estimate(Tc, Bt, E_p, H_p, G,
                                               in_sz, in_sz) > _VMEM_BUDGET:
        Tc //= 2
    T_p = _round_up(T, Tc)

    # --- embedding lookup gathered directly time-major in the MXU dtype -----
    emb = params["embedding"].astype(param_dtype)[sents.T]           # (T, B, E)
    x = jnp.zeros((T_p, B_p, E_p), param_dtype).at[:T, :B, :E].set(emb)

    # --- fused-gate weight layout (input_dim, 4*H_p), zero-padded ----------
    w_ih = params["w_ih"].astype(f32).reshape(4, H, E)               # (4, H, E)
    w_ih = jnp.zeros((4, H_p, E_p), f32).at[:, :H, :E].set(w_ih)
    wih_cat = jnp.transpose(w_ih, (2, 0, 1)).reshape(E_p, G)         # (E_p, 4H_p)

    w_hh = params["w_hh"].astype(f32).reshape(4, H, H)               # (4, Ho, Hi)
    w_hh = jnp.zeros((4, H_p, H_p), f32).at[:, :H, :H].set(w_hh)
    whh_cat = jnp.transpose(w_hh, (2, 0, 1)).reshape(H_p, G)         # (H_p, 4H_p)

    b = (params["b_ih"] + params["b_hh"]).astype(f32).reshape(4, H)
    b_cat = jnp.zeros((4, H_p), f32).at[:, :H].set(b).reshape(1, G)  # stays f32

    w_lin = jnp.zeros((H_p, O_p), f32).at[:H, :O].set(
        params["w_lin"].astype(f32).T).astype(param_dtype)
    b_lin = jnp.zeros((1, O_p), f32).at[0, :O].set(params["b_lin"].astype(f32))

    # Resident lengths (padded batch rows get length 0 -> stay zero).
    lens = jnp.zeros((B_p, 1), jnp.int32).at[:B, 0].set(lengths.astype(jnp.int32))

    unroll = Tc if Tc <= 8 else 8          # real partial unroll (LLO visibility)
    kernel = functools.partial(_lstm_recurrence_kernel, chunk=Tc,
                               hidden=H_p, unroll=unroll)
    h_seq = pl.pallas_call(
        kernel,
        out_shape=jax.ShapeDtypeStruct((T_p, B_p, H_p), param_dtype),
        grid_spec=pltpu.PrefetchScalarGridSpec(
            num_scalar_prefetch=0,
            grid=(B_p // Bt, T_p // Tc),
            in_specs=[
                pl.BlockSpec((Tc, Bt, E_p), lambda bb, tt: (tt, bb, 0)),  # x chunk
                pl.BlockSpec((Bt, 1), lambda bb, tt: (bb, 0)),            # lengths
                pl.BlockSpec((E_p, G), lambda bb, tt: (0, 0)),            # W_ih resident
                pl.BlockSpec((H_p, G), lambda bb, tt: (0, 0)),            # W_hh resident
                pl.BlockSpec((1, G), lambda bb, tt: (0, 0)),              # bias resident
            ],
            out_specs=pl.BlockSpec((Tc, Bt, H_p), lambda bb, tt: (tt, bb, 0)),
            scratch_shapes=[pltpu.VMEM((Bt, H_p), f32),   # h state (f32)
                            pltpu.VMEM((Bt, H_p), f32)],  # c state (f32)
        ),
        compiler_params=pltpu.CompilerParams(
            # batch tiles independent (2-TC split on v7x); time is sequential
            # and MUST stay the last grid axis for the scratch carry.
            dimension_semantics=("parallel", "arbitrary"),
            vmem_limit_bytes=_VMEM_LIMIT),
    )(x, lens, wih_cat.astype(param_dtype), whh_cat.astype(param_dtype), b_cat)

    # TODO(synk): nn.Dropout(p=0.5) is identity in eval mode; training-mode
    # random masking is not reproduced here.

    # --- final Linear: only the real [:max_len, :B] rows, lane-dense output --
    h_lin = h_seq[:max_len, :B]                                      # (max_len, B, H_p)
    scores = _matmul_bias(h_lin.reshape(max_len * B, H_p), w_lin, b_lin,
                          out_dtype=f32)
    scores = scores.reshape(max_len, B, O_p)

    # pad_packed_sequence(batch_first=True): (B, max(lengths), out_size)
    return jnp.transpose(scores[:, :, :O], (1, 0, 2))


def lstm_reference(sents, lengths, params, max_len):
    """Pure-JAX f32 reference reproducing the PyTorch forward (eval mode)."""
    emb = params["embedding"][sents].astype(jnp.float32)        # (B, T, E)
    B, T, _ = emb.shape
    H = params["w_hh"].shape[-1]
    w_ih, w_hh = params["w_ih"], params["w_hh"]
    b = params["b_ih"] + params["b_hh"]

    x = jnp.transpose(emb, (1, 0, 2))
    mask = (jnp.arange(T)[:, None] < lengths[None, :]).astype(jnp.float32)[:, :, None]

    def step(carry, xs):
        h, c = carry
        x_t, m_t = xs
        gates = x_t @ w_ih.T + h @ w_hh.T + b
        i, f, g, o = jnp.split(gates, 4, axis=-1)
        i, f, o = jax.nn.sigmoid(i), jax.nn.sigmoid(f), jax.nn.sigmoid(o)
        g = jnp.tanh(g)
        c_new = f * c + i * g
        h_new = o * jnp.tanh(c_new)
        h = jnp.where(m_t > 0, h_new, h)
        c = jnp.where(m_t > 0, c_new, c)
        return (h, c), h_new * m_t

    init = (jnp.zeros((B, H), jnp.float32), jnp.zeros((B, H), jnp.float32))
    _, outs = jax.lax.scan(step, init, (x, mask))
    outs = jnp.transpose(outs, (1, 0, 2))
    scores = outs @ params["w_lin"].T + params["b_lin"]
    return scores[:, :max_len]


if __name__ == "__main__":
    vocab_size, emb_size, hidden_size, out_size = 50, 16, 32, 8
    B, T = 2, 8

    key = jax.random.PRNGKey(0)
    ks = jax.random.split(key, 8)
    params = {
        "embedding": 0.1 * jax.random.normal(ks[0], (vocab_size, emb_size), jnp.float32),
        "w_ih": 0.1 * jax.random.normal(ks[1], (4 * hidden_size, emb_size), jnp.float32),
        "w_hh": 0.1 * jax.random.normal(ks[2], (4 * hidden_size, hidden_size), jnp.float32),
        "b_ih": 0.1 * jax.random.normal(ks[3], (4 * hidden_size,), jnp.float32),
        "b_hh": 0.1 * jax.random.normal(ks[4], (4 * hidden_size,), jnp.float32),
        "w_lin": 0.1 * jax.random.normal(ks[5], (out_size, hidden_size), jnp.float32),
        "b_lin": 0.1 * jax.random.normal(ks[6], (out_size,), jnp.float32),
    }

    sents = jax.random.randint(ks[7], (B, T), 0, vocab_size)
    lengths_list = [8, 5]          # sorted descending, as pack_padded_sequence requires
    lengths = jnp.asarray(lengths_list, jnp.int32)
    max_len = max(lengths_list)

    ref = lstm_reference(sents, lengths, params, max_len)

    # f32 path: bit-for-bit structure check against the reference.
    scores_f32 = jax.block_until_ready(
        lstm_forward(sents, lengths, params, max_len, param_dtype=jnp.float32))
    assert scores_f32.shape == (B, max_len, out_size), scores_f32.shape
    assert jnp.allclose(scores_f32, ref, atol=1e-4), \
        float(jnp.max(jnp.abs(scores_f32 - ref)))

    # Default bf16-MXU path (f32 accumulation / f32 state): looser tolerance.
    scores_bf16 = jax.block_until_ready(
        lstm_forward(sents, lengths, params, max_len))
    assert scores_bf16.shape == (B, max_len, out_size), scores_bf16.shape
    assert jnp.allclose(scores_bf16, ref, atol=2e-2), \
        float(jnp.max(jnp.abs(scores_bf16 - ref)))

    print("KERNEL_OK")
</pallas_src>

<mosaic_0001>
module attributes {stable_mosaic.version = 11 : i64} {
  func.func @_lstm_recurrence_kernel(%arg0: i32, %arg1: i32, %arg2: memref<8x8x128xf32, #tpu.memory_space<vmem>>, %arg3: memref<8x1xi32, #tpu.memory_space<vmem>>, %arg4: memref<128x512xf32, #tpu.memory_space<vmem>>, %arg5: memref<128x512xf32, #tpu.memory_space<vmem>>, %arg6: memref<1x512xf32, #tpu.memory_space<vmem>>, %arg7: memref<8x8x128xf32, #tpu.memory_space<vmem>>, %arg8: memref<8x128xf32, #tpu.memory_space<vmem>>, %arg9: memref<8x128xf32, #tpu.memory_space<vmem>>) attributes {dimension_semantics = [#tpu.dimension_semantics<parallel>, #tpu.dimension_semantics<arbitrary>], iteration_bounds = array<i64: 1, 1>, scalar_prefetch = 0 : i64, scratch_operands = 2 : i64, tpu.core_type = #tpu.core_type<tc>, window_params = [{transform_indices = @transform_0, window_bounds = array<i64: 8, 8, 128>}, {transform_indices = @transform_1, window_bounds = array<i64: 8, 1>}, {pipeline_mode = #tpu.pipeline_mode<synchronous>, transform_indices = @transform_2, window_bounds = array<i64: 128, 512>}, {pipeline_mode = #tpu.pipeline_mode<synchronous>, transform_indices = @transform_3, window_bounds = array<i64: 128, 512>}, {pipeline_mode = #tpu.pipeline_mode<synchronous>, transform_indices = @transform_4, window_bounds = array<i64: 1, 512>}, {transform_indices = @transform_5, window_bounds = array<i64: 8, 8, 128>}]} {
    %c0_i32 = arith.constant 0 : i32
    %0 = arith.cmpi eq, %arg1, %c0_i32 : i32
    %1 = arith.extui %0 : i1 to i32
    %c0_i32_0 = arith.constant 0 : i32
    %2 = arith.cmpi ne, %1, %c0_i32_0 : i32
    scf.if %2 {
      %cst_97 = arith.constant 0.000000e+00 : f32
      %412 = vector.broadcast %cst_97 : f32 to vector<8x128xf32>
      %c0_98 = arith.constant 0 : index
      %c0_99 = arith.constant 0 : index
      %413 = vector.load %arg8[%c0_98, %c0_99] : memref<8x128xf32, #tpu.memory_space<vmem>>, vector<8x128xf32>
      tpu.vector_store %arg8[%c0_98, %c0_99], %412 {strides = array<i32>} : memref<8x128xf32, #tpu.memory_space<vmem>>, vector<8x128xf32>,
      %cst_100 = arith.constant 0.000000e+00 : f32
      %414 = vector.broadcast %cst_100 : f32 to vector<8x128xf32>
      %c0_101 = arith.constant 0 : index
      %c0_102 = arith.constant 0 : index
      %415 = vector.load %arg9[%c0_101, %c0_102] : memref<8x128xf32, #tpu.memory_space<vmem>>, vector<8x128xf32>
      tpu.vector_store %arg9[%c0_101, %c0_102], %414 {strides = array<i32>} : memref<8x128xf32, #tpu.memory_space<vmem>>, vector<8x128xf32>,
    } else {
    }
    %c8_i32 = arith.constant 8 : i32
    %3 = arith.muli %arg1, %c8_i32 : i32
    %c0 = arith.constant 0 : index
    %c0_1 = arith.constant 0 : index
    %4 = vector.load %arg3[%c0, %c0_1] : memref<8x1xi32, #tpu.memory_space<vmem>>, vector<8x1xi32>
    %c0_2 = arith.constant 0 : index
    %c0_3 = arith.constant 0 : index
    %5 = vector.load %arg4[%c0_2, %c0_3] : memref<128x512xf32, #tpu.memory_space<vmem>>, vector<128x512xf32>
    %c0_4 = arith.constant 0 : index
    %c0_5 = arith.constant 0 : index
    %6 = vector.load %arg5[%c0_4, %c0_5] : memref<128x512xf32, #tpu.memory_space<vmem>>, vector<128x512xf32>
    %c0_6 = arith.constant 0 : index
    %c0_7 = arith.constant 0 : index
    %7 = vector.load %arg6[%c0_6, %c0_7] : memref<1x512xf32, #tpu.memory_space<vmem>>, vector<1x512xf32>
    %c0_8 = arith.constant 0 : index
    %c0_9 = arith.constant 0 : index
    %8 = vector.load %arg8[%c0_8, %c0_9] : memref<8x128xf32, #tpu.memory_space<vmem>>, vector<8x128xf32>
    %c0_10 = arith.constant 0 : index
    %c0_11 = arith.constant 0 : index
    %9 = vector.load %arg9[%c0_10, %c0_11] : memref<8x128xf32, #tpu.memory_space<vmem>>, vector<8x128xf32>
    %c0_i32_12 = arith.constant 0 : i32
    %10 = arith.index_cast %c0_i32_12 : i32 to index
    %c0_13 = arith.constant 0 : index
    %c0_14 = arith.constant 0 : index
    %11 = vector.load %arg2[%10, %c0_13, %c0_14] : memref<8x8x128xf32, #tpu.memory_space<vmem>>, vector<1x8x128xf32>
    %12 = vector.shape_cast %11 : vector<1x8x128xf32> to vector<8x128xf32>
    %cst = arith.constant dense<0.000000e+00> : vector<8x512xf32>
    %13 = tpu.matmul %12, %5, %cst {dimension_numbers = #tpu.dot_dimension_numbers<[1], [0], [0], [1], [0, 0, 1, 1], [], []>} : vector<8x128xf32>, vector<128x512xf32>, vector<8x512xf32> -> vector<8x512xf32>
    %cst_15 = arith.constant dense<0.000000e+00> : vector<8x512xf32>
    %14 = tpu.matmul %8, %6, %cst_15 {dimension_numbers = #tpu.dot_dimension_numbers<[1], [0], [0], [1], [0, 0, 1, 1], [], []>} : vector<8x128xf32>, vector<128x512xf32>, vector<8x512xf32> -> vector<8x512xf32>
    %15 = arith.addf %13, %14 : vector<8x512xf32>
    %16 = vector.broadcast %7 : vector<1x512xf32> to vector<8x512xf32>
    %17 = arith.addf %15, %16 : vector<8x512xf32>
    %18 = vector.extract_strided_slice %17 {offsets = [0, 0], sizes = [8, 128], strides = [1, 1]} : vector<8x512xf32> to vector<8x128xf32>
    %19 = arith.negf %18 : vector<8x128xf32>
    %20 = math.exp %19 : vector<8x128xf32>
    %cst_16 = arith.constant 1.000000e+00 : f32
    %21 = vector.broadcast %cst_16 : f32 to vector<8x128xf32>
    %22 = arith.addf %21, %20 : vector<8x128xf32>
    %23 = arith.divf %21, %22 : vector<8x128xf32>
    %24 = vector.extract_strided_slice %17 {offsets = [0, 128], sizes = [8, 128], strides = [1, 1]} : vector<8x512xf32> to vector<8x128xf32>
    %25 = arith.negf %24 : vector<8x128xf32>
    %26 = math.exp %25 : vector<8x128xf32>
    %cst_17 = arith.constant 1.000000e+00 : f32
    %27 = vector.broadcast %cst_17 : f32 to vector<8x128xf32>
    %28 = arith.addf %27, %26 : vector<8x128xf32>
    %29 = arith.divf %27, %28 : vector<8x128xf32>
    %30 = vector.extract_strided_slice %17 {offsets = [0, 256], sizes = [8, 128], strides = [1, 1]} : vector<8x512xf32> to vector<8x128xf32>
    %31 = math.tanh %30 : vector<8x128xf32>
    %32 = vector.extract_strided_slice %17 {offsets = [0, 384], sizes = [8, 128], strides = [1, 1]} : vector<8x512xf32> to vector<8x128xf32>
    %33 = arith.negf %32 : vector<8x128xf32>
    %34 = math.exp %33 : vector<8x128xf32>
    %cst_18 = arith.constant 1.000000e+00 : f32
    %35 = vector.broadcast %cst_18 : f32 to vector<8x128xf32>
    %36 = arith.addf %35, %34 : vector<8x128xf32>
    %37 = arith.divf %35, %36 : vector<8x128xf32>
    %38 = arith.mulf %29, %9 : vector<8x128xf32>
    %39 = arith.mulf %23, %31 : vector<8x128xf32>
    %40 = arith.addf %38, %39 : vector<8x128xf32>
    %41 = math.tanh %40 : vector<8x128xf32>
    %42 = arith.mulf %37, %41 : vector<8x128xf32>
    %43 = arith.addi %3, %c0_i32_12 : i32
    %44 = vector.broadcast %43 : i32 to vector<8x1xi32>
    %45 = arith.cmpi slt, %44, %4 : vector<8x1xi32>
    %cst_19 = arith.constant 0.000000e+00 : f32
    %46 = vector.shape_cast %45 : vector<8x1xi1> to vector<8x1xi1>
    %47 = vector.broadcast %46 : vector<8x1xi1> to vector<8x128xi1>
    %48 = vector.broadcast %cst_19 : f32 to vector<8x128xf32>
    %49 = arith.select %47, %42, %48 : vector<8x128xi1>, vector<8x128xf32>
    %50 = arith.index_cast %c0_i32_12 : i32 to index
    %c0_20 = arith.constant 0 : index
    %c0_21 = arith.constant 0 : index
    %51 = vector.load %arg7[%50, %c0_20, %c0_21] : memref<8x8x128xf32, #tpu.memory_space<vmem>>, vector<1x8x128xf32>
    %52 = vector.shape_cast %51 : vector<1x8x128xf32> to vector<8x128xf32>
    %53 = vector.shape_cast %49 : vector<8x128xf32> to vector<1x8x128xf32>
    tpu.vector_store %arg7[%50, %c0_20, %c0_21], %53 {strides = array<i32>} : memref<8x8x128xf32, #tpu.memory_space<vmem>>, vector<1x8x128xf32>,
    %54 = vector.shape_cast %45 : vector<8x1xi1> to vector<8x1xi1>
    %55 = vector.broadcast %54 : vector<8x1xi1> to vector<8x128xi1>
    %56 = arith.select %55, %42, %8 : vector<8x128xi1>, vector<8x128xf32>
    %57 = vector.shape_cast %45 : vector<8x1xi1> to vector<8x1xi1>
    %58 = vector.broadcast %57 : vector<8x1xi1> to vector<8x128xi1>
    %59 = arith.select %58, %40, %9 : vector<8x128xi1>, vector<8x128xf32>
    %c1_i32 = arith.constant 1 : i32
    %60 = arith.index_cast %c1_i32 : i32 to index
    %c0_22 = arith.constant 0 : index
    %c0_23 = arith.constant 0 : index
    %61 = vector.load %arg2[%60, %c0_22, %c0_23] : memref<8x8x128xf32, #tpu.memory_space<vmem>>, vector<1x8x128xf32>
    %62 = vector.shape_cast %61 : vector<1x8x128xf32> to vector<8x128xf32>
    %cst_24 = arith.constant dense<0.000000e+00> : vector<8x512xf32>
    %63 = tpu.matmul %62, %5, %cst_24 {dimension_numbers = #tpu.dot_dimension_numbers<[1], [0], [0], [1], [0, 0, 1, 1], [], []>} : vector<8x128xf32>, vector<128x512xf32>, vector<8x512xf32> -> vector<8x512xf32>
    %cst_25 = arith.constant dense<0.000000e+00> : vector<8x512xf32>
    %64 = tpu.matmul %56, %6, %cst_25 {dimension_numbers = #tpu.dot_dimension_numbers<[1], [0], [0], [1], [0, 0, 1, 1], [], []>} : vector<8x128xf32>, vector<128x512xf32>, vector<8x512xf32> -> vector<8x512xf32>
    %65 = arith.addf %63, %64 : vector<8x512xf32>
    %66 = vector.broadcast %7 : vector<1x512xf32> to vector<8x512xf32>
    %67 = arith.addf %65, %66 : vector<8x512xf32>
    %68 = vector.extract_strided_slice %67 {offsets = [0, 0], sizes = [8, 128], strides = [1, 1]} : vector<8x512xf32> to vector<8x128xf32>
    %69 = arith.negf %68 : vector<8x128xf32>
    %70 = math.exp %69 : vector<8x128xf32>
    %cst_26 = arith.constant 1.000000e+00 : f32
    %71 = vector.broadcast %cst_26 : f32 to vector<8x128xf32>
    %72 = arith.addf %71, %70 : vector<8x128xf32>
    %73 = arith.divf %71, %72 : vector<8x128xf32>
    %74 = vector.extract_strided_slice %67 {offsets = [0, 128], sizes = [8, 128], strides = [1, 1]} : vector<8x512xf32> to vector<8x128xf32>
    %75 = arith.negf %74 : vector<8x128xf32>
    %76 = math.exp %75 : vector<8x128xf32>
    %cst_27 = arith.constant 1.000000e+00 : f32
    %77 = vector.broadcast %cst_27 : f32 to vector<8x128xf32>
    %78 = arith.addf %77, %76 : vector<8x128xf32>
    %79 = arith.divf %77, %78 : vector<8x128xf32>
    %80 = vector.extract_strided_slice %67 {offsets = [0, 256], sizes = [8, 128], strides = [1, 1]} : vector<8x512xf32> to vector<8x128xf32>
    %81 = math.tanh %80 : vector<8x128xf32>
    %82 = vector.extract_strided_slice %67 {offsets = [0, 384], sizes = [8, 128], strides = [1, 1]} : vector<8x512xf32> to vector<8x128xf32>
    %83 = arith.negf %82 : vector<8x128xf32>
    %84 = math.exp %83 : vector<8x128xf32>
    %cst_28 = arith.constant 1.000000e+00 : f32
    %85 = vector.broadcast %cst_28 : f32 to vector<8x128xf32>
    %86 = arith.addf %85, %84 : vector<8x128xf32>
    %87 = arith.divf %85, %86 : vector<8x128xf32>
    %88 = arith.mulf %79, %59 : vector<8x128xf32>
    %89 = arith.mulf %73, %81 : vector<8x128xf32>
    %90 = arith.addf %88, %89 : vector<8x128xf32>
    %91 = math.tanh %90 : vector<8x128xf32>
    %92 = arith.mulf %87, %91 : vector<8x128xf32>
    %93 = arith.addi %3, %c1_i32 : i32
    %94 = vector.broadcast %93 : i32 to vector<8x1xi32>
    %95 = arith.cmpi slt, %94, %4 : vector<8x1xi32>
    %cst_29 = arith.constant 0.000000e+00 : f32
    %96 = vector.shape_cast %95 : vector<8x1xi1> to vector<8x1xi1>
    %97 = vector.broadcast %96 : vector<8x1xi1> to vector<8x128xi1>
    %98 = vector.broadcast %cst_29 : f32 to vector<8x128xf32>
    %99 = arith.select %97, %92, %98 : vector<8x128xi1>, vector<8x128xf32>
    %100 = arith.index_cast %c1_i32 : i32 to index
    %c0_30 = arith.constant 0 : index
    %c0_31 = arith.constant 0 : index
    %101 = vector.load %arg7[%100, %c0_30, %c0_31] : memref<8x8x128xf32, #tpu.memory_space<vmem>>, vector<1x8x128xf32>
    %102 = vector.shape_cast %101 : vector<1x8x128xf32> to vector<8x128xf32>
    %103 = vector.shape_cast %99 : vector<8x128xf32> to vector<1x8x128xf32>
    tpu.vector_store %arg7[%100, %c0_30, %c0_31], %103 {strides = array<i32>} : memref<8x8x128xf32, #tpu.memory_space<vmem>>, vector<1x8x128xf32>,
    %104 = vector.shape_cast %95 : vector<8x1xi1> to vector<8x1xi1>
    %105 = vector.broadcast %104 : vector<8x1xi1> to vector<8x128xi1>
    %106 = arith.select %105, %92, %56 : vector<8x128xi1>, vector<8x128xf32>
    %107 = vector.shape_cast %95 : vector<8x1xi1> to vector<8x1xi1>
    %108 = vector.broadcast %107 : vector<8x1xi1> to vector<8x128xi1>
    %109 = arith.select %108, %90, %59 : vector<8x128xi1>, vector<8x128xf32>
    %c2_i32 = arith.constant 2 : i32
    %110 = arith.index_cast %c2_i32 : i32 to index
    %c0_32 = arith.constant 0 : index
    %c0_33 = arith.constant 0 : index
    %111 = vector.load %arg2[%110, %c0_32, %c0_33] : memref<8x8x128xf32, #tpu.memory_space<vmem>>, vector<1x8x128xf32>
    %112 = vector.shape_cast %111 : vector<1x8x128xf32> to vector<8x128xf32>
    %cst_34 = arith.constant dense<0.000000e+00> : vector<8x512xf32>
    %113 = tpu.matmul %112, %5, %cst_34 {dimension_numbers = #tpu.dot_dimension_numbers<[1], [0], [0], [1], [0, 0, 1, 1], [], []>} : vector<8x128xf32>, vector<128x512xf32>, vector<8x512xf32> -> vector<8x512xf32>
    %cst_35 = arith.constant dense<0.000000e+00> : vector<8x512xf32>
    %114 = tpu.matmul %106, %6, %cst_35 {dimension_numbers = #tpu.dot_dimension_numbers<[1], [0], [0], [1], [0, 0, 1, 1], [], []>} : vector<8x128xf32>, vector<128x512xf32>, vector<8x512xf32> -> vector<8x512xf32>
    %115 = arith.addf %113, %114 : vector<8x512xf32>
    %116 = vector.broadcast %7 : vector<1x512xf32> to vector<8x512xf32>
    %117 = arith.addf %115, %116 : vector<8x512xf32>
    %118 = vector.extract_strided_slice %117 {offsets = [0, 0], sizes = [8, 128], strides = [1, 1]} : vector<8x512xf32> to vector<8x128xf32>
    %119 = arith.negf %118 : vector<8x128xf32>
    %120 = math.exp %119 : vector<8x128xf32>
    %cst_36 = arith.constant 1.000000e+00 : f32
    %121 = vector.broadcast %cst_36 : f32 to vector<8x128xf32>
    %122 = arith.addf %121, %120 : vector<8x128xf32>
    %123 = arith.divf %121, %122 : vector<8x128xf32>
    %124 = vector.extract_strided_slice %117 {offsets = [0, 128], sizes = [8, 128], strides = [1, 1]} : vector<8x512xf32> to vector<8x128xf32>
    %125 = arith.negf %124 : vector<8x128xf32>
    %126 = math.exp %125 : vector<8x128xf32>
    %cst_37 = arith.constant 1.000000e+00 : f32
    %127 = vector.broadcast %cst_37 : f32 to vector<8x128xf32>
    %128 = arith.addf %127, %126 : vector<8x128xf32>
    %129 = arith.divf %127, %128 : vector<8x128xf32>
    %130 = vector.extract_strided_slice %117 {offsets = [0, 256], sizes = [8, 128], strides = [1, 1]} : vector<8x512xf32> to vector<8x128xf32>
    %131 = math.tanh %130 : vector<8x128xf32>
    %132 = vector.extract_strided_slice %117 {offsets = [0, 384], sizes = [8, 128], strides = [1, 1]} : vector<8x512xf32> to vector<8x128xf32>
    %133 = arith.negf %132 : vector<8x128xf32>
    %134 = math.exp %133 : vector<8x128xf32>
    %cst_38 = arith.constant 1.000000e+00 : f32
    %135 = vector.broadcast %cst_38 : f32 to vector<8x128xf32>
    %136 = arith.addf %135, %134 : vector<8x128xf32>
    %137 = arith.divf %135, %136 : vector<8x128xf32>
    %138 = arith.mulf %129, %109 : vector<8x128xf32>
    %139 = arith.mulf %123, %131 : vector<8x128xf32>
    %140 = arith.addf %138, %139 : vector<8x128xf32>
    %141 = math.tanh %140 : vector<8x128xf32>
    %142 = arith.mulf %137, %141 : vector<8x128xf32>
    %143 = arith.addi %3, %c2_i32 : i32
    %144 = vector.broadcast %143 : i32 to vector<8x1xi32>
    %145 = arith.cmpi slt, %144, %4 : vector<8x1xi32>
    %cst_39 = arith.constant 0.000000e+00 : f32
    %146 = vector.shape_cast %145 : vector<8x1xi1> to vector<8x1xi1>
    %147 = vector.broadcast %146 : vector<8x1xi1> to vector<8x128xi1>
    %148 = vector.broadcast %cst_39 : f32 to vector<8x128xf32>
    %149 = arith.select %147, %142, %148 : vector<8x128xi1>, vector<8x128xf32>
    %150 = arith.index_cast %c2_i32 : i32 to index
    %c0_40 = arith.constant 0 : index
    %c0_41 = arith.constant 0 : index
    %151 = vector.load %arg7[%150, %c0_40, %c0_41] : memref<8x8x128xf32, #tpu.memory_space<vmem>>, vector<1x8x128xf32>
    %152 = vector.shape_cast %151 : vector<1x8x128xf32> to vector<8x128xf32>
    %153 = vector.shape_cast %149 : vector<8x128xf32> to vector<1x8x128xf32>
    tpu.vector_store %arg7[%150, %c0_40, %c0_41], %153 {strides = array<i32>} : memref<8x8x128xf32, #tpu.memory_space<vmem>>, vector<1x8x128xf32>,
    %154 = vector.shape_cast %145 : vector<8x1xi1> to vector<8x1xi1>
    %155 = vector.broadcast %154 : vector<8x1xi1> to vector<8x128xi1>
    %156 = arith.select %155, %142, %106 : vector<8x128xi1>, vector<8x128xf32>
    %157 = vector.shape_cast %145 : vector<8x1xi1> to vector<8x1xi1>
    %158 = vector.broadcast %157 : vector<8x1xi1> to vector<8x128xi1>
    %159 = arith.select %158, %140, %109 : vector<8x128xi1>, vector<8x128xf32>
    %c3_i32 = arith.constant 3 : i32
    %160 = arith.index_cast %c3_i32 : i32 to index
    %c0_42 = arith.constant 0 : index
    %c0_43 = arith.constant 0 : index
    %161 = vector.load %arg2[%160, %c0_42, %c0_43] : memref<8x8x128xf32, #tpu.memory_space<vmem>>, vector<1x8x128xf32>
    %162 = vector.shape_cast %161 : vector<1x8x128xf32> to vector<8x128xf32>
    %cst_44 = arith.constant dense<0.000000e+00> : vector<8x512xf32>
    %163 = tpu.matmul %162, %5, %cst_44 {dimension_numbers = #tpu.dot_dimension_numbers<[1], [0], [0], [1], [0, 0, 1, 1], [], []>} : vector<8x128xf32>, vector<128x512xf32>, vector<8x512xf32> -> vector<8x512xf32>
    %cst_45 = arith.constant dense<0.000000e+00> : vector<8x512xf32>
    %164 = tpu.matmul %156, %6, %cst_45 {dimension_numbers = #tpu.dot_dimension_numbers<[1], [0], [0], [1], [0, 0, 1, 1], [], []>} : vector<8x128xf32>, vector<128x512xf32>, vector<8x512xf32> -> vector<8x512xf32>
    %165 = arith.addf %163, %164 : vector<8x512xf32>
    %166 = vector.broadcast %7 : vector<1x512xf32> to vector<8x512xf32>
    %167 = arith.addf %165, %166 : vector<8x512xf32>
    %168 = vector.extract_strided_slice %167 {offsets = [0, 0], sizes = [8, 128], strides = [1, 1]} : vector<8x512xf32> to vector<8x128xf32>
    %169 = arith.negf %168 : vector<8x128xf32>
    %170 = math.exp %169 : vector<8x128xf32>
    %cst_46 = arith.constant 1.000000e+00 : f32
    %171 = vector.broadcast %cst_46 : f32 to vector<8x128xf32>
    %172 = arith.addf %171, %170 : vector<8x128xf32>
    %173 = arith.divf %171, %172 : vector<8x128xf32>
    %174 = vector.extract_strided_slice %167 {offsets = [0, 128], sizes = [8, 128], strides = [1, 1]} : vector<8x512xf32> to vector<8x128xf32>
    %175 = arith.negf %174 : vector<8x128xf32>
    %176 = math.exp %175 : vector<8x128xf32>
    %cst_47 = arith.constant 1.000000e+00 : f32
    %177 = vector.broadcast %cst_47 : f32 to vector<8x128xf32>
    %178 = arith.addf %177, %176 : vector<8x128xf32>
    %179 = arith.divf %177, %178 : vector<8x128xf32>
    %180 = vector.extract_strided_slice %167 {offsets = [0, 256], sizes = [8, 128], strides = [1, 1]} : vector<8x512xf32> to vector<8x128xf32>
    %181 = math.tanh %180 : vector<8x128xf32>
    %182 = vector.extract_strided_slice %167 {offsets = [0, 384], sizes = [8, 128], strides = [1, 1]} : vector<8x512xf32> to vector<8x128xf32>
    %183 = arith.negf %182 : vector<8x128xf32>
    %184 = math.exp %183 : vector<8x128xf32>
    %cst_48 = arith.constant 1.000000e+00 : f32
    %185 = vector.broadcast %cst_48 : f32 to vector<8x128xf32>
    %186 = arith.addf %185, %184 : vector<8x128xf32>
    %187 = arith.divf %185, %186 : vector<8x128xf32>
    %188 = arith.mulf %179, %159 : vector<8x128xf32>
    %189 = arith.mulf %173, %181 : vector<8x128xf32>
    %190 = arith.addf %188, %189 : vector<8x128xf32>
    %191 = math.tanh %190 : vector<8x128xf32>
    %192 = arith.mulf %187, %191 : vector<8x128xf32>
    %193 = arith.addi %3, %c3_i32 : i32
    %194 = vector.broadcast %193 : i32 to vector<8x1xi32>
    %195 = arith.cmpi slt, %194, %4 : vector<8x1xi32>
    %cst_49 = arith.constant 0.000000e+00 : f32
    %196 = vector.shape_cast %195 : vector<8x1xi1> to vector<8x1xi1>
    %197 = vector.broadcast %196 : vector<8x1xi1> to vector<8x128xi1>
    %198 = vector.broadcast %cst_49 : f32 to vector<8x128xf32>
    %199 = arith.select %197, %192, %198 : vector<8x128xi1>, vector<8x128xf32>
    %200 = arith.index_cast %c3_i32 : i32 to index
    %c0_50 = arith.constant 0 : index
    %c0_51 = arith.constant 0 : index
    %201 = vector.load %arg7[%200, %c0_50, %c0_51] : memref<8x8x128xf32, #tpu.memory_space<vmem>>, vector<1x8x128xf32>
    %202 = vector.shape_cast %201 : vector<1x8x128xf32> to vector<8x128xf32>
    %203 = vector.shape_cast %199 : vector<8x128xf32> to vector<1x8x128xf32>
    tpu.vector_store %arg7[%200, %c0_50, %c0_51], %203 {strides = array<i32>} : memref<8x8x128xf32, #tpu.memory_space<vmem>>, vector<1x8x128xf32>,
    %204 = vector.shape_cast %195 : vector<8x1xi1> to vector<8x1xi1>
    %205 = vector.broadcast %204 : vector<8x1xi1> to vector<8x128xi1>
    %206 = arith.select %205, %192, %156 : vector<8x128xi1>, vector<8x128xf32>
    %207 = vector.shape_cast %195 : vector<8x1xi1> to vector<8x1xi1>
    %208 = vector.broadcast %207 : vector<8x1xi1> to vector<8x128xi1>
    %209 = arith.select %208, %190, %159 : vector<8x128xi1>, vector<8x128xf32>
    %c4_i32 = arith.constant 4 : i32
    %210 = arith.index_cast %c4_i32 : i32 to index
    %c0_52 = arith.constant 0 : index
    %c0_53 = arith.constant 0 : index
    %211 = vector.load %arg2[%210, %c0_52, %c0_53] : memref<8x8x128xf32, #tpu.memory_space<vmem>>, vector<1x8x128xf32>
    %212 = vector.shape_cast %211 : vector<1x8x128xf32> to vector<8x128xf32>
    %cst_54 = arith.constant dense<0.000000e+00> : vector<8x512xf32>
    %213 = tpu.matmul %212, %5, %cst_54 {dimension_numbers = #tpu.dot_dimension_numbers<[1], [0], [0], [1], [0, 0, 1, 1], [], []>} : vector<8x128xf32>, vector<128x512xf32>, vector<8x512xf32> -> vector<8x512xf32>
    %cst_55 = arith.constant dense<0.000000e+00> : vector<8x512xf32>
    %214 = tpu.matmul %206, %6, %cst_55 {dimension_numbers = #tpu.dot_dimension_numbers<[1], [0], [0], [1], [0, 0, 1, 1], [], []>} : vector<8x128xf32>, vector<128x512xf32>, vector<8x512xf32> -> vector<8x512xf32>
    %215 = arith.addf %213, %214 : vector<8x512xf32>
    %216 = vector.broadcast %7 : vector<1x512xf32> to vector<8x512xf32>
    %217 = arith.addf %215, %216 : vector<8x512xf32>
    %218 = vector.extract_strided_slice %217 {offsets = [0, 0], sizes = [8, 128], strides = [1, 1]} : vector<8x512xf32> to vector<8x128xf32>
    %219 = arith.negf %218 : vector<8x128xf32>
    %220 = math.exp %219 : vector<8x128xf32>
    %cst_56 = arith.constant 1.000000e+00 : f32
    %221 = vector.broadcast %cst_56 : f32 to vector<8x128xf32>
    %222 = arith.addf %221, %220 : vector<8x128xf32>
    %223 = arith.divf %221, %222 : vector<8x128xf32>
    %224 = vector.extract_strided_slice %217 {offsets = [0, 128], sizes = [8, 128], strides = [1, 1]} : vector<8x512xf32> to vector<8x128xf32>
    %225 = arith.negf %224 : vector<8x128xf32>
    %226 = math.exp %225 : vector<8x128xf32>
    %cst_57 = arith.constant 1.000000e+00 : f32
    %227 = vector.broadcast %cst_57 : f32 to vector<8x128xf32>
    %228 = arith.addf %227, %226 : vector<8x128xf32>
    %229 = arith.divf %227, %228 : vector<8x128xf32>
    %230 = vector.extract_strided_slice %217 {offsets = [0, 256], sizes = [8, 128], strides = [1, 1]} : vector<8x512xf32> to vector<8x128xf32>
    %231 = math.tanh %230 : vector<8x128xf32>
    %232 = vector.extract_strided_slice %217 {offsets = [0, 384], sizes = [8, 128], strides = [1, 1]} : vector<8x512xf32> to vector<8x128xf32>
    %233 = arith.negf %232 : vector<8x128xf32>
    %234 = math.exp %233 : vector<8x128xf32>
    %cst_58 = arith.constant 1.000000e+00 : f32
    %235 = vector.broadcast %cst_58 : f32 to vector<8x128xf32>
    %236 = arith.addf %235, %234 : vector<8x128xf32>
    %237 = arith.divf %235, %236 : vector<8x128xf32>
    %238 = arith.mulf %229, %209 : vector<8x128xf32>
    %239 = arith.mulf %223, %231 : vector<8x128xf32>
    %240 = arith.addf %238, %239 : vector<8x128xf32>
    %241 = math.tanh %240 : vector<8x128xf32>
    %242 = arith.mulf %237, %241 : vector<8x128xf32>
    %243 = arith.addi %3, %c4_i32 : i32
    %244 = vector.broadcast %243 : i32 to vector<8x1xi32>
    %245 = arith.cmpi slt, %244, %4 : vector<8x1xi32>
    %cst_59 = arith.constant 0.000000e+00 : f32
    %246 = vector.shape_cast %245 : vector<8x1xi1> to vector<8x1xi1>
    %247 = vector.broadcast %246 : vector<8x1xi1> to vector<8x128xi1>
    %248 = vector.broadcast %cst_59 : f32 to vector<8x128xf32>
    %249 = arith.select %247, %242, %248 : vector<8x128xi1>, vector<8x128xf32>
    %250 = arith.index_cast %c4_i32 : i32 to index
    %c0_60 = arith.constant 0 : index
    %c0_61 = arith.constant 0 : index
    %251 = vector.load %arg7[%250, %c0_60, %c0_61] : memref<8x8x128xf32, #tpu.memory_space<vmem>>, vector<1x8x128xf32>
    %252 = vector.shape_cast %251 : vector<1x8x128xf32> to vector<8x128xf32>
    %253 = vector.shape_cast %249 : vector<8x128xf32> to vector<1x8x128xf32>
    tpu.vector_store %arg7[%250, %c0_60, %c0_61], %253 {strides = array<i32>} : memref<8x8x128xf32, #tpu.memory_space<vmem>>, vector<1x8x128xf32>,
    %254 = vector.shape_cast %245 : vector<8x1xi1> to vector<8x1xi1>
    %255 = vector.broadcast %254 : vector<8x1xi1> to vector<8x128xi1>
    %256 = arith.select %255, %242, %206 : vector<8x128xi1>, vector<8x128xf32>
    %257 = vector.shape_cast %245 : vector<8x1xi1> to vector<8x1xi1>
    %258 = vector.broadcast %257 : vector<8x1xi1> to vector<8x128xi1>
    %259 = arith.select %258, %240, %209 : vector<8x128xi1>, vector<8x128xf32>
    %c5_i32 = arith.constant 5 : i32
    %260 = arith.index_cast %c5_i32 : i32 to index
    %c0_62 = arith.constant 0 : index
    %c0_63 = arith.constant 0 : index
    %261 = vector.load %arg2[%260, %c0_62, %c0_63] : memref<8x8x128xf32, #tpu.memory_space<vmem>>, vector<1x8x128xf32>
    %262 = vector.shape_cast %261 : vector<1x8x128xf32> to vector<8x128xf32>
    %cst_64 = arith.constant dense<0.000000e+00> : vector<8x512xf32>
    %263 = tpu.matmul %262, %5, %cst_64 {dimension_numbers = #tpu.dot_dimension_numbers<[1], [0], [0], [1], [0, 0, 1, 1], [], []>} : vector<8x128xf32>, vector<128x512xf32>, vector<8x512xf32> -> vector<8x512xf32>
    %cst_65 = arith.constant dense<0.000000e+00> : vector<8x512xf32>
    %264 = tpu.matmul %256, %6, %cst_65 {dimension_numbers = #tpu.dot_dimension_numbers<[1], [0], [0], [1], [0, 0, 1, 1], [], []>} : vector<8x128xf32>, vector<128x512xf32>, vector<8x512xf32> -> vector<8x512xf32>
    %265 = arith.addf %263, %264 : vector<8x512xf32>
    %266 = vector.broadcast %7 : vector<1x512xf32> to vector<8x512xf32>
    %267 = arith.addf %265, %266 : vector<8x512xf32>
    %268 = vector.extract_strided_slice %267 {offsets = [0, 0], sizes = [8, 128], strides = [1, 1]} : vector<8x512xf32> to vector<8x128xf32>
    %269 = arith.negf %268 : vector<8x128xf32>
    %270 = math.exp %269 : vector<8x128xf32>
    %cst_66 = arith.constant 1.000000e+00 : f32
    %271 = vector.broadcast %cst_66 : f32 to vector<8x128xf32>
    %272 = arith.addf %271, %270 : vector<8x128xf32>
    %273 = arith.divf %271, %272 : vector<8x128xf32>
    %274 = vector.extract_strided_slice %267 {offsets = [0, 128], sizes = [8, 128], strides = [1, 1]} : vector<8x512xf32> to vector<8x128xf32>
    %275 = arith.negf %274 : vector<8x128xf32>
    %276 = math.exp %275 : vector<8x128xf32>
    %cst_67 = arith.constant 1.000000e+00 : f32
    %277 = vector.broadcast %cst_67 : f32 to vector<8x128xf32>
    %278 = arith.addf %277, %276 : vector<8x128xf32>
    %279 = arith.divf %277, %278 : vector<8x128xf32>
    %280 = vector.extract_strided_slice %267 {offsets = [0, 256], sizes = [8, 128], strides = [1, 1]} : vector<8x512xf32> to vector<8x128xf32>
    %281 = math.tanh %280 : vector<8x128xf32>
    %282 = vector.extract_strided_slice %267 {offsets = [0, 384], sizes = [8, 128], strides = [1, 1]} : vector<8x512xf32> to vector<8x128xf32>
    %283 = arith.negf %282 : vector<8x128xf32>
    %284 = math.exp %283 : vector<8x128xf32>
    %cst_68 = arith.constant 1.000000e+00 : f32
    %285 = vector.broadcast %cst_68 : f32 to vector<8x128xf32>
    %286 = arith.addf %285, %284 : vector<8x128xf32>
    %287 = arith.divf %285, %286 : vector<8x128xf32>
    %288 = arith.mulf %279, %259 : vector<8x128xf32>
    %289 = arith.mulf %273, %281 : vector<8x128xf32>
    %290 = arith.addf %288, %289 : vector<8x128xf32>
    %291 = math.tanh %290 : vector<8x128xf32>
    %292 = arith.mulf %287, %291 : vector<8x128xf32>
    %293 = arith.addi %3, %c5_i32 : i32
    %294 = vector.broadcast %293 : i32 to vector<8x1xi32>
    %295 = arith.cmpi slt, %294, %4 : vector<8x1xi32>
    %cst_69 = arith.constant 0.000000e+00 : f32
    %296 = vector.shape_cast %295 : vector<8x1xi1> to vector<8x1xi1>
    %297 = vector.broadcast %296 : vector<8x1xi1> to vector<8x128xi1>
    %298 = vector.broadcast %cst_69 : f32 to vector<8x128xf32>
    %299 = arith.select %297, %292, %298 : vector<8x128xi1>, vector<8x128xf32>
    %300 = arith.index_cast %c5_i32 : i32 to index
    %c0_70 = arith.constant 0 : index
    %c0_71 = arith.constant 0 : index
    %301 = vector.load %arg7[%300, %c0_70, %c0_71] : memref<8x8x128xf32, #tpu.memory_space<vmem>>, vector<1x8x128xf32>
    %302 = vector.shape_cast %301 : vector<1x8x128xf32> to vector<8x128xf32>
    %303 = vector.shape_cast %299 : vector<8x128xf32> to vector<1x8x128xf32>
    tpu.vector_store %arg7[%300, %c0_70, %c0_71], %303 {strides = array<i32>} : memref<8x8x128xf32, #tpu.memory_space<vmem>>, vector<1x8x128xf32>,
    %304 = vector.shape_cast %295 : vector<8x1xi1> to vector<8x1xi1>
    %305 = vector.broadcast %304 : vector<8x1xi1> to vector<8x128xi1>
    %306 = arith.select %305, %292, %256 : vector<8x128xi1>, vector<8x128xf32>
    %307 = vector.shape_cast %295 : vector<8x1xi1> to vector<8x1xi1>
    %308 = vector.broadcast %307 : vector<8x1xi1> to vector<8x128xi1>
    %309 = arith.select %308, %290, %259 : vector<8x128xi1>, vector<8x128xf32>
    %c6_i32 = arith.constant 6 : i32
    %310 = arith.index_cast %c6_i32 : i32 to index
    %c0_72 = arith.constant 0 : index
    %c0_73 = arith.constant 0 : index
    %311 = vector.load %arg2[%310, %c0_72, %c0_73] : memref<8x8x128xf32, #tpu.memory_space<vmem>>, vector<1x8x128xf32>
    %312 = vector.shape_cast %311 : vector<1x8x128xf32> to vector<8x128xf32>
    %cst_74 = arith.constant dense<0.000000e+00> : vector<8x512xf32>
    %313 = tpu.matmul %312, %5, %cst_74 {dimension_numbers = #tpu.dot_dimension_numbers<[1], [0], [0], [1], [0, 0, 1, 1], [], []>} : vector<8x128xf32>, vector<128x512xf32>, vector<8x512xf32> -> vector<8x512xf32>
    %cst_75 = arith.constant dense<0.000000e+00> : vector<8x512xf32>
    %314 = tpu.matmul %306, %6, %cst_75 {dimension_numbers = #tpu.dot_dimension_numbers<[1], [0], [0], [1], [0, 0, 1, 1], [], []>} : vector<8x128xf32>, vector<128x512xf32>, vector<8x512xf32> -> vector<8x512xf32>
    %315 = arith.addf %313, %314 : vector<8x512xf32>
    %316 = vector.broadcast %7 : vector<1x512xf32> to vector<8x512xf32>
    %317 = arith.addf %315, %316 : vector<8x512xf32>
    %318 = vector.extract_strided_slice %317 {offsets = [0, 0], sizes = [8, 128], strides = [1, 1]} : vector<8x512xf32> to vector<8x128xf32>
    %319 = arith.negf %318 : vector<8x128xf32>
    %320 = math.exp %319 : vector<8x128xf32>
    %cst_76 = arith.constant 1.000000e+00 : f32
    %321 = vector.broadcast %cst_76 : f32 to vector<8x128xf32>
    %322 = arith.addf %321, %320 : vector<8x128xf32>
    %323 = arith.divf %321, %322 : vector<8x128xf32>
    %324 = vector.extract_strided_slice %317 {offsets = [0, 128], sizes = [8, 128], strides = [1, 1]} : vector<8x512xf32> to vector<8x128xf32>
    %325 = arith.negf %324 : vector<8x128xf32>
    %326 = math.exp %325 : vector<8x128xf32>
    %cst_77 = arith.constant 1.000000e+00 : f32
    %327 = vector.broadcast %cst_77 : f32 to vector<8x128xf32>
    %328 = arith.addf %327, %326 : vector<8x128xf32>
    %329 = arith.divf %327, %328 : vector<8x128xf32>
    %330 = vector.extract_strided_slice %317 {offsets = [0, 256], sizes = [8, 128], strides = [1, 1]} : vector<8x512xf32> to vector<8x128xf32>
    %331 = math.tanh %330 : vector<8x128xf32>
    %332 = vector.extract_strided_slice %317 {offsets = [0, 384], sizes = [8, 128], strides = [1, 1]} : vector<8x512xf32> to vector<8x128xf32>
    %333 = arith.negf %332 : vector<8x128xf32>
    %334 = math.exp %333 : vector<8x128xf32>
    %cst_78 = arith.constant 1.000000e+00 : f32
    %335 = vector.broadcast %cst_78 : f32 to vector<8x128xf32>
    %336 = arith.addf %335, %334 : vector<8x128xf32>
    %337 = arith.divf %335, %336 : vector<8x128xf32>
    %338 = arith.mulf %329, %309 : vector<8x128xf32>
    %339 = arith.mulf %323, %331 : vector<8x128xf32>
    %340 = arith.addf %338, %339 : vector<8x128xf32>
    %341 = math.tanh %340 : vector<8x128xf32>
    %342 = arith.mulf %337, %341 : vector<8x128xf32>
    %343 = arith.addi %3, %c6_i32 : i32
    %344 = vector.broadcast %343 : i32 to vector<8x1xi32>
    %345 = arith.cmpi slt, %344, %4 : vector<8x1xi32>
    %cst_79 = arith.constant 0.000000e+00 : f32
    %346 = vector.shape_cast %345 : vector<8x1xi1> to vector<8x1xi1>
    %347 = vector.broadcast %346 : vector<8x1xi1> to vector<8x128xi1>
    %348 = vector.broadcast %cst_79 : f32 to vector<8x128xf32>
    %349 = arith.select %347, %342, %348 : vector<8x128xi1>, vector<8x128xf32>
    %350 = arith.index_cast %c6_i32 : i32 to index
    %c0_80 = arith.constant 0 : index
    %c0_81 = arith.constant 0 : index
    %351 = vector.load %arg7[%350, %c0_80, %c0_81] : memref<8x8x128xf32, #tpu.memory_space<vmem>>, vector<1x8x128xf32>
    %352 = vector.shape_cast %351 : vector<1x8x128xf32> to vector<8x128xf32>
    %353 = vector.shape_cast %349 : vector<8x128xf32> to vector<1x8x128xf32>
    tpu.vector_store %arg7[%350, %c0_80, %c0_81], %353 {strides = array<i32>} : memref<8x8x128xf32, #tpu.memory_space<vmem>>, vector<1x8x128xf32>,
    %354 = vector.shape_cast %345 : vector<8x1xi1> to vector<8x1xi1>
    %355 = vector.broadcast %354 : vector<8x1xi1> to vector<8x128xi1>
    %356 = arith.select %355, %342, %306 : vector<8x128xi1>, vector<8x128xf32>
    %357 = vector.shape_cast %345 : vector<8x1xi1> to vector<8x1xi1>
    %358 = vector.broadcast %357 : vector<8x1xi1> to vector<8x128xi1>
    %359 = arith.select %358, %340, %309 : vector<8x128xi1>, vector<8x128xf32>
    %c7_i32 = arith.constant 7 : i32
    %360 = arith.index_cast %c7_i32 : i32 to index
    %c0_82 = arith.constant 0 : index
    %c0_83 = arith.constant 0 : index
    %361 = vector.load %arg2[%360, %c0_82, %c0_83] : memref<8x8x128xf32, #tpu.memory_space<vmem>>, vector<1x8x128xf32>
    %362 = vector.shape_cast %361 : vector<1x8x128xf32> to vector<8x128xf32>
    %cst_84 = arith.constant dense<0.000000e+00> : vector<8x512xf32>
    %363 = tpu.matmul %362, %5, %cst_84 {dimension_numbers = #tpu.dot_dimension_numbers<[1], [0], [0], [1], [0, 0, 1, 1], [], []>} : vector<8x128xf32>, vector<128x512xf32>, vector<8x512xf32> -> vector<8x512xf32>
    %cst_85 = arith.constant dense<0.000000e+00> : vector<8x512xf32>
    %364 = tpu.matmul %356, %6, %cst_85 {dimension_numbers = #tpu.dot_dimension_numbers<[1], [0], [0], [1], [0, 0, 1, 1], [], []>} : vector<8x128xf32>, vector<128x512xf32>, vector<8x512xf32> -> vector<8x512xf32>
    %365 = arith.addf %363, %364 : vector<8x512xf32>
    %366 = vector.broadcast %7 : vector<1x512xf32> to vector<8x512xf32>
    %367 = arith.addf %365, %366 : vector<8x512xf32>
    %368 = vector.extract_strided_slice %367 {offsets = [0, 0], sizes = [8, 128], strides = [1, 1]} : vector<8x512xf32> to vector<8x128xf32>
    %369 = arith.negf %368 : vector<8x128xf32>
    %370 = math.exp %369 : vector<8x128xf32>
    %cst_86 = arith.constant 1.000000e+00 : f32
    %371 = vector.broadcast %cst_86 : f32 to vector<8x128xf32>
    %372 = arith.addf %371, %370 : vector<8x128xf32>
    %373 = arith.divf %371, %372 : vector<8x128xf32>
    %374 = vector.extract_strided_slice %367 {offsets = [0, 128], sizes = [8, 128], strides = [1, 1]} : vector<8x512xf32> to vector<8x128xf32>
    %375 = arith.negf %374 : vector<8x128xf32>
    %376 = math.exp %375 : vector<8x128xf32>
    %cst_87 = arith.constant 1.000000e+00 : f32
    %377 = vector.broadcast %cst_87 : f32 to vector<8x128xf32>
    %378 = arith.addf %377, %376 : vector<8x128xf32>
    %379 = arith.divf %377, %378 : vector<8x128xf32>
    %380 = vector.extract_strided_slice %367 {offsets = [0, 256], sizes = [8, 128], strides = [1, 1]} : vector<8x512xf32> to vector<8x128xf32>
    %381 = math.tanh %380 : vector<8x128xf32>
    %382 = vector.extract_strided_slice %367 {offsets = [0, 384], sizes = [8, 128], strides = [1, 1]} : vector<8x512xf32> to vector<8x128xf32>
    %383 = arith.negf %382 : vector<8x128xf32>
    %384 = math.exp %383 : vector<8x128xf32>
    %cst_88 = arith.constant 1.000000e+00 : f32
    %385 = vector.broadcast %cst_88 : f32 to vector<8x128xf32>
    %386 = arith.addf %385, %384 : vector<8x128xf32>
    %387 = arith.divf %385, %386 : vector<8x128xf32>
    %388 = arith.mulf %379, %359 : vector<8x128xf32>
    %389 = arith.mulf %373, %381 : vector<8x128xf32>
    %390 = arith.addf %388, %389 : vector<8x128xf32>
    %391 = math.tanh %390 : vector<8x128xf32>
    %392 = arith.mulf %387, %391 : vector<8x128xf32>
    %393 = arith.addi %3, %c7_i32 : i32
    %394 = vector.broadcast %393 : i32 to vector<8x1xi32>
    %395 = arith.cmpi slt, %394, %4 : vector<8x1xi32>
    %cst_89 = arith.constant 0.000000e+00 : f32
    %396 = vector.shape_cast %395 : vector<8x1xi1> to vector<8x1xi1>
    %397 = vector.broadcast %396 : vector<8x1xi1> to vector<8x128xi1>
    %398 = vector.broadcast %cst_89 : f32 to vector<8x128xf32>
    %399 = arith.select %397, %392, %398 : vector<8x128xi1>, vector<8x128xf32>
    %400 = arith.index_cast %c7_i32 : i32 to index
    %c0_90 = arith.constant 0 : index
    %c0_91 = arith.constant 0 : index
    %401 = vector.load %arg7[%400, %c0_90, %c0_91] : memref<8x8x128xf32, #tpu.memory_space<vmem>>, vector<1x8x128xf32>
    %402 = vector.shape_cast %401 : vector<1x8x128xf32> to vector<8x128xf32>
    %403 = vector.shape_cast %399 : vector<8x128xf32> to vector<1x8x128xf32>
    tpu.vector_store %arg7[%400, %c0_90, %c0_91], %403 {strides = array<i32>} : memref<8x8x128xf32, #tpu.memory_space<vmem>>, vector<1x8x128xf32>,
    %404 = vector.shape_cast %395 : vector<8x1xi1> to vector<8x1xi1>
    %405 = vector.broadcast %404 : vector<8x1xi1> to vector<8x128xi1>
    %406 = arith.select %405, %392, %356 : vector<8x128xi1>, vector<8x128xf32>
    %407 = vector.shape_cast %395 : vector<8x1xi1> to vector<8x1xi1>
    %408 = vector.broadcast %407 : vector<8x1xi1> to vector<8x128xi1>
    %409 = arith.select %408, %390, %359 : vector<8x128xi1>, vector<8x128xf32>
    %c8_i32_92 = arith.constant 8 : i32
    %c0_93 = arith.constant 0 : index
    %c0_94 = arith.constant 0 : index
    %410 = vector.load %arg8[%c0_93, %c0_94] : memref<8x128xf32, #tpu.memory_space<vmem>>, vector<8x128xf32>
    tpu.vector_store %arg8[%c0_93, %c0_94], %406 {strides = array<i32>} : memref<8x128xf32, #tpu.memory_space<vmem>>, vector<8x128xf32>,
    %c0_95 = arith.constant 0 : index
    %c0_96 = arith.constant 0 : index
    %411 = vector.load %arg9[%c0_95, %c0_96] : memref<8x128xf32, #tpu.memory_space<vmem>>, vector<8x128xf32>
    tpu.vector_store %arg9[%c0_95, %c0_96], %409 {strides = array<i32>} : memref<8x128xf32, #tpu.memory_space<vmem>>, vector<8x128xf32>,
    return
  }
  func.func @transform_0(%arg0: i32, %arg1: i32) -> (i32, i32, i32) {
    %c0_i32 = arith.constant 0 : i32
    %c0_i32_0 = arith.constant 0 : i32
    return %arg1, %arg0, %c0_i32 : i32, i32, i32
  }
  func.func @transform_1(%arg0: i32, %arg1: i32) -> (i32, i32) {
    %c0_i32 = arith.constant 0 : i32
    %c0_i32_0 = arith.constant 0 : i32
    return %arg0, %c0_i32 : i32, i32
  }
  func.func @transform_2(%arg0: i32, %arg1: i32) -> (i32, i32) {
    %c0_i32 = arith.constant 0 : i32
    %c0_i32_0 = arith.constant 0 : i32
    %c0_i32_1 = arith.constant 0 : i32
    return %c0_i32, %c0_i32_0 : i32, i32
  }
  func.func @transform_3(%arg0: i32, %arg1: i32) -> (i32, i32) {
    %c0_i32 = arith.constant 0 : i32
    %c0_i32_0 = arith.constant 0 : i32
    %c0_i32_1 = arith.constant 0 : i32
    return %c0_i32, %c0_i32_0 : i32, i32
  }
  func.func @transform_4(%arg0: i32, %arg1: i32) -> (i32, i32) {
    %c0_i32 = arith.constant 0 : i32
    %c0_i32_0 = arith.constant 0 : i32
    %c0_i32_1 = arith.constant 0 : i32
    return %c0_i32, %c0_i32_0 : i32, i32
  }
  func.func @transform_5(%arg0: i32, %arg1: i32) -> (i32, i32, i32) {
    %c0_i32 = arith.constant 0 : i32
    %c0_i32_0 = arith.constant 0 : i32
    return %arg1, %arg0, %c0_i32 : i32, i32, i32
  }
}

</mosaic_0001>

<bundles_post_ra>
// kernel: tpu_custom_call.1
= control target key start
LH: loop header
LB: loop body
LE: loop exit
PB: predicated region body
PF: predicated region fallthrough
CT: control target
= control target key end

     0   :  { %10 = vsyncpa [#allocation5], 0  ;;  %s5377_s0 = inlined_call_operand.hbm [shape: f32[8,8,128], index: 0, kind: input, shape index: {}]   ;;  %s5378_s1 = inlined_call_operand.vmem [shape: s32[8,1], index: 1, kind: input, shape index: {}]   ;;  %s5379_s2 = inlined_call_operand.hbm [shape: f32[128,512], index: 2, kind: input, shape index: {}]   ;;  %s5380_s3 = inlined_call_operand.hbm [shape: f32[128,512], index: 3, kind: input, shape index: {}]   ;;  %s5381_s4 = inlined_call_operand.vmem [shape: f32[1,512], index: 4, kind: input, shape index: {}]   ;;  %s5382_s5 = inlined_call_operand.hbm [shape: f32[8,8,128], index: 5, kind: output, shape index: {}]  }
   0x1   :  { %11 = vsyncpa [#allocation8], 0 }
   0x2   :  { %12 = vsyncpa [#allocation6], 0  ;;  %s3371_s18 = smov [#allocation7]  }
   0x3   :  { %s32_s19 = sshll.u32 %s3371_s18, 4  ;;  %s33_s19 = int_to_ptr.vmem [resolvable:$true] %s32_s19 }
   0x4   :  { %s3293_s20 = scalar_lea.vmem %s33_s19, 8192  ;;  %p3298_p1 = scmp.lt.s32.totalorder %s33_s19, %s33_s19 }
   0x5   :  { %p3294_p0 = scmp.ne.s32.totalorder %s33_s19, %s3293_s20  ;;  %p3299_p2 = scmp.lt.s32.totalorder %s3293_s20, %s3293_s20 }
   0x7   :  { %p3300_p3 = por %p3299_p2, %p3298_p1 }
   0x9   :  { %p3301_p4 = pnand %p3300_p3, %p3294_p0 }
   0xb   :  { %3304 = shalt.err (!%p3301_p4)
}
   0xc   :  { %s3372_s21 = smov 512   ;;  %s3373_s22 = smov 32  }
   0xd   :  { %38 = dma.hbm_to_vmem [thread:$0]  %s5379_s2, 8192, %s33_s19, [#allocation8], %s3372_s21, %s3372_s21, %s3373_s22  }
   0xe   :  { %s3374_s25 = smov [#allocation4]  }
   0xf   :  { %s18_s26 = sshll.u32 %s3374_s25, 4  ;;  %s19_s26 = int_to_ptr.vmem [resolvable:$true] %s18_s26 }
  0x10   :  { %s3313_s27 = scalar_lea.vmem %s19_s26, 1024  ;;  %p3318_p6 = scmp.lt.s32.totalorder %s19_s26, %s19_s26 }
  0x11   :  { %p3314_p5 = scmp.ne.s32.totalorder %s19_s26, %s3313_s27  ;;  %p3319_p7 = scmp.lt.s32.totalorder %s3313_s27, %s3313_s27 }
  0x13   :  { %p3320_p8 = por %p3319_p7, %p3318_p6 }
  0x15   :  { %p3321_p9 = pnand %p3320_p8, %p3314_p5 }
  0x17   :  { %3324 = shalt.err (!%p3321_p9)
}
  0x18   :  { %s3375_s28 = smov 128   ;;  %s3376_s29 = smov 8  }
  0x19   :  { %24 = dma.hbm_to_vmem [thread:$0]  %s5377_s0, 1024, %s19_s26, [#allocation5], %s3375_s28, %s3375_s28, %s3376_s29  }
  0x1a   :  { %s3377_s2 = smov [#allocation9]  }
  0x1b   :  { %s44_s7 = sshll.u32 %s3377_s2, 4  ;;  %s45_s7 = int_to_ptr.vmem [resolvable:$true] %s44_s7 }
  0x1c   :  { %s3333_s8 = scalar_lea.vmem %s45_s7, 8192  ;;  %p3338_p11 = scmp.lt.s32.totalorder %s45_s7, %s45_s7 }
  0x1d   :  { %p3334_p10 = scmp.ne.s32.totalorder %s45_s7, %s3333_s8  ;;  %p3339_p12 = scmp.lt.s32.totalorder %s3333_s8, %s3333_s8 }
  0x1f   :  { %p3340_p13 = por %p3339_p12, %p3338_p11 }
  0x21   :  { %p3341_p0 = pnand %p3340_p13, %p3334_p10 }
  0x23   :  { %3344 = shalt.err (!%p3341_p0)
}
  0x24   :  { %50 = dma.hbm_to_vmem [thread:$0]  %s5380_s3, 8192, %s45_s7, [#allocation8], %s3372_s21, %s3372_s21, %s3373_s22  }
  0x25   :  { %3365 = dma.done.wait [#allocation5], 1024  }
  0x26   :  { %3366 = vsyncadd [#allocation5], 4294966272 }
  0x27   :  { %3367 = dma.done.wait [#allocation8], 16384  }
  0x28   :  { %3368 = vsyncadd [#allocation8], 4294950912  ;;  %v5385_v0 = vmov 0.0   ;;  %v5383_v1 = vmov 0   ;;  %v3427_v2 = vld [vmem:[#allocation9 + $0x1e8] sm:$0xff]  ;;  %v3429_v3 = vld [vmem:[#allocation9 + $0x1f8] sm:$0xff] }
  0x29   :  { %266 = vmatprep.mubr.f32.mxu0 %v5385_v0  ;;  %337 = vmatprep.mubr.f32.mxu1 %v5385_v0  ;;  %v3431_v4 = vld [vmem:[#allocation9 + $0x1e0] sm:$0xff]  ;;  %v3435_v5 = vld [vmem:[#allocation9 + $0x1f0] sm:$0xff]  ;;  %v3437_v6 = vld [vmem:[#allocation9 + $0x1c8] sm:$0xff] }
  0x2a   :  { %2899 = vset.pattern.permute.xlu0 %v5383_v1  ;;  %2900 = vset.pattern.permute.xlu1 %v5383_v1  ;;  %v3439_v7 = vld [vmem:[#allocation9 + $0x1d8] sm:$0xff]  ;;  %v3443_v8 = vld [vmem:[#allocation9 + $0x1c0] sm:$0xff]  ;;  %v3445_v9 = vld [vmem:[#allocation9 + $0x1d0] sm:$0xff] }
  0x2b   :  { %202 = vmatprep.subr.mxu0 %v3427_v2  ;;  %273 = vmatprep.subr.mxu1 %v3429_v3  ;;  %v3447_v10 = vld [vmem:[#allocation9 + $0x1a8] sm:$0xff]  ;;  %v3451_v11 = vld [vmem:[#allocation9 + $0x1b8] sm:$0xff]  ;;  %v3453_v12 = vld [vmem:[#allocation9 + $0x1a0] sm:$0xff] }
  0x2c   :  { %203 = vmatpush1.msra.mxu0 %v3431_v4  ;;  %274 = vmatpush1.msra.mxu1 %v3435_v5  ;;  %v3455_v13 = vld [vmem:[#allocation9 + $0x1b0] sm:$0xff]  ;;  %v3459_v14 = vld [vmem:[#allocation9 + $0x188] sm:$0xff]  ;;  %v3461_v15 = vld [vmem:[#allocation9 + $0x198] sm:$0xff] }
  0x2d   :  { %204 = vmatprep.subr.mxu0 %v3437_v6  ;;  %275 = vmatprep.subr.mxu1 %v3439_v7  ;;  %v3465_v16 = vld [vmem:[#allocation9 + $0x180] sm:$0xff]  ;;  %v3467_v17 = vld [vmem:[#allocation9 + $0x190] sm:$0xff]  ;;  %v3471_v18 = vld [vmem:[#allocation9 + $0x168] sm:$0xff] }
  0x2e   :  { %205 = vmatpush1.msra.mxu0 %v3443_v8  ;;  %276 = vmatpush1.msra.mxu1 %v3445_v9  ;;  %v3473_v19 = vld [vmem:[#allocation9 + $0x178] sm:$0xff]  ;;  %v3477_v20 = vld [vmem:[#allocation9 + $0x160] sm:$0xff]  ;;  %v3479_v21 = vld [vmem:[#allocation9 + $0x170] sm:$0xff] }
  0x2f   :  { %206 = vmatprep.subr.mxu0 %v3447_v10  ;;  %277 = vmatprep.subr.mxu1 %v3451_v11  ;;  %v3483_v22 = vld [vmem:[#allocation9 + $0x148] sm:$0xff]  ;;  %v3485_v23 = vld [vmem:[#allocation9 + $0x158] sm:$0xff]  ;;  %v3489_v24 = vld [vmem:[#allocation9 + $0x140] sm:$0xff] }
  0x30   :  { %207 = vmatpush1.msra.mxu0 %v3453_v12  ;;  %278 = vmatpush1.msra.mxu1 %v3455_v13  ;;  %v3491_v25 = vld [vmem:[#allocation9 + $0x150] sm:$0xff]  ;;  %v3495_v26 = vld [vmem:[#allocation9 + $0x128] sm:$0xff]  ;;  %v3497_v27 = vld [vmem:[#allocation9 + $0x138] sm:$0xff] }
  0x31   :  { %208 = vmatprep.subr.mxu0 %v3459_v14  ;;  %279 = vmatprep.subr.mxu1 %v3461_v15  ;;  %v3501_v28 = vld [vmem:[#allocation9 + $0x120] sm:$0xff]  ;;  %v3503_v29 = vld [vmem:[#allocation9 + $0x130] sm:$0xff]  ;;  %v3507_v30 = vld [vmem:[#allocation9 + $0x108] sm:$0xff] }
  0x32   :  { %209 = vmatpush1.msra.mxu0 %v3465_v16  ;;  %280 = vmatpush1.msra.mxu1 %v3467_v17  ;;  %v3509_v31 = vld [vmem:[#allocation9 + $0x118] sm:$0xff]  ;;  %v3513_v32 = vld [vmem:[#allocation9 + $0x100] sm:$0xff]  ;;  %v3515_v33 = vld [vmem:[#allocation9 + $0x110] sm:$0xff] }
  0x33   :  { %210 = vmatprep.subr.mxu0 %v3471_v18  ;;  %281 = vmatprep.subr.mxu1 %v3473_v19  ;;  %v3519_v34 = vld [vmem:[#allocation9 + $0xe8] sm:$0xff]  ;;  %v3521_v35 = vld [vmem:[#allocation9 + $0xf8] sm:$0xff]  ;;  %v3525_v36 = vld [vmem:[#allocation9 + $0xe0] sm:$0xff] }
  0x34   :  { %211 = vmatpush1.msra.mxu0 %v3477_v20  ;;  %282 = vmatpush1.msra.mxu1 %v3479_v21  ;;  %5786 = vst [vmem:[#allocation14_spill] sm:$0xff] %v3521_v35  ;;  %5787 = vst [vmem:[#allocation15_spill] sm:$0xff] %v3525_v36  ;;  %v3527_v37 = vld [vmem:[#allocation9 + $0xf0] sm:$0xff]  ;;  %v3531_v38 = vld [vmem:[#allocation9 + $0xc8] sm:$0xff] }
  0x35   :  { %212 = vmatprep.subr.mxu0 %v3483_v22  ;;  %283 = vmatprep.subr.mxu1 %v3485_v23  ;;  %5788 = vst [vmem:[#allocation16_spill] sm:$0xff] %v3527_v37  ;;  %5789 = vst [vmem:[#allocation17_spill] sm:$0xff] %v3531_v38  ;;  %v3533_v39 = vld [vmem:[#allocation9 + $0xd8] sm:$0xff]  ;;  %v3537_v40 = vld [vmem:[#allocation9 + $0xc0] sm:$0xff] }
  0x36   :  { %213 = vmatpush1.msra.mxu0 %v3489_v24  ;;  %284 = vmatpush1.msra.mxu1 %v3491_v25  ;;  %5790 = vst [vmem:[#allocation18_spill] sm:$0xff] %v3533_v39  ;;  %5791 = vst [vmem:[#allocation19_spill] sm:$0xff] %v3537_v40  ;;  %v3539_v41 = vld [vmem:[#allocation9 + $0xd0] sm:$0xff]  ;;  %v3543_v42 = vld [vmem:[#allocation9 + $0xa8] sm:$0xff] }
  0x37   :  { %214 = vmatprep.subr.mxu0 %v3495_v26  ;;  %285 = vmatprep.subr.mxu1 %v3497_v27  ;;  %5792 = vst [vmem:[#allocation20_spill] sm:$0xff] %v3539_v41  ;;  %5793 = vst [vmem:[#allocation21_spill] sm:$0xff] %v3543_v42  ;;  %v3545_v43 = vld [vmem:[#allocation9 + $0xb8] sm:$0xff]  ;;  %v3549_v44 = vld [vmem:[#allocation9 + $0xa0] sm:$0xff] }
  0x38   :  { %215 = vmatpush1.msra.mxu0 %v3501_v28  ;;  %286 = vmatpush1.msra.mxu1 %v3503_v29  ;;  %5794 = vst [vmem:[#allocation22_spill] sm:$0xff] %v3545_v43  ;;  %5795 = vst [vmem:[#allocation23_spill] sm:$0xff] %v3549_v44  ;;  %v3551_v45 = vld [vmem:[#allocation9 + $0xb0] sm:$0xff]  ;;  %v3555_v46 = vld [vmem:[#allocation9 + $0x88] sm:$0xff] }
  0x39   :  { %216 = vmatprep.subr.mxu0 %v3507_v30  ;;  %287 = vmatprep.subr.mxu1 %v3509_v31  ;;  %5796 = vst [vmem:[#allocation24_spill] sm:$0xff] %v3551_v45  ;;  %5797 = vst [vmem:[#allocation25_spill] sm:$0xff] %v3555_v46  ;;  %v3557_v47 = vld [vmem:[#allocation9 + $0x98] sm:$0xff]  ;;  %v3561_v48 = vld [vmem:[#allocation9 + $0x80] sm:$0xff] }
  0x3a   :  { %217 = vmatpush1.msra.mxu0 %v3513_v32  ;;  %288 = vmatpush1.msra.mxu1 %v3515_v33  ;;  %5798 = vst [vmem:[#allocation26_spill] sm:$0xff] %v3557_v47  ;;  %5799 = vst [vmem:[#allocation27_spill] sm:$0xff] %v3561_v48  ;;  %v3563_v49 = vld [vmem:[#allocation9 + $0x90] sm:$0xff]  ;;  %v3567_v50 = vld [vmem:[#allocation9 + $0x68] sm:$0xff] }
  0x3b   :  { %218 = vmatprep.subr.mxu0 %v3519_v34  ;;  %289 = vmatprep.subr.mxu1 %v3521_v35  ;;  %5800 = vst [vmem:[#allocation28_spill] sm:$0xff] %v3563_v49  ;;  %5801 = vst [vmem:[#allocation29_spill] sm:$0xff] %v3567_v50  ;;  %v3569_v51 = vld [vmem:[#allocation9 + $0x78] sm:$0xff]  ;;  %v3573_v52 = vld [vmem:[#allocation9 + $0x60] sm:$0xff] }
  0x3c   :  { %219 = vmatpush1.msra.mxu0 %v3525_v36  ;;  %290 = vmatpush1.msra.mxu1 %v3527_v37  ;;  %5802 = vst [vmem:[#allocation30_spill] sm:$0xff] %v3569_v51  ;;  %5803 = vst [vmem:[#allocation31_spill] sm:$0xff] %v3573_v52  ;;  %v3575_v53 = vld [vmem:[#allocation9 + $0x70] sm:$0xff]  ;;  %v3579_v54 = vld [vmem:[#allocation9 + $0x48] sm:$0xff] }
  0x3d   :  { %220 = vmatprep.subr.mxu0 %v3531_v38  ;;  %291 = vmatprep.subr.mxu1 %v3533_v39  ;;  %5804 = vst [vmem:[#allocation32_spill] sm:$0xff] %v3575_v53  ;;  %5805 = vst [vmem:[#allocation33_spill] sm:$0xff] %v3579_v54  ;;  %v3581_v55 = vld [vmem:[#allocation9 + $0x58] sm:$0xff]  ;;  %v3585_v56 = vld [vmem:[#allocation9 + $0x40] sm:$0xff] }
  0x3e   :  { %221 = vmatpush1.msra.mxu0 %v3537_v40  ;;  %292 = vmatpush1.msra.mxu1 %v3539_v41  ;;  %5806 = vst [vmem:[#allocation34_spill] sm:$0xff] %v3581_v55  ;;  %5807 = vst [vmem:[#allocation35_spill] sm:$0xff] %v3585_v56  ;;  %v3587_v57 = vld [vmem:[#allocation9 + $0x50] sm:$0xff]  ;;  %v3591_v58 = vld [vmem:[#allocation9 + $0x28] sm:$0xff] }
  0x3f   :  { %222 = vmatprep.subr.mxu0 %v3543_v42  ;;  %293 = vmatprep.subr.mxu1 %v3545_v43  ;;  %5808 = vst [vmem:[#allocation36_spill] sm:$0xff] %v3587_v57  ;;  %5809 = vst [vmem:[#allocation37_spill] sm:$0xff] %v3591_v58  ;;  %v3593_v59 = vld [vmem:[#allocation9 + $0x38] sm:$0xff]  ;;  %v3597_v60 = vld [vmem:[#allocation9 + $0x20] sm:$0xff] }
  0x40   :  { %223 = vmatpush1.msra.mxu0 %v3549_v44  ;;  %294 = vmatpush1.msra.mxu1 %v3551_v45  ;;  %5810 = vst [vmem:[#allocation38_spill] sm:$0xff] %v3593_v59  ;;  %5811 = vst [vmem:[#allocation39_spill] sm:$0xff] %v3597_v60  ;;  %v3599_v61 = vld [vmem:[#allocation9 + $0x30] sm:$0xff]  ;;  %v3603_v62 = vld [vmem:[#allocation9 + $0x8] sm:$0xff] }
  0x41   :  { %224 = vmatprep.subr.mxu0 %v3555_v46  ;;  %295 = vmatprep.subr.mxu1 %v3557_v47  ;;  %5812 = vst [vmem:[#allocation40_spill] sm:$0xff] %v3599_v61  ;;  %5813 = vst [vmem:[#allocation41_spill] sm:$0xff] %v3603_v62  ;;  %v3605_v63 = vld [vmem:[#allocation9 + $0x18] sm:$0xff]  ;;  %v3609_v1 = vld [vmem:[#allocation9] sm:$0xff] }
  0x42   :  { %225 = vmatpush1.msra.mxu0 %v3561_v48  ;;  %296 = vmatpush1.msra.mxu1 %v3563_v49  ;;  %5814 = vst [vmem:[#allocation42_spill] sm:$0xff] %v3605_v63  ;;  %5815 = vst [vmem:[#allocation43_spill] sm:$0xff] %v3609_v1  ;;  %v3611_v0 = vld [vmem:[#allocation9 + $0x10] sm:$0xff] }
  0x43   :  { %226 = vmatprep.subr.mxu0 %v3567_v50  ;;  %297 = vmatprep.subr.mxu1 %v3569_v51  ;;  %5816 = vst [vmem:[#allocation44_spill] sm:$0xff] %v3611_v0 }
  0x44   :  { %227 = vmatpush1.msra.mxu0 %v3573_v52  ;;  %298 = vmatpush1.msra.mxu1 %v3575_v53  ;;  %v3808_v53 = vld [vmem:[#allocation7] sm:$0xff] }
  0x45   :  { %228 = vmatprep.subr.mxu0 %v3579_v54  ;;  %299 = vmatprep.subr.mxu1 %v3581_v55  ;;  %v3615_v55 = vld [vmem:[#allocation7 + $0x1e8] sm:$0xff] }
  0x46   :  { %229 = vmatpush1.msra.mxu0 %v3585_v56  ;;  %300 = vmatpush1.msra.mxu1 %v3587_v57  ;;  %5817 = vst [vmem:[#allocation45_spill] sm:$0xff] %v3615_v55  ;;  %v3619_v57 = vld [vmem:[#allocation7 + $0x1f8] sm:$0xff]  ;;  %v5821_v56 = vmov 0.0   ;;  %v3653_v54 = vld [vmem:[#allocation7 + $0x188] sm:$0xff] }
  0x47   :  { %230 = vmatprep.subr.mxu0 %v3591_v58  ;;  %301 = vmatprep.subr.mxu1 %v3593_v59  ;;  %5818 = vst [vmem:[#allocation46_spill] sm:$0xff] %v3619_v57  ;;  %v3623_v59 = vld [vmem:[#allocation7 + $0x1e0] sm:$0xff]  ;;  %v3625_v58 = vld [vmem:[#allocation7 + $0x1f0] sm:$0xff]  ;;  %5830 = vst [vmem:[#allocation57_spill] sm:$0xff] %v3653_v54 }
  0x48   :  { %231 = vmatpush1.msra.mxu0 %v3597_v60  ;;  %302 = vmatpush1.msra.mxu1 %v3599_v61  ;;  %5819 = vst [vmem:[#allocation47_spill] sm:$0xff] %v3623_v59  ;;  %5820 = vst [vmem:[#allocation48_spill] sm:$0xff] %v3625_v58  ;;  %v3629_v61 = vld [vmem:[#allocation7 + $0x1c8] sm:$0xff]  ;;  %v3631_v60 = vld [vmem:[#allocation7 + $0x1d8] sm:$0xff] }
  0x49   :  { %232 = vmatprep.subr.mxu0 %v3603_v62  ;;  %303 = vmatprep.subr.mxu1 %v3605_v63  ;;  %5822 = vst [vmem:[#allocation49_spill] sm:$0xff] %v3629_v61  ;;  %5823 = vst [vmem:[#allocation50_spill] sm:$0xff] %v3631_v60  ;;  %v3635_v63 = vld [vmem:[#allocation7 + $0x1c0] sm:$0xff]  ;;  %v3643_v62 = vld [vmem:[#allocation7 + $0x1b8] sm:$0xff] }
  0x4a   :  { %233 = vmatpush1.msra.mxu0 %v3609_v1  ;;  %304 = vmatpush1.msra.mxu1 %v3611_v0  ;;  %5824 = vst [vmem:[#allocation51_spill] sm:$0xff] %v3635_v63  ;;  %v3637_v1 = vld [vmem:[#allocation7 + $0x1d0] sm:$0xff]  ;;  %v3641_v0 = vld [vmem:[#allocation7 + $0x1a8] sm:$0xff]  ;;  %5827 = vst [vmem:[#allocation54_spill] sm:$0xff] %v3643_v62 }
  0x4b   :  { %267 = vmatmul.mubr.f32.vlgmr.msra.gmra.mxu0 %v5821_v56  ;;  %344 = vmatprep.subr.mxu0 %v3615_v55  ;;  %5825 = vst [vmem:[#allocation52_spill] sm:$0xff] %v3637_v1  ;;  %5826 = vst [vmem:[#allocation53_spill] sm:$0xff] %v3641_v0  ;;  %v3647_v55 = vld [vmem:[#allocation7 + $0x1a0] sm:$0xff] }
  0x4c   :  { %415 = vmatprep.subr.mxu1 %v3619_v57  ;;  %338 = vmatmul.mubr.f32.vlgmr.msra.gmra.mxu1 %v5821_v56  ;;  %5828 = vst [vmem:[#allocation55_spill] sm:$0xff] %v3647_v55  ;;  %v3649_v57 = vld [vmem:[#allocation7 + $0x1b0] sm:$0xff] }
  0x4d   :  { %345 = vmatpush1.msra.mxu0 %v3623_v59  ;;  %416 = vmatpush1.msra.mxu1 %v3625_v58  ;;  %5829 = vst [vmem:[#allocation56_spill] sm:$0xff] %v3649_v57  ;;  %v3655_v59 = vld [vmem:[#allocation7 + $0x198] sm:$0xff]  ;;  %v3659_v58 = vld [vmem:[#allocation7 + $0x180] sm:$0xff] }
  0x4e   :  { %346 = vmatprep.subr.mxu0 %v3629_v61  ;;  %417 = vmatprep.subr.mxu1 %v3631_v60  ;;  %5831 = vst [vmem:[#allocation58_spill] sm:$0xff] %v3655_v59  ;;  %5832 = vst [vmem:[#allocation59_spill] sm:$0xff] %v3659_v58  ;;  %v3661_v61 = vld [vmem:[#allocation7 + $0x190] sm:$0xff]  ;;  %v3665_v60 = vld [vmem:[#allocation7 + $0x168] sm:$0xff] }
  0x4f   :  { %347 = vmatpush1.msra.mxu0 %v3635_v63  ;;  %418 = vmatpush1.msra.mxu1 %v3637_v1  ;;  %5833 = vst [vmem:[#allocation60_spill] sm:$0xff] %v3661_v61  ;;  %5834 = vst [vmem:[#allocation61_spill] sm:$0xff] %v3665_v60  ;;  %v3667_v63 = vld [vmem:[#allocation7 + $0x178] sm:$0xff]  ;;  %v3671_v1 = vld [vmem:[#allocation7 + $0x160] sm:$0xff] }
  0x50   :  { %348 = vmatprep.subr.mxu0 %v3641_v0  ;;  %419 = vmatprep.subr.mxu1 %v3643_v62  ;;  %5835 = vst [vmem:[#allocation62_spill] sm:$0xff] %v3667_v63  ;;  %5836 = vst [vmem:[#allocation63_spill] sm:$0xff] %v3671_v1  ;;  %v3673_v0 = vld [vmem:[#allocation7 + $0x170] sm:$0xff]  ;;  %v3677_v62 = vld [vmem:[#allocation7 + $0x148] sm:$0xff] }
  0x51   :  { %349 = vmatpush1.msra.mxu0 %v3647_v55  ;;  %420 = vmatpush1.msra.mxu1 %v3649_v57  ;;  %5837 = vst [vmem:[#allocation64_spill] sm:$0xff] %v3673_v0  ;;  %5838 = vst [vmem:[#allocation65_spill] sm:$0xff] %v3677_v62  ;;  %v3679_v55 = vld [vmem:[#allocation7 + $0x158] sm:$0xff]  ;;  %v3683_v57 = vld [vmem:[#allocation7 + $0x140] sm:$0xff] }
  0x52   :  { %350 = vmatprep.subr.mxu0 %v3653_v54  ;;  %421 = vmatprep.subr.mxu1 %v3655_v59  ;;  %5839 = vst [vmem:[#allocation66_spill] sm:$0xff] %v3679_v55  ;;  %5840 = vst [vmem:[#allocation67_spill] sm:$0xff] %v3683_v57  ;;  %v3685_v54 = vld [vmem:[#allocation7 + $0x150] sm:$0xff]  ;;  %v3689_v59 = vld [vmem:[#allocation7 + $0x128] sm:$0xff] }
  0x53   :  { %351 = vmatpush1.msra.mxu0 %v3659_v58  ;;  %422 = vmatpush1.msra.mxu1 %v3661_v61  ;;  %5841 = vst [vmem:[#allocation68_spill] sm:$0xff] %v3685_v54  ;;  %5842 = vst [vmem:[#allocation69_spill] sm:$0xff] %v3689_v59  ;;  %v3691_v58 = vld [vmem:[#allocation7 + $0x138] sm:$0xff]  ;;  %v3695_v61 = vld [vmem:[#allocation7 + $0x120] sm:$0xff] }
  0x54   :  { %352 = vmatprep.subr.mxu0 %v3665_v60  ;;  %423 = vmatprep.subr.mxu1 %v3667_v63  ;;  %5843 = vst [vmem:[#allocation70_spill] sm:$0xff] %v3691_v58  ;;  %5844 = vst [vmem:[#allocation71_spill] sm:$0xff] %v3695_v61  ;;  %v3697_v60 = vld [vmem:[#allocation7 + $0x130] sm:$0xff]  ;;  %v3701_v63 = vld [vmem:[#allocation7 + $0x108] sm:$0xff] }
  0x55   :  { %353 = vmatpush1.msra.mxu0 %v3671_v1  ;;  %424 = vmatpush1.msra.mxu1 %v3673_v0  ;;  %5845 = vst [vmem:[#allocation72_spill] sm:$0xff] %v3697_v60  ;;  %5846 = vst [vmem:[#allocation73_spill] sm:$0xff] %v3701_v63  ;;  %v3703_v1 = vld [vmem:[#allocation7 + $0x118] sm:$0xff]  ;;  %v3707_v0 = vld [vmem:[#allocation7 + $0x100] sm:$0xff] }
  0x56   :  { %354 = vmatprep.subr.mxu0 %v3677_v62  ;;  %425 = vmatprep.subr.mxu1 %v3679_v55  ;;  %5847 = vst [vmem:[#allocation74_spill] sm:$0xff] %v3703_v1  ;;  %5848 = vst [vmem:[#allocation75_spill] sm:$0xff] %v3707_v0  ;;  %v3709_v62 = vld [vmem:[#allocation7 + $0x110] sm:$0xff]  ;;  %v3713_v55 = vld [vmem:[#allocation7 + $0xe8] sm:$0xff] }
  0x57   :  { %355 = vmatpush1.msra.mxu0 %v3683_v57  ;;  %426 = vmatpush1.msra.mxu1 %v3685_v54  ;;  %5849 = vst [vmem:[#allocation76_spill] sm:$0xff] %v3709_v62  ;;  %5850 = vst [vmem:[#allocation77_spill] sm:$0xff] %v3713_v55  ;;  %v3715_v57 = vld [vmem:[#allocation7 + $0xf8] sm:$0xff]  ;;  %v3719_v54 = vld [vmem:[#allocation7 + $0xe0] sm:$0xff] }
  0x58   :  { %356 = vmatprep.subr.mxu0 %v3689_v59  ;;  %427 = vmatprep.subr.mxu1 %v3691_v58  ;;  %5851 = vst [vmem:[#allocation78_spill] sm:$0xff] %v3715_v57  ;;  %5852 = vst [vmem:[#allocation79_spill] sm:$0xff] %v3719_v54  ;;  %v3721_v59 = vld [vmem:[#allocation7 + $0xf0] sm:$0xff]  ;;  %v3725_v58 = vld [vmem:[#allocation7 + $0xc8] sm:$0xff] }
  0x59   :  { %357 = vmatpush1.msra.mxu0 %v3695_v61  ;;  %428 = vmatpush1.msra.mxu1 %v3697_v60  ;;  %5853 = vst [vmem:[#allocation80_spill] sm:$0xff] %v3721_v59  ;;  %5854 = vst [vmem:[#allocation81_spill] sm:$0xff] %v3725_v58  ;;  %v3727_v61 = vld [vmem:[#allocation7 + $0xd8] sm:$0xff]  ;;  %v3731_v60 = vld [vmem:[#allocation7 + $0xc0] sm:$0xff] }
  0x5a   :  { %358 = vmatprep.subr.mxu0 %v3701_v63  ;;  %429 = vmatprep.subr.mxu1 %v3703_v1  ;;  %5855 = vst [vmem:[#allocation82_spill] sm:$0xff] %v3727_v61  ;;  %5856 = vst [vmem:[#allocation83_spill] sm:$0xff] %v3731_v60  ;;  %v3733_v63 = vld [vmem:[#allocation7 + $0xd0] sm:$0xff]  ;;  %v3737_v1 = vld [vmem:[#allocation7 + $0xa8] sm:$0xff] }
  0x5b   :  { %359 = vmatpush1.msra.mxu0 %v3707_v0  ;;  %430 = vmatpush1.msra.mxu1 %v3709_v62  ;;  %5857 = vst [vmem:[#allocation84_spill] sm:$0xff] %v3733_v63  ;;  %5858 = vst [vmem:[#allocation85_spill] sm:$0xff] %v3737_v1  ;;  %v3739_v0 = vld [vmem:[#allocation7 + $0xb8] sm:$0xff]  ;;  %v3743_v62 = vld [vmem:[#allocation7 + $0xa0] sm:$0xff] }
  0x5c   :  { %360 = vmatprep.subr.mxu0 %v3713_v55  ;;  %431 = vmatprep.subr.mxu1 %v3715_v57  ;;  %5859 = vst [vmem:[#allocation86_spill] sm:$0xff] %v3739_v0  ;;  %5860 = vst [vmem:[#allocation87_spill] sm:$0xff] %v3743_v62  ;;  %v3745_v55 = vld [vmem:[#allocation7 + $0xb0] sm:$0xff]  ;;  %v3749_v57 = vld [vmem:[#allocation7 + $0x88] sm:$0xff] }
  0x5d   :  { %361 = vmatpush1.msra.mxu0 %v3719_v54  ;;  %432 = vmatpush1.msra.mxu1 %v3721_v59  ;;  %5861 = vst [vmem:[#allocation88_spill] sm:$0xff] %v3745_v55  ;;  %5862 = vst [vmem:[#allocation89_spill] sm:$0xff] %v3749_v57  ;;  %v3751_v54 = vld [vmem:[#allocation7 + $0x98] sm:$0xff]  ;;  %v3755_v59 = vld [vmem:[#allocation7 + $0x80] sm:$0xff] }
  0x5e   :  { %362 = vmatprep.subr.mxu0 %v3725_v58  ;;  %433 = vmatprep.subr.mxu1 %v3727_v61  ;;  %5863 = vst [vmem:[#allocation90_spill] sm:$0xff] %v3751_v54  ;;  %5864 = vst [vmem:[#allocation91_spill] sm:$0xff] %v3755_v59  ;;  %v3757_v58 = vld [vmem:[#allocation7 + $0x90] sm:$0xff]  ;;  %v3761_v61 = vld [vmem:[#allocation7 + $0x68] sm:$0xff] }
  0x5f   :  { %363 = vmatpush1.msra.mxu0 %v3731_v60  ;;  %434 = vmatpush1.msra.mxu1 %v3733_v63  ;;  %5865 = vst [vmem:[#allocation92_spill] sm:$0xff] %v3757_v58  ;;  %5866 = vst [vmem:[#allocation93_spill] sm:$0xff] %v3761_v61  ;;  %v3763_v60 = vld [vmem:[#allocation7 + $0x78] sm:$0xff]  ;;  %v3767_v63 = vld [vmem:[#allocation7 + $0x60] sm:$0xff] }
  0x60   :  { %364 = vmatprep.subr.mxu0 %v3737_v1  ;;  %435 = vmatprep.subr.mxu1 %v3739_v0  ;;  %5867 = vst [vmem:[#allocation94_spill] sm:$0xff] %v3763_v60  ;;  %5868 = vst [vmem:[#allocation95_spill] sm:$0xff] %v3767_v63  ;;  %v3769_v1 = vld [vmem:[#allocation7 + $0x70] sm:$0xff]  ;;  %v3773_v0 = vld [vmem:[#allocation7 + $0x48] sm:$0xff] }
  0x61   :  { %365 = vmatpush1.msra.mxu0 %v3743_v62  ;;  %436 = vmatpush1.msra.mxu1 %v3745_v55  ;;  %5869 = vst [vmem:[#allocation96_spill] sm:$0xff] %v3769_v1  ;;  %v3775_v62 = vld [vmem:[#allocation7 + $0x58] sm:$0xff]  ;;  %v3779_v55 = vld [vmem:[#allocation7 + $0x40] sm:$0xff] }
  0x62   :  { %366 = vmatprep.subr.mxu0 %v3749_v57  ;;  %437 = vmatprep.subr.mxu1 %v3751_v54  ;;  %5870 = vst [vmem:[#allocation97_spill] sm:$0xff] %v3775_v62  ;;  %v3781_v57 = vld [vmem:[#allocation7 + $0x50] sm:$0xff]  ;;  %v3785_v54 = vld [vmem:[#allocation7 + $0x28] sm:$0xff] }
  0x63   :  { %367 = vmatpush1.msra.mxu0 %v3755_v59  ;;  %438 = vmatpush1.msra.mxu1 %v3757_v58  ;;  %5871 = vst [vmem:[#allocation98_spill] sm:$0xff] %v3781_v57  ;;  %5872 = vst [vmem:[#allocation99_spill] sm:$0xff] %v3785_v54  ;;  %v3787_v59 = vld [vmem:[#allocation7 + $0x38] sm:$0xff]  ;;  %v3792_v58 = vld [vmem:[%s5378_s1] sm:$0xff] }
  0x64   :  { %368 = vmatprep.subr.mxu0 %v3761_v61  ;;  %439 = vmatprep.subr.mxu1 %v3763_v60  ;;  %5873 = vst [vmem:[#allocation100_spill] sm:$0xff] %v3787_v59  ;;  %5874 = vst [vmem:[#allocation101_spill] sm:$0xff] %v3792_v58  ;;  %v3796_v60 = vld [vmem:[#allocation7 + $0x20] sm:$0xff]  ;;  %v3798_v61 = vld [vmem:[#allocation7 + $0x30] sm:$0xff]  ;;  %vm2858_vm0 = vcmp.gt.s32.totalorder %v3792_v58, 0  ;;  %vm2862_vm1 = vcmp.gt.s32.totalorder %v3792_v58, 1 }
  0x65   :  { %369 = vmatpush1.msra.mxu0 %v3767_v63  ;;  %440 = vmatpush1.msra.mxu1 %v3769_v1  ;;  %v3802_v1 = vld [vmem:[#allocation7 + $0x8] sm:$0xff]  ;;  %v3804_v63 = vld [vmem:[#allocation7 + $0x18] sm:$0xff]  ;;  %vm2874_vm2 = vcmp.gt.s32.totalorder %v3792_v58, 4  ;;  %vm2882_vm3 = vcmp.gt.s32.totalorder %v3792_v58, 6  ;;  %v5881_v58 = vld [vmem:[#allocation36_spill] sm:$0xff] }
  0x66   :  { %370 = vmatprep.subr.mxu0 %v3773_v0  ;;  %441 = vmatprep.subr.mxu1 %v3775_v62  ;;  %5875 = vst [vmem:[#allocation102_spill] sm:$0xff] %v3804_v63  ;;  %v3813_v62 = vld [vmem:[#allocation7 + $0x10] sm:$0xff] }
  0x67   :  { %371 = vmatpush1.msra.mxu0 %v3779_v55  ;;  %442 = vmatpush1.msra.mxu1 %v3781_v57  ;;  %v201_v57 = vld [vmem:[#allocation4] sm:$0xff] }
  0x68   :  { %372 = vmatprep.subr.mxu0 %v3785_v54  ;;  %443 = vmatprep.subr.mxu1 %v3787_v59  ;;  %v5876_v59 = vmov 0  }
  0x69   :  { %373 = vmatpush1.msra.mxu0 %v3796_v60  ;;  %444 = vmatpush1.msra.mxu1 %v3798_v61  ;;  %v537_v54 = vsel %vm2858_vm0, 1, %v5876_v59 }
  0x6a   :  { %374 = vmatprep.subr.mxu0 %v3802_v1  ;;  %445 = vmatprep.subr.mxu1 %v3804_v63  ;;  %v863_v63 = vsel %vm2862_vm1, 1, %v5876_v59 }
  0x6b   :  { %375 = vmatpush1.msra.mxu0 %v3808_v53  ;;  %408 = vmatprep.mubr.f32.mxu0 %v5821_v56 }
  0x6c   :  { %446 = vmatpush1.msra.mxu1 %v3813_v62  ;;  %479 = vmatprep.mubr.f32.mxu1 %v5821_v56 }
  0x6d   :  { %409 = vmatmul.mubr.f32.vlgmr.msra.gmra.mxu0 %v201_v57  ;;  %480 = vmatmul.mubr.f32.vlgmr.msra.gmra.mxu1 %v201_v57  ;;  %v2498_v57 = vsel %vm2882_vm3, 1, %v5876_v59 }
  0x6e   :  { %539 = vperm.xlu0 %2899, %v537_v54   ;;  %548 = vmatprep.subr.mxu0 %v3427_v2  ;;  %v1844_v54 = vsel %vm2874_vm2, 1, %v5876_v59  ;;  %v5880_v59 = vld [vmem:[#allocation35_spill] sm:$0xff] }
  0x6f   :  { %619 = vmatprep.subr.mxu1 %v3429_v3  ;;  %549 = vmatpush1.msra.mxu0 %v3431_v4 }
  0x70   :  { %620 = vmatpush1.msra.mxu1 %v3435_v5  ;;  %550 = vmatprep.subr.mxu0 %v3437_v6 }
  0x71   :  { %621 = vmatprep.subr.mxu1 %v3439_v7  ;;  %551 = vmatpush1.msra.mxu0 %v3443_v8 }
  0x72   :  { %865 = vperm.xlu0 %2899, %v863_v63   ;;  %622 = vmatpush1.msra.mxu1 %v3445_v9  ;;  %v5877_v63 = vld [vmem:[#allocation32_spill] sm:$0xff] }
  0x73   :  { %552 = vmatprep.subr.mxu0 %v3447_v10  ;;  %623 = vmatprep.subr.mxu1 %v3451_v11 }
  0x74   :  { %553 = vmatpush1.msra.mxu0 %v3453_v12  ;;  %624 = vmatpush1.msra.mxu1 %v3455_v13 }
  0x75   :  { %554 = vmatprep.subr.mxu0 %v3459_v14  ;;  %625 = vmatprep.subr.mxu1 %v3461_v15 }
  0x76   :  { %1846 = vperm.xlu0 %2899, %v1844_v54   ;;  %555 = vmatpush1.msra.mxu0 %v3465_v16  ;;  %v5878_v54 = vld [vmem:[#allocation33_spill] sm:$0xff] }
  0x77   :  { %626 = vmatpush1.msra.mxu1 %v3467_v17  ;;  %556 = vmatprep.subr.mxu0 %v3471_v18 }
  0x78   :  { %627 = vmatprep.subr.mxu1 %v3473_v19  ;;  %557 = vmatpush1.msra.mxu0 %v3477_v20 }
  0x79   :  { %628 = vmatpush1.msra.mxu1 %v3479_v21  ;;  %558 = vmatprep.subr.mxu0 %v3483_v22 }
  0x7a   :  { %2500 = vperm.xlu0 %2899, %v2498_v57   ;;  %629 = vmatprep.subr.mxu1 %v3485_v23  ;;  %v5879_v57 = vld [vmem:[#allocation34_spill] sm:$0xff] }
  0x7b   :  { %559 = vmatpush1.msra.mxu0 %v3489_v24  ;;  %630 = vmatpush1.msra.mxu1 %v3491_v25 }
  0x7c   :  { %560 = vmatprep.subr.mxu0 %v3495_v26  ;;  %631 = vmatprep.subr.mxu1 %v3497_v27 }
  0x7d   :  { %561 = vmatpush1.msra.mxu0 %v3501_v28  ;;  %632 = vmatpush1.msra.mxu1 %v3503_v29 }
  0x7e   :  { %562 = vmatprep.subr.mxu0 %v3507_v30  ;;  %633 = vmatprep.subr.mxu1 %v3509_v31 }
  0x7f   :  { %563 = vmatpush1.msra.mxu0 %v3513_v32  ;;  %634 = vmatpush1.msra.mxu1 %v3515_v33 }
  0x80   :  { %564 = vmatprep.subr.mxu0 %v3519_v34  ;;  %635 = vmatprep.subr.mxu1 %v3521_v35 }
  0x81   :  { %565 = vmatpush1.msra.mxu0 %v3525_v36  ;;  %636 = vmatpush1.msra.mxu1 %v3527_v37 }
  0x82   :  { %566 = vmatprep.subr.mxu0 %v3531_v38  ;;  %637 = vmatprep.subr.mxu1 %v3533_v39 }
  0x83   :  { %567 = vmatpush1.msra.mxu0 %v3537_v40  ;;  %638 = vmatpush1.msra.mxu1 %v3539_v41 }
  0x84   :  { %568 = vmatprep.subr.mxu0 %v3543_v42  ;;  %639 = vmatprep.subr.mxu1 %v3545_v43 }
  0x85   :  { %569 = vmatpush1.msra.mxu0 %v3549_v44  ;;  %640 = vmatpush1.msra.mxu1 %v3551_v45 }
  0x86   :  { %570 = vmatprep.subr.mxu0 %v3555_v46  ;;  %641 = vmatprep.subr.mxu1 %v3557_v47  ;;  %v5882_v47 = vld [vmem:[#allocation37_spill] sm:$0xff] }
  0x87   :  { %571 = vmatpush1.msra.mxu0 %v3561_v48  ;;  %642 = vmatpush1.msra.mxu1 %v3563_v49  ;;  %v5883_v48 = vld [vmem:[#allocation38_spill] sm:$0xff]  ;;  %v5884_v49 = vld [vmem:[#allocation39_spill] sm:$0xff] }
  0x88   :  { %572 = vmatprep.subr.mxu0 %v3567_v50  ;;  %643 = vmatprep.subr.mxu1 %v3569_v51  ;;  %v5885_v50 = vld [vmem:[#allocation40_spill] sm:$0xff]  ;;  %v5886_v51 = vld [vmem:[#allocation41_spill] sm:$0xff] }
  0x89   :  { %573 = vmatpush1.msra.mxu0 %v3573_v52  ;;  %644 = vmatpush1.msra.mxu1 %v5877_v63  ;;  %v5887_v52 = vld [vmem:[#allocation42_spill] sm:$0xff]  ;;  %v5888_v63 = vld [vmem:[#allocation43_spill] sm:$0xff] }
  0x8a   :  { %574 = vmatprep.subr.mxu0 %v5878_v54  ;;  %645 = vmatprep.subr.mxu1 %v5879_v57  ;;  %v5889_v54 = vld [vmem:[#allocation44_spill] sm:$0xff] }
  0x8b   :  { %575 = vmatpush1.msra.mxu0 %v5880_v59  ;;  %646 = vmatpush1.msra.mxu1 %v5881_v58  ;;  %v5890_v58 = vld [vmem:[#allocation45_spill] sm:$0xff] }
  0x8c   :  { %576 = vmatprep.subr.mxu0 %v5882_v47  ;;  %647 = vmatprep.subr.mxu1 %v5883_v48  ;;  %v5891_v47 = vld [vmem:[#allocation46_spill] sm:$0xff]  ;;  %v487_v48 = vlaneseq }
  0x8d   :  { %577 = vmatpush1.msra.mxu0 %v5884_v49  ;;  %648 = vmatpush1.msra.mxu1 %v5885_v50 }
  0x8e   :  { %578 = vmatprep.subr.mxu0 %v5886_v51  ;;  %649 = vmatprep.subr.mxu1 %v5887_v52  ;;  %v488_v49 = vshrl.u32 %v487_v48, 7  ;;  %v198_v52 = vld [vmem:[%s5381_s4] sm:$0xf]  ;;  %s3380_s4 = smov [#allocation10]  }
  0x8f   :  { %579 = vmatpush1.msra.mxu0 %v5888_v63  ;;  %650 = vmatpush1.msra.mxu1 %v5889_v54  ;;  %s2842_s12 = sshll.u32 %s3380_s4, 4  ;;  %s2843_s12 = int_to_ptr.vmem [resolvable:$true] %s2842_s12 }
  0x90   :  { %612 = vmatprep.mubr.f32.mxu0 %v5821_v56  ;;  %683 = vmatprep.mubr.f32.mxu1 %v5821_v56  ;;  %v489_v50 = vsub.s32 0, %v488_v49  ;;  %v493_v63 = vsub.s32 1, %v488_v49  ;;  %v501_v39 = vsub.s32 3, %v488_v49  ;;  %v497_v35 = vsub.s32 2, %v488_v49  ;;  %s3345_s13 = scalar_lea.vmem %s2843_s12, 1024  ;;  %p3350_p2 = scmp.lt.s32.totalorder %s2843_s12, %s2843_s12 }
  0x91   :  { %690 = vmatprep.subr.mxu0 %v5890_v58  ;;  %761 = vmatprep.subr.mxu1 %v5891_v47  ;;  %p3346_p1 = scmp.ne.s32.totalorder %s2843_s12, %s3345_s13  ;;  %p3351_p3 = scmp.lt.s32.totalorder %s3345_s13, %s3345_s13 }
  0x92   :  { %v3899_v54 = vrot.slane %v198_v52, %v489_v50  ;;  %v3901_v43 = vrot.slane %v198_v52, %v493_v63  ;;  %v3905_v36 = vrot.slane %v198_v52, %v501_v39  ;;  %v3908_v63 = vrot.slane %v198_v52, %v497_v35 }
  0x93   :  { %p3352_p4 = por %p3351_p3, %p3350_p2 }
  0x94   :  { %5892 = vst [vmem:[#allocation103_spill] sm:$0xff] %v3899_v54 }
  0x95   :  { %p3353_p5 = pnand %p3352_p4, %p3346_p1 }
 0x10b   :  { %v268_v59 = vpop.f32.mrf.mxu0 }
 0x10c   :  { %v339_v51 = vpop.f32.mrf.mxu1 }
 0x10d   :  { %v270_v57 = vpop.f32.mrf.mxu0 }
 0x10e   :  { %v341_v45 = vpop.f32.mrf.mxu1 }
 0x12d   :  { %v410_v46 = vpop.f32.mrf.mxu0  ;;  %v481_v48 = vpop.f32.mrf.mxu1 }
 0x12e   :  { %v411_v44 = vadd.f32 %v410_v46, %v268_v59  ;;  %v482_v59 = vadd.f32 %v481_v48, %v339_v51 }
 0x12f   :  { %v412_v58 = vpop.f32.mrf.mxu0  ;;  %v483_v37 = vpop.f32.mrf.mxu1 }
 0x130   :  { %v507_v47 = vadd.f32 %v3899_v54, %v411_v44  ;;  %v413_v42 = vadd.f32 %v412_v58, %v270_v57  ;;  %v484_v50 = vadd.f32 %v483_v37, %v341_v45 }
 0x132   :  { %v2855_v41 = vmul.f32 -1.442695, %v507_v47  ;;  %v508_v40 = vadd.f32 %v3901_v43, %v413_v42  ;;  %v510_v46 = vadd.f32 %v3905_v36, %v484_v50  ;;  %v509_v47 = vadd.f32 %v3908_v63, %v482_v59  ;;  %v5893_v59 = vld [vmem:[#allocation47_spill] sm:$0xff] }
 0x134   :  { %2901 = vpow2.f32 %v2855_v41  ;;  %v2856_v38 = vmul.f32 -1.442695, %v508_v40  ;;  %v2857_v44 = vmul.f32 -1.442695, %v510_v46  ;;  %v540_v41 = vpop.permute.xlu0 %539 }
 0x135   :  { %vm541_vm4 = vcmp.eq.s32.totalorder %v540_v41, 1  ;;  %v5902_v41 = vld [vmem:[#allocation56_spill] sm:$0xff] }
 0x136   :  { %2903 = vpow2.f32 %v2856_v38 }
 0x137   :  { %2905 = vpow2.f32 %v2857_v44  ;;  %v5894_v44 = vld [vmem:[#allocation48_spill] sm:$0xff] }
 0x141   :  { %v2902_v54 = vpop.eup %2901 }
 0x142   :  { %v514_v58 = vadd.f32 1.0, %v2902_v54 }
 0x143   :  { %v2904_v42 = vpop.eup %2903 }
 0x144   :  { %2907 = vrcp.f32 %v514_v58  ;;  %v520_v40 = vadd.f32 1.0, %v2904_v42  ;;  %v2906_v37 = vpop.eup %2905  ;;  %v5896_v58 = vld [vmem:[#allocation50_spill] sm:$0xff]  ;;  %v5897_v42 = vld [vmem:[#allocation51_spill] sm:$0xff] }
 0x145   :  { %2909 = vtanh.f32 %v509_v47  ;;  %v527_v49 = vadd.f32 1.0, %v2906_v37  ;;  %v5895_v47 = vld [vmem:[#allocation49_spill] sm:$0xff] }
 0x146   :  { %2911 = vrcp.f32 %v520_v40  ;;  %v5898_v40 = vld [vmem:[#allocation52_spill] sm:$0xff]  ;;  %v5899_v37 = vld [vmem:[#allocation53_spill] sm:$0xff] }
 0x147   :  { %2913 = vrcp.f32 %v527_v49  ;;  %v5904_v49 = vld [vmem:[#allocation58_spill] sm:$0xff] }
 0x151   :  { %v2908_v38 = vpop.eup %2907 }
 0x152   :  { %v2910_v39 = vpop.eup %2909 }
 0x153   :  { %v2912_v45 = vpop.eup %2911  ;;  %v531_v35 = vmul.f32 %v2910_v39, %v2908_v38  ;;  %v5900_v38 = vld [vmem:[#allocation54_spill] sm:$0xff]  ;;  %v5901_v39 = vld [vmem:[#allocation55_spill] sm:$0xff] }
 0x154   :  { %v530_v51 = vmul.f32 0.0, %v2912_v45  ;;  %v2914_v54 = vpop.eup %2913  ;;  %v5903_v45 = vld [vmem:[#allocation57_spill] sm:$0xff] }
 0x156   :  { %v532_v52 = vadd.f32 %v531_v35, %v530_v51  ;;  %v5905_v51 = vld [vmem:[#allocation59_spill] sm:$0xff]  ;;  %v5906_v35 = vld [vmem:[#allocation60_spill] sm:$0xff] }
 0x158   :  { %2915 = vtanh.f32 %v532_v52  ;;  %v3911_v57 = vsel %vm541_vm4, %v532_v52, 0.0  ;;  %v5907_v52 = vld [vmem:[#allocation61_spill] sm:$0xff] }
 0x165   :  { %v2916_v48 = vpop.eup %2915 }
 0x166   :  { %v534_v50 = vmul.f32 %v2916_v48, %v2914_v54  ;;  %v5908_v54 = vld [vmem:[#allocation62_spill] sm:$0xff]  ;;  %v5909_v48 = vld [vmem:[#allocation63_spill] sm:$0xff] }
 0x168   :  { %v3913_v46 = vsel %vm541_vm4, %v534_v50, 0.0  ;;  %2887 = vmatmul.mubr.msk.f32.vlgmr.msra.gmra.mxu0 %vm541_vm4, %v534_v50  ;;  %2888 = vmatmul.mubr.msk.f32.vlgmr.msra.gmra.mxu1 %vm541_vm4, %v534_v50  ;;  %v5910_v50 = vld [vmem:[#allocation64_spill] sm:$0xff] }
 0x169   :  { %543 = vst [vmem:[#allocation10] sm:$0xff] %v3913_v46  ;;  %691 = vmatpush1.msra.mxu0 %v5893_v59  ;;  %762 = vmatpush1.msra.mxu1 %v5894_v44 }
 0x16a   :  { %692 = vmatprep.subr.mxu0 %v5895_v47  ;;  %763 = vmatprep.subr.mxu1 %v5896_v58 }
 0x16b   :  { %693 = vmatpush1.msra.mxu0 %v5897_v42  ;;  %764 = vmatpush1.msra.mxu1 %v5898_v40 }
 0x16c   :  { %694 = vmatprep.subr.mxu0 %v5899_v37  ;;  %765 = vmatprep.subr.mxu1 %v5900_v38  ;;  %v5911_v38 = vld [vmem:[#allocation65_spill] sm:$0xff] }
 0x16d   :  { %695 = vmatpush1.msra.mxu0 %v5901_v39  ;;  %766 = vmatpush1.msra.mxu1 %v5902_v41  ;;  %v5912_v39 = vld [vmem:[#allocation66_spill] sm:$0xff]  ;;  %v5913_v41 = vld [vmem:[#allocation67_spill] sm:$0xff] }
 0x16e   :  { %696 = vmatprep.subr.mxu0 %v5903_v45  ;;  %767 = vmatprep.subr.mxu1 %v5904_v49  ;;  %v5914_v45 = vld [vmem:[#allocation68_spill] sm:$0xff]  ;;  %v5915_v49 = vld [vmem:[#allocation69_spill] sm:$0xff] }
 0x16f   :  { %697 = vmatpush1.msra.mxu0 %v5905_v51  ;;  %768 = vmatpush1.msra.mxu1 %v5906_v35  ;;  %v5916_v51 = vld [vmem:[#allocation70_spill] sm:$0xff]  ;;  %v5917_v35 = vld [vmem:[#allocation71_spill] sm:$0xff] }
 0x170   :  { %698 = vmatprep.subr.mxu0 %v5907_v52  ;;  %769 = vmatprep.subr.mxu1 %v5908_v54  ;;  %v5918_v52 = vld [vmem:[#allocation72_spill] sm:$0xff]  ;;  %v5919_v54 = vld [vmem:[#allocation73_spill] sm:$0xff] }
 0x171   :  { %699 = vmatpush1.msra.mxu0 %v5909_v48  ;;  %770 = vmatpush1.msra.mxu1 %v5910_v50  ;;  %v5920_v48 = vld [vmem:[#allocation74_spill] sm:$0xff]  ;;  %v5921_v50 = vld [vmem:[#allocation75_spill] sm:$0xff] }
 0x172   :  { %700 = vmatprep.subr.mxu0 %v5911_v38  ;;  %771 = vmatprep.subr.mxu1 %v5912_v39  ;;  %v5922_v38 = vld [vmem:[#allocation76_spill] sm:$0xff]  ;;  %v5923_v39 = vld [vmem:[#allocation77_spill] sm:$0xff] }
 0x173   :  { %701 = vmatpush1.msra.mxu0 %v5913_v41  ;;  %772 = vmatpush1.msra.mxu1 %v5914_v45  ;;  %v5924_v41 = vld [vmem:[#allocation78_spill] sm:$0xff]  ;;  %v5925_v45 = vld [vmem:[#allocation79_spill] sm:$0xff] }
 0x174   :  { %702 = vmatprep.subr.mxu0 %v5915_v49  ;;  %773 = vmatprep.subr.mxu1 %v5916_v51  ;;  %v5926_v49 = vld [vmem:[#allocation80_spill] sm:$0xff]  ;;  %v5927_v51 = vld [vmem:[#allocation81_spill] sm:$0xff] }
 0x175   :  { %703 = vmatpush1.msra.mxu0 %v5917_v35  ;;  %774 = vmatpush1.msra.mxu1 %v5918_v52  ;;  %v5928_v35 = vld [vmem:[#allocation82_spill] sm:$0xff]  ;;  %v5929_v52 = vld [vmem:[#allocation83_spill] sm:$0xff] }
 0x176   :  { %704 = vmatprep.subr.mxu0 %v5919_v54  ;;  %775 = vmatprep.subr.mxu1 %v5920_v48  ;;  %v5930_v54 = vld [vmem:[#allocation84_spill] sm:$0xff]  ;;  %v5931_v48 = vld [vmem:[#allocation85_spill] sm:$0xff] }
 0x177   :  { %705 = vmatpush1.msra.mxu0 %v5921_v50  ;;  %776 = vmatpush1.msra.mxu1 %v5922_v38  ;;  %v5932_v50 = vld [vmem:[#allocation86_spill] sm:$0xff]  ;;  %v5933_v38 = vld [vmem:[#allocation87_spill] sm:$0xff] }
 0x178   :  { %706 = vmatprep.subr.mxu0 %v5923_v39  ;;  %777 = vmatprep.subr.mxu1 %v5924_v41  ;;  %v5934_v39 = vld [vmem:[#allocation88_spill] sm:$0xff]  ;;  %v5935_v41 = vld [vmem:[#allocation89_spill] sm:$0xff] }
 0x179   :  { %707 = vmatpush1.msra.mxu0 %v5925_v45  ;;  %778 = vmatpush1.msra.mxu1 %v5926_v49  ;;  %v5936_v45 = vld [vmem:[#allocation90_spill] sm:$0xff]  ;;  %v5937_v49 = vld [vmem:[#allocation91_spill] sm:$0xff] }
 0x17a   :  { %708 = vmatprep.subr.mxu0 %v5927_v51  ;;  %779 = vmatprep.subr.mxu1 %v5928_v35  ;;  %v5938_v51 = vld [vmem:[#allocation92_spill] sm:$0xff]  ;;  %v5939_v35 = vld [vmem:[#allocation93_spill] sm:$0xff] }
 0x17b   :  { %709 = vmatpush1.msra.mxu0 %v5929_v52  ;;  %780 = vmatpush1.msra.mxu1 %v5930_v54  ;;  %v5940_v52 = vld [vmem:[#allocation94_spill] sm:$0xff]  ;;  %v5941_v54 = vld [vmem:[#allocation95_spill] sm:$0xff] }
 0x17c   :  { %710 = vmatprep.subr.mxu0 %v5931_v48  ;;  %781 = vmatprep.subr.mxu1 %v5932_v50  ;;  %v5942_v48 = vld [vmem:[#allocation96_spill] sm:$0xff] }
 0x17d   :  { %711 = vmatpush1.msra.mxu0 %v5933_v38  ;;  %782 = vmatpush1.msra.mxu1 %v5934_v39  ;;  %v5943_v38 = vld [vmem:[#allocation97_spill] sm:$0xff] }
 0x17e   :  { %712 = vmatprep.subr.mxu0 %v5935_v41  ;;  %783 = vmatprep.subr.mxu1 %v5936_v45  ;;  %v5944_v41 = vld [vmem:[#allocation98_spill] sm:$0xff]  ;;  %v5945_v45 = vld [vmem:[#allocation99_spill] sm:$0xff] }
 0x17f   :  { %713 = vmatpush1.msra.mxu0 %v5937_v49  ;;  %784 = vmatpush1.msra.mxu1 %v5938_v51  ;;  %v5946_v49 = vld [vmem:[#allocation100_spill] sm:$0xff] }
 0x180   :  { %714 = vmatprep.subr.mxu0 %v5939_v35  ;;  %785 = vmatprep.subr.mxu1 %v5940_v52 }
 0x181   :  { %715 = vmatpush1.msra.mxu0 %v5941_v54  ;;  %786 = vmatpush1.msra.mxu1 %v5942_v48  ;;  %v5947_v54 = vld [vmem:[#allocation102_spill] sm:$0xff]  ;;  %v547_v48 = vld [vmem:[#allocation4 + $0x8] sm:$0xff] }
 0x182   :  { %716 = vmatprep.subr.mxu0 %v3773_v0  ;;  %787 = vmatprep.subr.mxu1 %v5943_v38 }
 0x183   :  { %717 = vmatpush1.msra.mxu0 %v3779_v55  ;;  %788 = vmatpush1.msra.mxu1 %v5944_v41 }
 0x184   :  { %718 = vmatprep.subr.mxu0 %v5945_v45  ;;  %789 = vmatprep.subr.mxu1 %v5946_v49 }
 0x185   :  { %719 = vmatpush1.msra.mxu0 %v3796_v60  ;;  %790 = vmatpush1.msra.mxu1 %v3798_v61 }
 0x186   :  { %720 = vmatprep.subr.mxu0 %v3802_v1  ;;  %791 = vmatprep.subr.mxu1 %v5947_v54 }
 0x187   :  { %721 = vmatpush1.msra.mxu0 %v3808_v53  ;;  %754 = vmatprep.mubr.f32.mxu0 %v5821_v56 }
 0x188   :  { %792 = vmatpush1.msra.mxu1 %v3813_v62  ;;  %825 = vmatprep.mubr.f32.mxu1 %v5821_v56 }
 0x189   :  { %755 = vmatmul.mubr.f32.vlgmr.msra.gmra.mxu0 %v547_v48  ;;  %826 = vmatmul.mubr.f32.vlgmr.msra.gmra.mxu1 %v547_v48  ;;  %v5981_v48 = vld [vmem:[#allocation101_spill] sm:$0xff] }
 0x18a   :  { %875 = vmatprep.subr.mxu0 %v3427_v2  ;;  %946 = vmatprep.subr.mxu1 %v3429_v3  ;;  %v5948_v2 = vld [vmem:[#allocation14_spill] sm:$0xff]  ;;  %v5949_v3 = vld [vmem:[#allocation15_spill] sm:$0xff]  ;;  %vm2866_vm5 = vcmp.gt.s32.totalorder %v5981_v48, 2  ;;  %vm2870_vm6 = vcmp.gt.s32.totalorder %v5981_v48, 3  ;;  %vm2878_vm7 = vcmp.gt.s32.totalorder %v5981_v48, 5  ;;  %vm2886_vm8 = vcmp.gt.s32.totalorder %v5981_v48, 7 }
 0x18b   :  { %876 = vmatpush1.msra.mxu0 %v3431_v4  ;;  %947 = vmatpush1.msra.mxu1 %v3435_v5  ;;  %v5950_v4 = vld [vmem:[#allocation16_spill] sm:$0xff]  ;;  %v5951_v5 = vld [vmem:[#allocation17_spill] sm:$0xff] }
 0x18c   :  { %877 = vmatprep.subr.mxu0 %v3437_v6  ;;  %948 = vmatprep.subr.mxu1 %v3439_v7  ;;  %v5952_v6 = vld [vmem:[#allocation18_spill] sm:$0xff]  ;;  %v5953_v7 = vld [vmem:[#allocation19_spill] sm:$0xff] }
 0x18d   :  { %878 = vmatpush1.msra.mxu0 %v3443_v8  ;;  %949 = vmatpush1.msra.mxu1 %v3445_v9  ;;  %v5954_v8 = vld [vmem:[#allocation20_spill] sm:$0xff]  ;;  %v5955_v9 = vld [vmem:[#allocation21_spill] sm:$0xff] }
 0x18e   :  { %879 = vmatprep.subr.mxu0 %v3447_v10  ;;  %950 = vmatprep.subr.mxu1 %v3451_v11  ;;  %v5956_v10 = vld [vmem:[#allocation22_spill] sm:$0xff]  ;;  %v5957_v11 = vld [vmem:[#allocation23_spill] sm:$0xff] }
 0x18f   :  { %880 = vmatpush1.msra.mxu0 %v3453_v12  ;;  %951 = vmatpush1.msra.mxu1 %v3455_v13  ;;  %v5958_v12 = vld [vmem:[#allocation24_spill] sm:$0xff]  ;;  %v5959_v13 = vld [vmem:[#allocation25_spill] sm:$0xff] }
 0x190   :  { %881 = vmatprep.subr.mxu0 %v3459_v14  ;;  %952 = vmatprep.subr.mxu1 %v3461_v15  ;;  %v5960_v14 = vld [vmem:[#allocation26_spill] sm:$0xff]  ;;  %v5961_v15 = vld [vmem:[#allocation27_spill] sm:$0xff] }
 0x191   :  { %882 = vmatpush1.msra.mxu0 %v3465_v16  ;;  %953 = vmatpush1.msra.mxu1 %v3467_v17  ;;  %v5962_v16 = vld [vmem:[#allocation28_spill] sm:$0xff]  ;;  %v5963_v17 = vld [vmem:[#allocation29_spill] sm:$0xff] }
 0x192   :  { %883 = vmatprep.subr.mxu0 %v3471_v18  ;;  %954 = vmatprep.subr.mxu1 %v3473_v19  ;;  %v5964_v18 = vld [vmem:[#allocation30_spill] sm:$0xff]  ;;  %v5965_v19 = vld [vmem:[#allocation31_spill] sm:$0xff] }
 0x193   :  { %884 = vmatpush1.msra.mxu0 %v3477_v20  ;;  %955 = vmatpush1.msra.mxu1 %v3479_v21  ;;  %v5966_v20 = vld [vmem:[#allocation32_spill] sm:$0xff]  ;;  %v5967_v21 = vld [vmem:[#allocation33_spill] sm:$0xff] }
 0x194   :  { %885 = vmatprep.subr.mxu0 %v3483_v22  ;;  %956 = vmatprep.subr.mxu1 %v3485_v23  ;;  %v5968_v22 = vld [vmem:[#allocation34_spill] sm:$0xff]  ;;  %v5969_v23 = vld [vmem:[#allocation35_spill] sm:$0xff] }
 0x195   :  { %886 = vmatpush1.msra.mxu0 %v3489_v24  ;;  %957 = vmatpush1.msra.mxu1 %v3491_v25  ;;  %v5970_v24 = vld [vmem:[#allocation36_spill] sm:$0xff]  ;;  %v5971_v25 = vld [vmem:[#allocation37_spill] sm:$0xff] }
 0x196   :  { %887 = vmatprep.subr.mxu0 %v3495_v26  ;;  %958 = vmatprep.subr.mxu1 %v3497_v27  ;;  %v5972_v26 = vld [vmem:[#allocation38_spill] sm:$0xff]  ;;  %v5973_v27 = vld [vmem:[#allocation39_spill] sm:$0xff] }
 0x197   :  { %888 = vmatpush1.msra.mxu0 %v3501_v28  ;;  %959 = vmatpush1.msra.mxu1 %v3503_v29  ;;  %v5974_v28 = vld [vmem:[#allocation40_spill] sm:$0xff]  ;;  %v5975_v29 = vld [vmem:[#allocation41_spill] sm:$0xff] }
 0x198   :  { %889 = vmatprep.subr.mxu0 %v3507_v30  ;;  %960 = vmatprep.subr.mxu1 %v3509_v31  ;;  %v5976_v30 = vld [vmem:[#allocation42_spill] sm:$0xff]  ;;  %v5977_v31 = vld [vmem:[#allocation43_spill] sm:$0xff] }
 0x199   :  { %890 = vmatpush1.msra.mxu0 %v3513_v32  ;;  %961 = vmatpush1.msra.mxu1 %v3515_v33  ;;  %v5978_v32 = vld [vmem:[#allocation44_spill] sm:$0xff]  ;;  %v5979_v33 = vld [vmem:[#allocation45_spill] sm:$0xff] }
 0x19a   :  { %891 = vmatprep.subr.mxu0 %v3519_v34  ;;  %962 = vmatprep.subr.mxu1 %v5948_v2  ;;  %v5980_v34 = vld [vmem:[#allocation46_spill] sm:$0xff]  ;;  %v5982_v2 = vmov 0  }
 0x19b   :  { %892 = vmatpush1.msra.mxu0 %v5949_v3  ;;  %963 = vmatpush1.msra.mxu1 %v5950_v4  ;;  %v1190_v3 = vsel %vm2866_vm5, 1, %v5982_v2  ;;  %v1517_v4 = vsel %vm2870_vm6, 1, %v5982_v2 }
 0x19c   :  { %893 = vmatprep.subr.mxu0 %v5951_v5  ;;  %964 = vmatprep.subr.mxu1 %v5952_v6  ;;  %v2171_v5 = vsel %vm2878_vm7, 1, %v5982_v2  ;;  %v2825_v6 = vsel %vm2886_vm8, 1, %v5982_v2 }
 0x19d   :  { %894 = vmatpush1.msra.mxu0 %v5953_v7  ;;  %965 = vmatpush1.msra.mxu1 %v5954_v8 }
 0x19e   :  { %895 = vmatprep.subr.mxu0 %v5955_v9  ;;  %966 = vmatprep.subr.mxu1 %v5956_v10 }
 0x19f   :  { %896 = vmatpush1.msra.mxu0 %v5957_v11  ;;  %967 = vmatpush1.msra.mxu1 %v5958_v12 }
 0x1a0   :  { %897 = vmatprep.subr.mxu0 %v5959_v13  ;;  %968 = vmatprep.subr.mxu1 %v5960_v14  ;;  %v5983_v14 = vld [vmem:[#allocation103_spill] sm:$0xff] }
 0x1a1   :  { %898 = vmatpush1.msra.mxu0 %v5961_v15  ;;  %969 = vmatpush1.msra.mxu1 %v5962_v16 }
 0x1a2   :  { %899 = vmatprep.subr.mxu0 %v5963_v17  ;;  %970 = vmatprep.subr.mxu1 %v5964_v18 }
 0x1a3   :  { %900 = vmatpush1.msra.mxu0 %v5965_v19  ;;  %971 = vmatpush1.msra.mxu1 %v5966_v20 }
 0x1a4   :  { %901 = vmatprep.subr.mxu0 %v5967_v21  ;;  %972 = vmatprep.subr.mxu1 %v5968_v22 }
 0x1a5   :  { %902 = vmatpush1.msra.mxu0 %v5969_v23  ;;  %973 = vmatpush1.msra.mxu1 %v5970_v24 }
 0x1a6   :  { %903 = vmatprep.subr.mxu0 %v5971_v25  ;;  %974 = vmatprep.subr.mxu1 %v5972_v26 }
 0x1a7   :  { %904 = vmatpush1.msra.mxu0 %v5973_v27  ;;  %975 = vmatpush1.msra.mxu1 %v5974_v28 }
 0x1a8   :  { %905 = vmatprep.subr.mxu0 %v5975_v29  ;;  %976 = vmatprep.subr.mxu1 %v5976_v30 }
 0x1a9   :  { %906 = vmatpush1.msra.mxu0 %v5977_v31  ;;  %977 = vmatpush1.msra.mxu1 %v5978_v32 }
 0x1aa   :  { %939 = vmatprep.mubr.f32.mxu0 %v5821_v56  ;;  %1010 = vmatprep.mubr.f32.mxu1 %v5821_v56 }
 0x1ab   :  { %1017 = vmatprep.subr.mxu0 %v5979_v33  ;;  %1088 = vmatprep.subr.mxu1 %v5980_v34 }
 0x1ac   :  { %1192 = vperm.xlu1 %2900, %v1190_v3  }
 0x1b0   :  { %1519 = vperm.xlu1 %2900, %v1517_v4   ;;  %v866_v4 = vpop.permute.xlu0 %865 }
 0x1b1   :  { %vm867_vm9 = vcmp.eq.s32.totalorder %v866_v4, 1  ;;  %v6018_v4 = vld [vmem:[#allocation90_spill] sm:$0xff] }
 0x1b4   :  { %2173 = vperm.xlu1 %2900, %v2171_v5  }
 0x1b8   :  { %2827 = vperm.xlu1 %2900, %v2825_v6  }
 0x228   :  { %v614_v7 = vpop.f32.mrf.mxu0  ;;  %v685_v8 = vpop.f32.mrf.mxu1 }
 0x22a   :  { %v616_v9 = vpop.f32.mrf.mxu0  ;;  %v687_v11 = vpop.f32.mrf.mxu1 }
 0x249   :  { %v756_v10 = vpop.f32.mrf.mxu0  ;;  %v827_v16 = vpop.f32.mrf.mxu1 }
 0x24a   :  { %v757_v12 = vadd.f32 %v756_v10, %v614_v7  ;;  %v828_v24 = vadd.f32 %v827_v16, %v685_v8  ;;  %v5996_v16 = vld [vmem:[#allocation66_spill] sm:$0xff] }
 0x24b   :  { %v758_v13 = vpop.f32.mrf.mxu0  ;;  %v829_v21 = vpop.f32.mrf.mxu1 }
 0x24c   :  { %v832_v15 = vadd.f32 %v757_v12, %v5983_v14  ;;  %v759_v17 = vadd.f32 %v758_v13, %v616_v9  ;;  %v830_v22 = vadd.f32 %v829_v21, %v687_v11  ;;  %v834_v27 = vadd.f32 %v828_v24, %v3908_v63  ;;  %v5986_v12 = vld [vmem:[#allocation56_spill] sm:$0xff]  ;;  %v5987_v13 = vld [vmem:[#allocation57_spill] sm:$0xff]  ;;  %v6001_v21 = vld [vmem:[#allocation71_spill] sm:$0xff] }
 0x24d   :  { %v6004_v24 = vld [vmem:[#allocation74_spill] sm:$0xff] }
 0x24e   :  { %v2859_v18 = vmul.f32 -1.442695, %v832_v15  ;;  %v833_v19 = vadd.f32 %v759_v17, %v3901_v43  ;;  %v835_v23 = vadd.f32 %v830_v22, %v3905_v36  ;;  %v5995_v15 = vld [vmem:[#allocation65_spill] sm:$0xff]  ;;  %v5997_v17 = vld [vmem:[#allocation67_spill] sm:$0xff]  ;;  %v6002_v22 = vld [vmem:[#allocation72_spill] sm:$0xff] }
 0x250   :  { %2917 = vpow2.f32 %v2859_v18  ;;  %v2860_v20 = vmul.f32 -1.442695, %v833_v19  ;;  %v2861_v25 = vmul.f32 -1.442695, %v835_v23  ;;  %v5998_v18 = vld [vmem:[#allocation68_spill] sm:$0xff]  ;;  %v5999_v19 = vld [vmem:[#allocation69_spill] sm:$0xff] }
 0x251   :  { %v6003_v23 = vld [vmem:[#allocation73_spill] sm:$0xff] }
 0x252   :  { %2919 = vpow2.f32 %v2860_v20  ;;  %v6000_v20 = vld [vmem:[#allocation70_spill] sm:$0xff] }
 0x253   :  { %2921 = vpow2.f32 %v2861_v25  ;;  %v6005_v25 = vld [vmem:[#allocation75_spill] sm:$0xff] }
 0x25d   :  { %v2918_v26 = vpop.eup %2917 }
 0x25e   :  { %v839_v28 = vadd.f32 1.0, %v2918_v26  ;;  %v6006_v26 = vld [vmem:[#allocation76_spill] sm:$0xff] }
 0x25f   :  { %v2920_v29 = vpop.eup %2919 }
 0x260   :  { %2923 = vrcp.f32 %v839_v28  ;;  %v845_v30 = vadd.f32 1.0, %v2920_v29  ;;  %v2922_v31 = vpop.eup %2921  ;;  %v6008_v28 = vld [vmem:[#allocation78_spill] sm:$0xff]  ;;  %v6009_v29 = vld [vmem:[#allocation79_spill] sm:$0xff] }
 0x261   :  { %2925 = vtanh.f32 %v834_v27  ;;  %v852_v48 = vadd.f32 1.0, %v2922_v31  ;;  %v6007_v27 = vld [vmem:[#allocation77_spill] sm:$0xff] }
 0x262   :  { %2927 = vrcp.f32 %v845_v30  ;;  %v6010_v30 = vld [vmem:[#allocation80_spill] sm:$0xff]  ;;  %v6011_v31 = vld [vmem:[#allocation81_spill] sm:$0xff] }
 0x263   :  { %2929 = vrcp.f32 %v852_v48  ;;  %v6015_v48 = vld [vmem:[#allocation85_spill] sm:$0xff] }
 0x26d   :  { %v2924_v32 = vpop.eup %2923 }
 0x26e   :  { %v2926_v33 = vpop.eup %2925 }
 0x26f   :  { %v2928_v34 = vpop.eup %2927  ;;  %v856_v2 = vmul.f32 %v2926_v33, %v2924_v32  ;;  %v6012_v32 = vld [vmem:[#allocation82_spill] sm:$0xff]  ;;  %v6013_v33 = vld [vmem:[#allocation83_spill] sm:$0xff] }
 0x270   :  { %v855_v3 = vmul.f32 %v2928_v34, %v3911_v57  ;;  %v2930_v7 = vpop.eup %2929  ;;  %v6014_v34 = vld [vmem:[#allocation84_spill] sm:$0xff] }
 0x272   :  { %v857_v5 = vadd.f32 %v856_v2, %v855_v3  ;;  %v6016_v2 = vld [vmem:[#allocation87_spill] sm:$0xff]  ;;  %v6017_v3 = vld [vmem:[#allocation89_spill] sm:$0xff] }
 0x274   :  { %2931 = vtanh.f32 %v857_v5  ;;  %v4062_v6 = vsel %vm867_vm9, %v857_v5, %v3911_v57  ;;  %v5984_v57 = vld [vmem:[#allocation54_spill] sm:$0xff]  ;;  %v6019_v5 = vld [vmem:[#allocation91_spill] sm:$0xff] }
 0x281   :  { %v2932_v8 = vpop.eup %2931 }
 0x282   :  { %v859_v9 = vmul.f32 %v2932_v8, %v2930_v7  ;;  %v6020_v7 = vld [vmem:[#allocation95_spill] sm:$0xff]  ;;  %v6021_v8 = vld [vmem:[#allocation96_spill] sm:$0xff] }
 0x284   :  { %v868_v10 = vsel %vm867_vm9, %v859_v9, 0.0  ;;  %v4065_v11 = vsel %vm867_vm9, %v859_v9, %v3913_v46  ;;  %v5985_v46 = vld [vmem:[#allocation55_spill] sm:$0xff] }
 0x285   :  { %870 = vst [vmem:[#allocation10 + $0x8] sm:$0xff] %v868_v10  ;;  %940 = vmatmul.mubr.f32.vlgmr.msra.gmra.mxu0 %v4065_v11  ;;  %1011 = vmatmul.mubr.f32.vlgmr.msra.gmra.mxu1 %v4065_v11  ;;  %v4181_v9 = vld [vmem:[#allocation9 + $0x168] sm:$0xff]  ;;  %v4184_v10 = vld [vmem:[#allocation9 + $0x178] sm:$0xff] }
 0x286   :  { %1018 = vmatpush1.msra.mxu0 %v5893_v59  ;;  %1089 = vmatpush1.msra.mxu1 %v5894_v44  ;;  %v5988_v59 = vld [vmem:[#allocation58_spill] sm:$0xff]  ;;  %v5989_v44 = vld [vmem:[#allocation59_spill] sm:$0xff] }
 0x287   :  { %1019 = vmatprep.subr.mxu0 %v5895_v47  ;;  %1090 = vmatprep.subr.mxu1 %v5896_v58  ;;  %v5990_v47 = vld [vmem:[#allocation60_spill] sm:$0xff]  ;;  %v5991_v58 = vld [vmem:[#allocation61_spill] sm:$0xff] }
 0x288   :  { %1020 = vmatpush1.msra.mxu0 %v5897_v42  ;;  %1091 = vmatpush1.msra.mxu1 %v5898_v40  ;;  %v5992_v42 = vld [vmem:[#allocation62_spill] sm:$0xff]  ;;  %v5993_v40 = vld [vmem:[#allocation63_spill] sm:$0xff] }
 0x289   :  { %1021 = vmatprep.subr.mxu0 %v5899_v37  ;;  %1092 = vmatprep.subr.mxu1 %v5984_v57  ;;  %v5994_v37 = vld [vmem:[#allocation64_spill] sm:$0xff]  ;;  %v4187_v57 = vld [vmem:[#allocation9 + $0x160] sm:$0xff] }
 0x28a   :  { %1022 = vmatpush1.msra.mxu0 %v5985_v46  ;;  %1093 = vmatpush1.msra.mxu1 %v5986_v12  ;;  %6022 = vst [vmem:[#allocation47_spill] sm:$0xff] %v4187_v57  ;;  %v4190_v46 = vld [vmem:[#allocation9 + $0x170] sm:$0xff]  ;;  %v4193_v12 = vld [vmem:[#allocation9 + $0x148] sm:$0xff] }
 0x28b   :  { %1023 = vmatprep.subr.mxu0 %v5987_v13  ;;  %1094 = vmatprep.subr.mxu1 %v5988_v59  ;;  %6023 = vst [vmem:[#allocation48_spill] sm:$0xff] %v4190_v46  ;;  %6024 = vst [vmem:[#allocation49_spill] sm:$0xff] %v4193_v12  ;;  %v4196_v13 = vld [vmem:[#allocation9 + $0x158] sm:$0xff]  ;;  %v4199_v59 = vld [vmem:[#allocation9 + $0x140] sm:$0xff] }
 0x28c   :  { %1024 = vmatpush1.msra.mxu0 %v5989_v44  ;;  %1095 = vmatpush1.msra.mxu1 %v5990_v47  ;;  %6025 = vst [vmem:[#allocation50_spill] sm:$0xff] %v4196_v13  ;;  %6026 = vst [vmem:[#allocation51_spill] sm:$0xff] %v4199_v59  ;;  %v4202_v44 = vld [vmem:[#allocation9 + $0x150] sm:$0xff]  ;;  %v4205_v47 = vld [vmem:[#allocation9 + $0x128] sm:$0xff] }
 0x28d   :  { %1025 = vmatprep.subr.mxu0 %v5991_v58  ;;  %1096 = vmatprep.subr.mxu1 %v5992_v42  ;;  %6027 = vst [vmem:[#allocation52_spill] sm:$0xff] %v4202_v44  ;;  %6028 = vst [vmem:[#allocation53_spill] sm:$0xff] %v4205_v47  ;;  %v4208_v58 = vld [vmem:[#allocation9 + $0x138] sm:$0xff]  ;;  %v4211_v42 = vld [vmem:[#allocation9 + $0x120] sm:$0xff] }
 0x28e   :  { %1026 = vmatpush1.msra.mxu0 %v5993_v40  ;;  %1097 = vmatpush1.msra.mxu1 %v5994_v37  ;;  %6029 = vst [vmem:[#allocation86_spill] sm:$0xff] %v4208_v58  ;;  %6030 = vst [vmem:[#allocation88_spill] sm:$0xff] %v4211_v42  ;;  %v4214_v40 = vld [vmem:[#allocation9 + $0x130] sm:$0xff]  ;;  %v4217_v37 = vld [vmem:[#allocation9 + $0x108] sm:$0xff] }
 0x28f   :  { %1027 = vmatprep.subr.mxu0 %v5995_v15  ;;  %1098 = vmatprep.subr.mxu1 %v5996_v16  ;;  %6031 = vst [vmem:[#allocation92_spill] sm:$0xff] %v4214_v40  ;;  %6032 = vst [vmem:[#allocation93_spill] sm:$0xff] %v4217_v37  ;;  %v4220_v15 = vld [vmem:[#allocation9 + $0x118] sm:$0xff]  ;;  %v4223_v16 = vld [vmem:[#allocation9 + $0x100] sm:$0xff] }
 0x290   :  { %1028 = vmatpush1.msra.mxu0 %v5997_v17  ;;  %1099 = vmatpush1.msra.mxu1 %v5998_v18  ;;  %6033 = vst [vmem:[#allocation94_spill] sm:$0xff] %v4220_v15  ;;  %6034 = vst [vmem:[#allocation97_spill] sm:$0xff] %v4223_v16  ;;  %v4226_v17 = vld [vmem:[#allocation9 + $0x110] sm:$0xff]  ;;  %v4229_v18 = vld [vmem:[#allocation9 + $0xe8] sm:$0xff] }
 0x291   :  { %1029 = vmatprep.subr.mxu0 %v5999_v19  ;;  %1100 = vmatprep.subr.mxu1 %v6000_v20  ;;  %6035 = vst [vmem:[#allocation98_spill] sm:$0xff] %v4226_v17  ;;  %6036 = vst [vmem:[#allocation99_spill] sm:$0xff] %v4229_v18  ;;  %v4232_v19 = vld [vmem:[#allocation9 + $0xf8] sm:$0xff]  ;;  %v4235_v20 = vld [vmem:[#allocation9 + $0xe0] sm:$0xff] }
 0x292   :  { %1030 = vmatpush1.msra.mxu0 %v6001_v21  ;;  %1101 = vmatpush1.msra.mxu1 %v6002_v22  ;;  %6037 = vst [vmem:[#allocation100_spill] sm:$0xff] %v4232_v19  ;;  %6038 = vst [vmem:[#allocation102_spill] sm:$0xff] %v4235_v20  ;;  %v4238_v21 = vld [vmem:[#allocation9 + $0xf0] sm:$0xff]  ;;  %v4241_v22 = vld [vmem:[#allocation9 + $0xc8] sm:$0xff] }
 0x293   :  { %1031 = vmatprep.subr.mxu0 %v6003_v23  ;;  %1102 = vmatprep.subr.mxu1 %v6004_v24  ;;  %6039 = vst [vmem:[#allocation14_spill] sm:$0xff] %v4238_v21  ;;  %6040 = vst [vmem:[#allocation15_spill] sm:$0xff] %v4241_v22  ;;  %v4244_v23 = vld [vmem:[#allocation9 + $0xd8] sm:$0xff]  ;;  %v4247_v24 = vld [vmem:[#allocation9 + $0xc0] sm:$0xff] }
 0x294   :  { %1032 = vmatpush1.msra.mxu0 %v6005_v25  ;;  %1103 = vmatpush1.msra.mxu1 %v6006_v26  ;;  %6041 = vst [vmem:[#allocation16_spill] sm:$0xff] %v4244_v23  ;;  %6042 = vst [vmem:[#allocation17_spill] sm:$0xff] %v4247_v24  ;;  %v4250_v25 = vld [vmem:[#allocation9 + $0xd0] sm:$0xff]  ;;  %v4253_v26 = vld [vmem:[#allocation9 + $0xa8] sm:$0xff] }
 0x295   :  { %1033 = vmatprep.subr.mxu0 %v6007_v27  ;;  %1104 = vmatprep.subr.mxu1 %v6008_v28  ;;  %6043 = vst [vmem:[#allocation18_spill] sm:$0xff] %v4250_v25  ;;  %6044 = vst [vmem:[#allocation19_spill] sm:$0xff] %v4253_v26  ;;  %v4256_v27 = vld [vmem:[#allocation9 + $0xb8] sm:$0xff]  ;;  %v4259_v28 = vld [vmem:[#allocation9 + $0xa0] sm:$0xff] }
 0x296   :  { %1034 = vmatpush1.msra.mxu0 %v6009_v29  ;;  %1105 = vmatpush1.msra.mxu1 %v6010_v30  ;;  %6045 = vst [vmem:[#allocation20_spill] sm:$0xff] %v4256_v27  ;;  %6046 = vst [vmem:[#allocation21_spill] sm:$0xff] %v4259_v28  ;;  %v4262_v29 = vld [vmem:[#allocation9 + $0xb0] sm:$0xff]  ;;  %v4265_v30 = vld [vmem:[#allocation9 + $0x88] sm:$0xff] }
 0x297   :  { %1035 = vmatprep.subr.mxu0 %v6011_v31  ;;  %1106 = vmatprep.subr.mxu1 %v6012_v32  ;;  %6047 = vst [vmem:[#allocation22_spill] sm:$0xff] %v4262_v29  ;;  %6048 = vst [vmem:[#allocation23_spill] sm:$0xff] %v4265_v30  ;;  %v4268_v31 = vld [vmem:[#allocation9 + $0x98] sm:$0xff]  ;;  %v4271_v32 = vld [vmem:[#allocation9 + $0x80] sm:$0xff] }
 0x298   :  { %1036 = vmatpush1.msra.mxu0 %v6013_v33  ;;  %1107 = vmatpush1.msra.mxu1 %v6014_v34  ;;  %6049 = vst [vmem:[#allocation24_spill] sm:$0xff] %v4268_v31  ;;  %6050 = vst [vmem:[#allocation25_spill] sm:$0xff] %v4271_v32  ;;  %v4274_v33 = vld [vmem:[#allocation9 + $0x90] sm:$0xff]  ;;  %v4277_v34 = vld [vmem:[#allocation9 + $0x68] sm:$0xff] }
 0x299   :  { %1037 = vmatprep.subr.mxu0 %v6015_v48  ;;  %1108 = vmatprep.subr.mxu1 %v5932_v50  ;;  %v4178_v50 = vld [vmem:[#allocation9 + $0x190] sm:$0xff]  ;;  %6051 = vst [vmem:[#allocation26_spill] sm:$0xff] %v4274_v33  ;;  %6052 = vst [vmem:[#allocation27_spill] sm:$0xff] %v4277_v34  ;;  %v4280_v48 = vld [vmem:[#allocation9 + $0x78] sm:$0xff] }
 0x29a   :  { %1038 = vmatpush1.msra.mxu0 %v6016_v2  ;;  %1109 = vmatpush1.msra.mxu1 %v5934_v39  ;;  %v874_v39 = vld [vmem:[#allocation4 + $0x10] sm:$0xff]  ;;  %6053 = vst [vmem:[#allocation28_spill] sm:$0xff] %v4280_v48  ;;  %v4283_v2 = vld [vmem:[#allocation9 + $0x60] sm:$0xff] }
 0x29b   :  { %1039 = vmatprep.subr.mxu0 %v6017_v3  ;;  %1110 = vmatprep.subr.mxu1 %v6018_v4  ;;  %6054 = vst [vmem:[#allocation29_spill] sm:$0xff] %v4283_v2  ;;  %v4286_v3 = vld [vmem:[#allocation9 + $0x70] sm:$0xff]  ;;  %v4289_v4 = vld [vmem:[#allocation9 + $0x48] sm:$0xff] }
 0x29c   :  { %1040 = vmatpush1.msra.mxu0 %v6019_v5  ;;  %1111 = vmatpush1.msra.mxu1 %v5938_v51  ;;  %v4166_v51 = vld [vmem:[#allocation9 + $0x1b0] sm:$0xff]  ;;  %6055 = vst [vmem:[#allocation30_spill] sm:$0xff] %v4286_v3  ;;  %6056 = vst [vmem:[#allocation31_spill] sm:$0xff] %v4289_v4  ;;  %v4292_v5 = vld [vmem:[#allocation9 + $0x58] sm:$0xff] }
 0x29d   :  { %1041 = vmatprep.subr.mxu0 %v5939_v35  ;;  %1112 = vmatprep.subr.mxu1 %v5940_v52  ;;  %v4169_v35 = vld [vmem:[#allocation9 + $0x188] sm:$0xff]  ;;  %v4172_v52 = vld [vmem:[#allocation9 + $0x198] sm:$0xff]  ;;  %6057 = vst [vmem:[#allocation32_spill] sm:$0xff] %v4292_v5 }
 0x29e   :  { %1042 = vmatpush1.msra.mxu0 %v6020_v7  ;;  %1113 = vmatpush1.msra.mxu1 %v6021_v8  ;;  %v4295_v7 = vld [vmem:[#allocation9 + $0x40] sm:$0xff]  ;;  %v4298_v8 = vld [vmem:[#allocation9 + $0x50] sm:$0xff] }
 0x29f   :  { %1043 = vmatprep.subr.mxu0 %v3773_v0  ;;  %1114 = vmatprep.subr.mxu1 %v5943_v38  ;;  %v4133_v0 = vld [vmem:[#allocation9 + $0x1e8] sm:$0xff]  ;;  %v4154_v38 = vld [vmem:[#allocation9 + $0x1d0] sm:$0xff]  ;;  %6058 = vst [vmem:[#allocation33_spill] sm:$0xff] %v4295_v7  ;;  %6059 = vst [vmem:[#allocation34_spill] sm:$0xff] %v4298_v8 }
 0x2a0   :  { %1044 = vmatpush1.msra.mxu0 %v3779_v55  ;;  %1115 = vmatpush1.msra.mxu1 %v5944_v41  ;;  %v4136_v55 = vld [vmem:[#allocation9 + $0x1f8] sm:$0xff]  ;;  %v4157_v41 = vld [vmem:[#allocation9 + $0x1a8] sm:$0xff] }
 0x2a1   :  { %1045 = vmatprep.subr.mxu0 %v5945_v45  ;;  %1116 = vmatprep.subr.mxu1 %v5946_v49  ;;  %v4160_v45 = vld [vmem:[#allocation9 + $0x1b8] sm:$0xff]  ;;  %v4163_v49 = vld [vmem:[#allocation9 + $0x1a0] sm:$0xff] }
 0x2a2   :  { %1046 = vmatpush1.msra.mxu0 %v3796_v60  ;;  %1117 = vmatpush1.msra.mxu1 %v3798_v61  ;;  %v4145_v60 = vld [vmem:[#allocation9 + $0x1c8] sm:$0xff]  ;;  %v4148_v61 = vld [vmem:[#allocation9 + $0x1d8] sm:$0xff] }
 0x2a3   :  { %1047 = vmatprep.subr.mxu0 %v3802_v1  ;;  %1118 = vmatprep.subr.mxu1 %v5947_v54  ;;  %v4139_v1 = vld [vmem:[#allocation9 + $0x1e0] sm:$0xff] }
 0x2a4   :  { %1048 = vmatpush1.msra.mxu0 %v3808_v53  ;;  %1081 = vmatprep.mubr.f32.mxu0 %v5821_v56  ;;  %v4142_v53 = vld [vmem:[#allocation9 + $0x1f0] sm:$0xff]  ;;  %v4175_v54 = vld [vmem:[#allocation9 + $0x180] sm:$0xff] }
 0x2a5   :  { %1119 = vmatpush1.msra.mxu1 %v3813_v62  ;;  %1152 = vmatprep.mubr.f32.mxu1 %v5821_v56  ;;  %v4151_v62 = vld [vmem:[#allocation9 + $0x1c0] sm:$0xff] }
 0x2a6   :  { %1082 = vmatmul.mubr.f32.vlgmr.msra.gmra.mxu0 %v874_v39  ;;  %1153 = vmatmul.mubr.f32.vlgmr.msra.gmra.mxu1 %v874_v39  ;;  %v4301_v39 = vld [vmem:[#allocation9 + $0x28] sm:$0xff] }
 0x2a7   :  { %1202 = vmatprep.subr.mxu0 %v4133_v0  ;;  %1273 = vmatprep.subr.mxu1 %v4136_v55  ;;  %6060 = vst [vmem:[#allocation35_spill] sm:$0xff] %v4301_v39 }
 0x2a8   :  { %1203 = vmatpush1.msra.mxu0 %v4139_v1  ;;  %1274 = vmatpush1.msra.mxu1 %v4142_v53 }
 0x2a9   :  { %1204 = vmatprep.subr.mxu0 %v4145_v60  ;;  %1275 = vmatprep.subr.mxu1 %v4148_v61 }
 0x2aa   :  { %1205 = vmatpush1.msra.mxu0 %v4151_v62  ;;  %1276 = vmatpush1.msra.mxu1 %v4154_v38 }
 0x2ab   :  { %1206 = vmatprep.subr.mxu0 %v4157_v41  ;;  %1277 = vmatprep.subr.mxu1 %v4160_v45 }
 0x2ac   :  { %1207 = vmatpush1.msra.mxu0 %v4163_v49  ;;  %1278 = vmatpush1.msra.mxu1 %v4166_v51 }
 0x2ad   :  { %1208 = vmatprep.subr.mxu0 %v4169_v35  ;;  %1279 = vmatprep.subr.mxu1 %v4172_v52 }
 0x2ae   :  { %1209 = vmatpush1.msra.mxu0 %v4175_v54  ;;  %1280 = vmatpush1.msra.mxu1 %v4178_v50 }
 0x2af   :  { %1210 = vmatprep.subr.mxu0 %v4181_v9  ;;  %1281 = vmatprep.subr.mxu1 %v4184_v10 }
 0x2b0   :  { %1211 = vmatpush1.msra.mxu0 %v4187_v57  ;;  %1282 = vmatpush1.msra.mxu1 %v4190_v46 }
 0x2b1   :  { %1212 = vmatprep.subr.mxu0 %v4193_v12  ;;  %1283 = vmatprep.subr.mxu1 %v4196_v13 }
 0x2b2   :  { %1213 = vmatpush1.msra.mxu0 %v4199_v59  ;;  %1284 = vmatpush1.msra.mxu1 %v4202_v44 }
 0x2b3   :  { %1214 = vmatprep.subr.mxu0 %v4205_v47  ;;  %1285 = vmatprep.subr.mxu1 %v4208_v58 }
 0x2b4   :  { %1215 = vmatpush1.msra.mxu0 %v4211_v42  ;;  %1286 = vmatpush1.msra.mxu1 %v4214_v40 }
 0x2b5   :  { %1216 = vmatprep.subr.mxu0 %v4217_v37  ;;  %1287 = vmatprep.subr.mxu1 %v4220_v15 }
 0x2b6   :  { %1217 = vmatpush1.msra.mxu0 %v4223_v16  ;;  %1288 = vmatpush1.msra.mxu1 %v4226_v17 }
 0x2b7   :  { %1218 = vmatprep.subr.mxu0 %v4229_v18  ;;  %1289 = vmatprep.subr.mxu1 %v4232_v19 }
 0x2b8   :  { %1219 = vmatpush1.msra.mxu0 %v4235_v20  ;;  %1290 = vmatpush1.msra.mxu1 %v4238_v21 }
 0x2b9   :  { %1220 = vmatprep.subr.mxu0 %v4241_v22  ;;  %1291 = vmatprep.subr.mxu1 %v4244_v23 }
 0x2ba   :  { %1221 = vmatpush1.msra.mxu0 %v4247_v24  ;;  %1292 = vmatpush1.msra.mxu1 %v4250_v25 }
 0x2bb   :  { %1222 = vmatprep.subr.mxu0 %v4253_v26  ;;  %1293 = vmatprep.subr.mxu1 %v4256_v27 }
 0x2bc   :  { %1223 = vmatpush1.msra.mxu0 %v4259_v28  ;;  %1294 = vmatpush1.msra.mxu1 %v4262_v29 }
 0x2bd   :  { %1224 = vmatprep.subr.mxu0 %v4265_v30  ;;  %1295 = vmatprep.subr.mxu1 %v4268_v31 }
 0x2be   :  { %1225 = vmatpush1.msra.mxu0 %v4271_v32  ;;  %1296 = vmatpush1.msra.mxu1 %v4274_v33 }
 0x2bf   :  { %1226 = vmatprep.subr.mxu0 %v4277_v34  ;;  %1297 = vmatprep.subr.mxu1 %v4280_v48 }
 0x2c0   :  { %1227 = vmatpush1.msra.mxu0 %v4283_v2  ;;  %1298 = vmatpush1.msra.mxu1 %v4286_v3  ;;  %v4304_v3 = vld [vmem:[#allocation9 + $0x38] sm:$0xff] }
 0x2c1   :  { %1228 = vmatprep.subr.mxu0 %v4289_v4  ;;  %1299 = vmatprep.subr.mxu1 %v4292_v5  ;;  %6061 = vst [vmem:[#allocation36_spill] sm:$0xff] %v4304_v3  ;;  %v4307_v4 = vld [vmem:[#allocation9 + $0x20] sm:$0xff]  ;;  %v4310_v5 = vld [vmem:[#allocation9 + $0x30] sm:$0xff] }
 0x2c2   :  { %1229 = vmatpush1.msra.mxu0 %v4295_v7  ;;  %1300 = vmatpush1.msra.mxu1 %v4298_v8  ;;  %6062 = vst [vmem:[#allocation37_spill] sm:$0xff] %v4307_v4  ;;  %6063 = vst [vmem:[#allocation38_spill] sm:$0xff] %v4310_v5  ;;  %v4313_v7 = vld [vmem:[#allocation9 + $0x8] sm:$0xff]  ;;  %v4316_v8 = vld [vmem:[#allocation9 + $0x18] sm:$0xff] }
 0x2c3   :  { %1230 = vmatprep.subr.mxu0 %v4301_v39  ;;  %1301 = vmatprep.subr.mxu1 %v4304_v3  ;;  %6064 = vst [vmem:[#allocation39_spill] sm:$0xff] %v4313_v7  ;;  %6065 = vst [vmem:[#allocation40_spill] sm:$0xff] %v4316_v8  ;;  %v4319_v39 = vld [vmem:[#allocation9] sm:$0xff]  ;;  %v4322_v3 = vld [vmem:[#allocation9 + $0x10] sm:$0xff] }
 0x2c4   :  { %1231 = vmatpush1.msra.mxu0 %v4307_v4  ;;  %1302 = vmatpush1.msra.mxu1 %v4310_v5  ;;  %6066 = vst [vmem:[#allocation41_spill] sm:$0xff] %v4319_v39  ;;  %6067 = vst [vmem:[#allocation42_spill] sm:$0xff] %v4322_v3  ;;  %v4327_v5 = vld [vmem:[#allocation7 + $0x1e8] sm:$0xff] }
 0x2c5   :  { %1232 = vmatprep.subr.mxu0 %v4313_v7  ;;  %1303 = vmatprep.subr.mxu1 %v4316_v8  ;;  %6068 = vst [vmem:[#allocation43_spill] sm:$0xff] %v4327_v5  ;;  %v4330_v7 = vld [vmem:[#allocation7 + $0x1f8] sm:$0xff] }
 0x2c6   :  { %1233 = vmatpush1.msra.mxu0 %v4319_v39  ;;  %1304 = vmatpush1.msra.mxu1 %v4322_v3  ;;  %6069 = vst [vmem:[#allocation44_spill] sm:$0xff] %v4330_v7 }
 0x2c7   :  { %1266 = vmatprep.mubr.f32.mxu0 %v5821_v56  ;;  %1337 = vmatprep.mubr.f32.mxu1 %v5821_v56 }
 0x2c8   :  { %1344 = vmatprep.subr.mxu0 %v4327_v5  ;;  %1415 = vmatprep.subr.mxu1 %v4330_v7 }
 0x345   :  { %v941_v8 = vpop.f32.mrf.mxu0  ;;  %v1012_v4 = vpop.f32.mrf.mxu1 }
 0x347   :  { %v943_v2 = vpop.f32.mrf.mxu0  ;;  %v1014_v48 = vpop.f32.mrf.mxu1 }
 0x366   :  { %v1083_v39 = vpop.f32.mrf.mxu0  ;;  %v1154_v32 = vpop.f32.mrf.mxu1 }
 0x367   :  { %v1084_v34 = vadd.f32 %v1083_v39, %v941_v8  ;;  %v1155_v26 = vadd.f32 %v1154_v32, %v1012_v4 }
 0x368   :  { %v1085_v33 = vpop.f32.mrf.mxu0  ;;  %v1156_v28 = vpop.f32.mrf.mxu1 }
 0x369   :  { %v1159_v3 = vadd.f32 %v1084_v34, %v5983_v14  ;;  %v1086_v31 = vadd.f32 %v1085_v33, %v943_v2  ;;  %v1157_v27 = vadd.f32 %v1156_v28, %v1014_v48  ;;  %v1161_v8 = vadd.f32 %v1155_v26, %v3908_v63  ;;  %v1193_v34 = vpop.permute.xlu1 %1192 }
 0x36a   :  { %vm1194_vm10 = vcmp.eq.s32.totalorder %v1193_v34, 1  ;;  %v4376_v34 = vld [vmem:[#allocation7 + $0x188] sm:$0xff] }
 0x36b   :  { %v2863_v30 = vmul.f32 -1.442695, %v1159_v3  ;;  %v1160_v29 = vadd.f32 %v1086_v31, %v3901_v43  ;;  %v1162_v7 = vadd.f32 %v1157_v27, %v3905_v36 }
 0x36d   :  { %2933 = vpow2.f32 %v2863_v30  ;;  %v2864_v5 = vmul.f32 -1.442695, %v1160_v29  ;;  %v2865_v25 = vmul.f32 -1.442695, %v1162_v7  ;;  %v4349_v7 = vld [vmem:[#allocation7 + $0x1f0] sm:$0xff] }
 0x36f   :  { %2935 = vpow2.f32 %v2864_v5  ;;  %v4346_v5 = vld [vmem:[#allocation7 + $0x1e0] sm:$0xff] }
 0x370   :  { %2937 = vpow2.f32 %v2865_v25 }
 0x37a   :  { %v2934_v24 = vpop.eup %2933 }
 0x37b   :  { %v1166_v39 = vadd.f32 1.0, %v2934_v24 }
 0x37c   :  { %v2936_v23 = vpop.eup %2935 }
 0x37d   :  { %2939 = vrcp.f32 %v1166_v39  ;;  %v1172_v33 = vadd.f32 1.0, %v2936_v23  ;;  %v2938_v31 = vpop.eup %2937  ;;  %v4361_v39 = vld [vmem:[#allocation7 + $0x1d0] sm:$0xff] }
 0x37e   :  { %2941 = vtanh.f32 %v1161_v8  ;;  %v1179_v28 = vadd.f32 1.0, %v2938_v31  ;;  %v4355_v8 = vld [vmem:[#allocation7 + $0x1d8] sm:$0xff] }
 0x37f   :  { %2943 = vrcp.f32 %v1172_v33  ;;  %v4364_v33 = vld [vmem:[#allocation7 + $0x1a8] sm:$0xff]  ;;  %v4367_v31 = vld [vmem:[#allocation7 + $0x1b8] sm:$0xff] }
 0x380   :  { %2945 = vrcp.f32 %v1179_v28  ;;  %v4382_v28 = vld [vmem:[#allocation7 + $0x180] sm:$0xff] }
 0x38a   :  { %v2940_v30 = vpop.eup %2939 }
 0x38b   :  { %v2942_v29 = vpop.eup %2941 }
 0x38c   :  { %v2944_v2 = vpop.eup %2943  ;;  %v1183_v32 = vmul.f32 %v2942_v29, %v2940_v30  ;;  %v4370_v30 = vld [vmem:[#allocation7 + $0x1a0] sm:$0xff]  ;;  %v4373_v29 = vld [vmem:[#allocation7 + $0x1b0] sm:$0xff] }
 0x38d   :  { %v1182_v27 = vmul.f32 %v2944_v2, %v4062_v6  ;;  %v2946_v25 = vpop.eup %2945  ;;  %v4379_v2 = vld [vmem:[#allocation7 + $0x198] sm:$0xff] }
 0x38f   :  { %v1184_v48 = vadd.f32 %v1183_v32, %v1182_v27  ;;  %v4385_v27 = vld [vmem:[#allocation7 + $0x190] sm:$0xff]  ;;  %v4388_v32 = vld [vmem:[#allocation7 + $0x168] sm:$0xff] }
 0x390   :  { %6070 = vst [vmem:[#allocation45_spill] sm:$0xff] %v4385_v27  ;;  %6071 = vst [vmem:[#allocation46_spill] sm:$0xff] %v4388_v32 }
 0x391   :  { %2947 = vtanh.f32 %v1184_v48  ;;  %v4339_v24 = vsel %vm1194_vm10, %v1184_v48, %v4062_v6  ;;  %v4352_v6 = vld [vmem:[#allocation7 + $0x1c8] sm:$0xff]  ;;  %v4391_v48 = vld [vmem:[#allocation7 + $0x178] sm:$0xff] }
 0x392   :  { %6072 = vst [vmem:[#allocation101_spill] sm:$0xff] %v4391_v48 }
 0x39e   :  { %v2948_v23 = vpop.eup %2947 }
 0x39f   :  { %v1186_v26 = vmul.f32 %v2948_v23, %v2946_v25  ;;  %v4394_v25 = vld [vmem:[#allocation7 + $0x160] sm:$0xff]  ;;  %v4397_v23 = vld [vmem:[#allocation7 + $0x170] sm:$0xff] }
 0x3a0   :  { %6073 = vst [vmem:[#allocation103_spill] sm:$0xff] %v4394_v25  ;;  %6074 = vst [vmem:[#allocation54_spill] sm:$0xff] %v4397_v23 }
 0x3a1   :  { %v1195_v3 = vsel %vm1194_vm10, %v1186_v26, 0.0  ;;  %v4342_v4 = vsel %vm1194_vm10, %v1186_v26, %v4065_v11  ;;  %v4358_v11 = vld [vmem:[#allocation7 + $0x1c0] sm:$0xff]  ;;  %v4400_v26 = vld [vmem:[#allocation7 + $0x148] sm:$0xff] }
 0x3a2   :  { %1197 = vst [vmem:[#allocation10 + $0x10] sm:$0xff] %v1195_v3  ;;  %1267 = vmatmul.mubr.f32.vlgmr.msra.gmra.mxu0 %v4342_v4  ;;  %1338 = vmatmul.mubr.f32.vlgmr.msra.gmra.mxu1 %v4342_v4  ;;  %6075 = vst [vmem:[#allocation55_spill] sm:$0xff] %v4400_v26  ;;  %v4403_v3 = vld [vmem:[#allocation7 + $0x158] sm:$0xff] }
 0x3a3   :  { %1345 = vmatpush1.msra.mxu0 %v4346_v5  ;;  %1416 = vmatpush1.msra.mxu1 %v4349_v7  ;;  %6076 = vst [vmem:[#allocation56_spill] sm:$0xff] %v4403_v3 }
 0x3a4   :  { %1346 = vmatprep.subr.mxu0 %v4352_v6  ;;  %1417 = vmatprep.subr.mxu1 %v4355_v8 }
 0x3a5   :  { %1347 = vmatpush1.msra.mxu0 %v4358_v11  ;;  %1418 = vmatpush1.msra.mxu1 %v4361_v39 }
 0x3a6   :  { %1348 = vmatprep.subr.mxu0 %v4364_v33  ;;  %1419 = vmatprep.subr.mxu1 %v4367_v31 }
 0x3a7   :  { %1349 = vmatpush1.msra.mxu0 %v4370_v30  ;;  %1420 = vmatpush1.msra.mxu1 %v4373_v29 }
 0x3a8   :  { %1350 = vmatprep.subr.mxu0 %v4376_v34  ;;  %1421 = vmatprep.subr.mxu1 %v4379_v2 }
 0x3a9   :  { %1351 = vmatpush1.msra.mxu0 %v4382_v28  ;;  %1422 = vmatpush1.msra.mxu1 %v4385_v27  ;;  %v4526_v27 = vld [vmem:[#allocation7] sm:$0xff] }
 0x3aa   :  { %1352 = vmatprep.subr.mxu0 %v4388_v32  ;;  %1423 = vmatprep.subr.mxu1 %v4391_v48  ;;  %v4406_v32 = vld [vmem:[#allocation7 + $0x140] sm:$0xff]  ;;  %v4409_v48 = vld [vmem:[#allocation7 + $0x150] sm:$0xff] }
 0x3ab   :  { %1353 = vmatpush1.msra.mxu0 %v4394_v25  ;;  %1424 = vmatpush1.msra.mxu1 %v4397_v23  ;;  %6077 = vst [vmem:[#allocation57_spill] sm:$0xff] %v4406_v32  ;;  %6078 = vst [vmem:[#allocation58_spill] sm:$0xff] %v4409_v48  ;;  %v4412_v25 = vld [vmem:[#allocation7 + $0x128] sm:$0xff]  ;;  %v4415_v23 = vld [vmem:[#allocation7 + $0x138] sm:$0xff] }
 0x3ac   :  { %1354 = vmatprep.subr.mxu0 %v4400_v26  ;;  %1425 = vmatprep.subr.mxu1 %v4403_v3  ;;  %6079 = vst [vmem:[#allocation59_spill] sm:$0xff] %v4412_v25  ;;  %6080 = vst [vmem:[#allocation60_spill] sm:$0xff] %v4415_v23  ;;  %v4418_v26 = vld [vmem:[#allocation7 + $0x120] sm:$0xff]  ;;  %v4421_v3 = vld [vmem:[#allocation7 + $0x130] sm:$0xff] }
 0x3ad   :  { %1355 = vmatpush1.msra.mxu0 %v4406_v32  ;;  %1426 = vmatpush1.msra.mxu1 %v4409_v48  ;;  %6081 = vst [vmem:[#allocation61_spill] sm:$0xff] %v4418_v26  ;;  %6082 = vst [vmem:[#allocation62_spill] sm:$0xff] %v4421_v3  ;;  %v4424_v32 = vld [vmem:[#allocation7 + $0x108] sm:$0xff]  ;;  %v4427_v48 = vld [vmem:[#allocation7 + $0x118] sm:$0xff] }
 0x3ae   :  { %1356 = vmatprep.subr.mxu0 %v4412_v25  ;;  %1427 = vmatprep.subr.mxu1 %v4415_v23  ;;  %6083 = vst [vmem:[#allocation63_spill] sm:$0xff] %v4424_v32  ;;  %6084 = vst [vmem:[#allocation64_spill] sm:$0xff] %v4427_v48  ;;  %v4430_v25 = vld [vmem:[#allocation7 + $0x100] sm:$0xff]  ;;  %v4433_v23 = vld [vmem:[#allocation7 + $0x110] sm:$0xff] }
 0x3af   :  { %1357 = vmatpush1.msra.mxu0 %v4418_v26  ;;  %1428 = vmatpush1.msra.mxu1 %v4421_v3  ;;  %6085 = vst [vmem:[#allocation65_spill] sm:$0xff] %v4430_v25  ;;  %6086 = vst [vmem:[#allocation66_spill] sm:$0xff] %v4433_v23  ;;  %v4436_v26 = vld [vmem:[#allocation7 + $0xe8] sm:$0xff]  ;;  %v4439_v3 = vld [vmem:[#allocation7 + $0xf8] sm:$0xff] }
 0x3b0   :  { %1358 = vmatprep.subr.mxu0 %v4424_v32  ;;  %1429 = vmatprep.subr.mxu1 %v4427_v48  ;;  %6087 = vst [vmem:[#allocation67_spill] sm:$0xff] %v4436_v26  ;;  %6088 = vst [vmem:[#allocation68_spill] sm:$0xff] %v4439_v3  ;;  %v4442_v32 = vld [vmem:[#allocation7 + $0xe0] sm:$0xff]  ;;  %v4445_v48 = vld [vmem:[#allocation7 + $0xf0] sm:$0xff] }
 0x3b1   :  { %1359 = vmatpush1.msra.mxu0 %v4430_v25  ;;  %1430 = vmatpush1.msra.mxu1 %v4433_v23  ;;  %6089 = vst [vmem:[#allocation69_spill] sm:$0xff] %v4442_v32  ;;  %6090 = vst [vmem:[#allocation70_spill] sm:$0xff] %v4445_v48  ;;  %v4448_v25 = vld [vmem:[#allocation7 + $0xc8] sm:$0xff]  ;;  %v4451_v23 = vld [vmem:[#allocation7 + $0xd8] sm:$0xff] }
 0x3b2   :  { %1360 = vmatprep.subr.mxu0 %v4436_v26  ;;  %1431 = vmatprep.subr.mxu1 %v4439_v3  ;;  %6091 = vst [vmem:[#allocation71_spill] sm:$0xff] %v4448_v25  ;;  %6092 = vst [vmem:[#allocation72_spill] sm:$0xff] %v4451_v23  ;;  %v4454_v26 = vld [vmem:[#allocation7 + $0xc0] sm:$0xff]  ;;  %v4457_v3 = vld [vmem:[#allocation7 + $0xd0] sm:$0xff] }
 0x3b3   :  { %1361 = vmatpush1.msra.mxu0 %v4442_v32  ;;  %1432 = vmatpush1.msra.mxu1 %v4445_v48  ;;  %6093 = vst [vmem:[#allocation73_spill] sm:$0xff] %v4454_v26  ;;  %6094 = vst [vmem:[#allocation74_spill] sm:$0xff] %v4457_v3  ;;  %v4460_v32 = vld [vmem:[#allocation7 + $0xa8] sm:$0xff]  ;;  %v4463_v48 = vld [vmem:[#allocation7 + $0xb8] sm:$0xff] }
 0x3b4   :  { %1362 = vmatprep.subr.mxu0 %v4448_v25  ;;  %1433 = vmatprep.subr.mxu1 %v4451_v23  ;;  %6095 = vst [vmem:[#allocation75_spill] sm:$0xff] %v4460_v32  ;;  %6096 = vst [vmem:[#allocation76_spill] sm:$0xff] %v4463_v48  ;;  %v4466_v25 = vld [vmem:[#allocation7 + $0xa0] sm:$0xff]  ;;  %v4469_v23 = vld [vmem:[#allocation7 + $0xb0] sm:$0xff] }
 0x3b5   :  { %1363 = vmatpush1.msra.mxu0 %v4454_v26  ;;  %1434 = vmatpush1.msra.mxu1 %v4457_v3  ;;  %6097 = vst [vmem:[#allocation77_spill] sm:$0xff] %v4466_v25  ;;  %6098 = vst [vmem:[#allocation78_spill] sm:$0xff] %v4469_v23  ;;  %v4472_v26 = vld [vmem:[#allocation7 + $0x88] sm:$0xff]  ;;  %v4475_v3 = vld [vmem:[#allocation7 + $0x98] sm:$0xff] }
 0x3b6   :  { %1364 = vmatprep.subr.mxu0 %v4460_v32  ;;  %1435 = vmatprep.subr.mxu1 %v4463_v48  ;;  %6099 = vst [vmem:[#allocation79_spill] sm:$0xff] %v4472_v26  ;;  %6100 = vst [vmem:[#allocation80_spill] sm:$0xff] %v4475_v3  ;;  %v4478_v32 = vld [vmem:[#allocation7 + $0x80] sm:$0xff]  ;;  %v4481_v48 = vld [vmem:[#allocation7 + $0x90] sm:$0xff] }
 0x3b7   :  { %1365 = vmatpush1.msra.mxu0 %v4466_v25  ;;  %1436 = vmatpush1.msra.mxu1 %v4469_v23  ;;  %6101 = vst [vmem:[#allocation81_spill] sm:$0xff] %v4478_v32  ;;  %6102 = vst [vmem:[#allocation82_spill] sm:$0xff] %v4481_v48  ;;  %v4484_v25 = vld [vmem:[#allocation7 + $0x68] sm:$0xff]  ;;  %v4487_v23 = vld [vmem:[#allocation7 + $0x78] sm:$0xff] }
 0x3b8   :  { %1366 = vmatprep.subr.mxu0 %v4472_v26  ;;  %1437 = vmatprep.subr.mxu1 %v4475_v3  ;;  %6103 = vst [vmem:[#allocation83_spill] sm:$0xff] %v4484_v25  ;;  %6104 = vst [vmem:[#allocation84_spill] sm:$0xff] %v4487_v23  ;;  %v4490_v26 = vld [vmem:[#allocation7 + $0x60] sm:$0xff]  ;;  %v4493_v3 = vld [vmem:[#allocation7 + $0x70] sm:$0xff] }
 0x3b9   :  { %1367 = vmatpush1.msra.mxu0 %v4478_v32  ;;  %1438 = vmatpush1.msra.mxu1 %v4481_v48  ;;  %6105 = vst [vmem:[#allocation85_spill] sm:$0xff] %v4490_v26  ;;  %6106 = vst [vmem:[#allocation87_spill] sm:$0xff] %v4493_v3  ;;  %v4496_v32 = vld [vmem:[#allocation7 + $0x48] sm:$0xff]  ;;  %v4499_v48 = vld [vmem:[#allocation7 + $0x58] sm:$0xff] }
 0x3ba   :  { %1368 = vmatprep.subr.mxu0 %v4484_v25  ;;  %1439 = vmatprep.subr.mxu1 %v4487_v23  ;;  %6107 = vst [vmem:[#allocation89_spill] sm:$0xff] %v4496_v32  ;;  %6108 = vst [vmem:[#allocation90_spill] sm:$0xff] %v4499_v48  ;;  %v4502_v25 = vld [vmem:[#allocation7 + $0x40] sm:$0xff]  ;;  %v4505_v23 = vld [vmem:[#allocation7 + $0x50] sm:$0xff] }
 0x3bb   :  { %1369 = vmatpush1.msra.mxu0 %v4490_v26  ;;  %1440 = vmatpush1.msra.mxu1 %v4493_v3  ;;  %6109 = vst [vmem:[#allocation91_spill] sm:$0xff] %v4502_v25  ;;  %6110 = vst [vmem:[#allocation95_spill] sm:$0xff] %v4505_v23  ;;  %v4508_v26 = vld [vmem:[#allocation7 + $0x28] sm:$0xff]  ;;  %v4511_v3 = vld [vmem:[#allocation7 + $0x38] sm:$0xff] }
 0x3bc   :  { %1370 = vmatprep.subr.mxu0 %v4496_v32  ;;  %1441 = vmatprep.subr.mxu1 %v4499_v48  ;;  %6111 = vst [vmem:[#allocation96_spill] sm:$0xff] %v4508_v26  ;;  %v4514_v32 = vld [vmem:[#allocation7 + $0x20] sm:$0xff]  ;;  %v4517_v48 = vld [vmem:[#allocation7 + $0x30] sm:$0xff] }
 0x3bd   :  { %1371 = vmatpush1.msra.mxu0 %v4502_v25  ;;  %1442 = vmatpush1.msra.mxu1 %v4505_v23  ;;  %6112 = vst [vmem:[#allocation104_spill] sm:$0xff] %v4514_v32  ;;  %v4520_v25 = vld [vmem:[#allocation7 + $0x8] sm:$0xff]  ;;  %v4523_v23 = vld [vmem:[#allocation7 + $0x18] sm:$0xff] }
 0x3be   :  { %1372 = vmatprep.subr.mxu0 %v4508_v26  ;;  %1443 = vmatprep.subr.mxu1 %v4511_v3  ;;  %v1201_v26 = vld [vmem:[#allocation4 + $0x18] sm:$0xff] }
 0x3bf   :  { %1373 = vmatpush1.msra.mxu0 %v4514_v32  ;;  %1444 = vmatpush1.msra.mxu1 %v4517_v48  ;;  %v4530_v32 = vld [vmem:[#allocation7 + $0x10] sm:$0xff] }
 0x3c0   :  { %1374 = vmatprep.subr.mxu0 %v4520_v25  ;;  %1445 = vmatprep.subr.mxu1 %v4523_v23  ;;  %6113 = vst [vmem:[#allocation105_spill] sm:$0xff] %v4530_v32 }
 0x3c1   :  { %1375 = vmatpush1.msra.mxu0 %v4526_v27  ;;  %1408 = vmatprep.mubr.f32.mxu0 %v5821_v56 }
 0x3c2   :  { %1446 = vmatpush1.msra.mxu1 %v4530_v32  ;;  %1479 = vmatprep.mubr.f32.mxu1 %v5821_v56 }
 0x3c3   :  { %1409 = vmatmul.mubr.f32.vlgmr.msra.gmra.mxu0 %v1201_v26  ;;  %1480 = vmatmul.mubr.f32.vlgmr.msra.gmra.mxu1 %v1201_v26  ;;  %v6114_v26 = vld [vmem:[#allocation16_spill] sm:$0xff] }
 0x3c4   :  { %1529 = vmatprep.subr.mxu0 %v4133_v0  ;;  %1600 = vmatprep.subr.mxu1 %v4136_v55 }
 0x3c5   :  { %1530 = vmatpush1.msra.mxu0 %v4139_v1  ;;  %1601 = vmatpush1.msra.mxu1 %v4142_v53 }
 0x3c6   :  { %1531 = vmatprep.subr.mxu0 %v4145_v60  ;;  %1602 = vmatprep.subr.mxu1 %v4148_v61 }
 0x3c7   :  { %1532 = vmatpush1.msra.mxu0 %v4151_v62  ;;  %1603 = vmatpush1.msra.mxu1 %v4154_v38 }
 0x3c8   :  { %1533 = vmatprep.subr.mxu0 %v4157_v41  ;;  %1604 = vmatprep.subr.mxu1 %v4160_v45 }
 0x3c9   :  { %1534 = vmatpush1.msra.mxu0 %v4163_v49  ;;  %1605 = vmatpush1.msra.mxu1 %v4166_v51 }
 0x3ca   :  { %1535 = vmatprep.subr.mxu0 %v4169_v35  ;;  %1606 = vmatprep.subr.mxu1 %v4172_v52 }
 0x3cb   :  { %1536 = vmatpush1.msra.mxu0 %v4175_v54  ;;  %1607 = vmatpush1.msra.mxu1 %v4178_v50 }
 0x3cc   :  { %1537 = vmatprep.subr.mxu0 %v4181_v9  ;;  %1608 = vmatprep.subr.mxu1 %v4184_v10 }
 0x3cd   :  { %1538 = vmatpush1.msra.mxu0 %v4187_v57  ;;  %1609 = vmatpush1.msra.mxu1 %v4190_v46 }
 0x3ce   :  { %1539 = vmatprep.subr.mxu0 %v4193_v12  ;;  %1610 = vmatprep.subr.mxu1 %v4196_v13 }
 0x3cf   :  { %1540 = vmatpush1.msra.mxu0 %v4199_v59  ;;  %1611 = vmatpush1.msra.mxu1 %v4202_v44 }
 0x3d0   :  { %1541 = vmatprep.subr.mxu0 %v4205_v47  ;;  %1612 = vmatprep.subr.mxu1 %v4208_v58 }
 0x3d1   :  { %1542 = vmatpush1.msra.mxu0 %v4211_v42  ;;  %1613 = vmatpush1.msra.mxu1 %v4214_v40  ;;  %v6115_v40 = vld [vmem:[#allocation17_spill] sm:$0xff] }
 0x3d2   :  { %1543 = vmatprep.subr.mxu0 %v4217_v37  ;;  %1614 = vmatprep.subr.mxu1 %v4220_v15  ;;  %v6116_v37 = vld [vmem:[#allocation18_spill] sm:$0xff]  ;;  %v6117_v15 = vld [vmem:[#allocation19_spill] sm:$0xff] }
 0x3d3   :  { %1544 = vmatpush1.msra.mxu0 %v4223_v16  ;;  %1615 = vmatpush1.msra.mxu1 %v4226_v17  ;;  %v6118_v16 = vld [vmem:[#allocation20_spill] sm:$0xff]  ;;  %v6119_v17 = vld [vmem:[#allocation21_spill] sm:$0xff] }
 0x3d4   :  { %1545 = vmatprep.subr.mxu0 %v4229_v18  ;;  %1616 = vmatprep.subr.mxu1 %v4232_v19  ;;  %v6120_v18 = vld [vmem:[#allocation22_spill] sm:$0xff]  ;;  %v6121_v19 = vld [vmem:[#allocation23_spill] sm:$0xff] }
 0x3d5   :  { %1546 = vmatpush1.msra.mxu0 %v4235_v20  ;;  %1617 = vmatpush1.msra.mxu1 %v4238_v21  ;;  %v6122_v20 = vld [vmem:[#allocation24_spill] sm:$0xff]  ;;  %v6123_v21 = vld [vmem:[#allocation25_spill] sm:$0xff] }
 0x3d6   :  { %1547 = vmatprep.subr.mxu0 %v4241_v22  ;;  %1618 = vmatprep.subr.mxu1 %v6114_v26  ;;  %v6124_v22 = vld [vmem:[#allocation26_spill] sm:$0xff]  ;;  %v6125_v26 = vld [vmem:[#allocation27_spill] sm:$0xff] }
 0x3d7   :  { %1548 = vmatpush1.msra.mxu0 %v6115_v40  ;;  %1619 = vmatpush1.msra.mxu1 %v6116_v37  ;;  %v6126_v40 = vld [vmem:[#allocation28_spill] sm:$0xff]  ;;  %v6127_v37 = vld [vmem:[#allocation29_spill] sm:$0xff] }
 0x3d8   :  { %1549 = vmatprep.subr.mxu0 %v6117_v15  ;;  %1620 = vmatprep.subr.mxu1 %v6118_v16  ;;  %v6128_v15 = vld [vmem:[#allocation30_spill] sm:$0xff]  ;;  %v6129_v16 = vld [vmem:[#allocation31_spill] sm:$0xff] }
 0x3d9   :  { %1550 = vmatpush1.msra.mxu0 %v6119_v17  ;;  %1621 = vmatpush1.msra.mxu1 %v6120_v18  ;;  %v6130_v17 = vld [vmem:[#allocation32_spill] sm:$0xff]  ;;  %v6131_v18 = vld [vmem:[#allocation33_spill] sm:$0xff] }
 0x3da   :  { %1551 = vmatprep.subr.mxu0 %v6121_v19  ;;  %1622 = vmatprep.subr.mxu1 %v6122_v20  ;;  %v6132_v19 = vld [vmem:[#allocation34_spill] sm:$0xff]  ;;  %v6133_v20 = vld [vmem:[#allocation35_spill] sm:$0xff] }
 0x3db   :  { %1552 = vmatpush1.msra.mxu0 %v6123_v21  ;;  %1623 = vmatpush1.msra.mxu1 %v6124_v22  ;;  %v6134_v21 = vld [vmem:[#allocation36_spill] sm:$0xff]  ;;  %v6135_v22 = vld [vmem:[#allocation37_spill] sm:$0xff] }
 0x3dc   :  { %1553 = vmatprep.subr.mxu0 %v6125_v26  ;;  %1624 = vmatprep.subr.mxu1 %v6126_v40  ;;  %v6136_v26 = vld [vmem:[#allocation38_spill] sm:$0xff]  ;;  %v6137_v40 = vld [vmem:[#allocation39_spill] sm:$0xff] }
 0x3dd   :  { %1554 = vmatpush1.msra.mxu0 %v6127_v37  ;;  %1625 = vmatpush1.msra.mxu1 %v6128_v15  ;;  %v6138_v37 = vld [vmem:[#allocation40_spill] sm:$0xff]  ;;  %v6139_v15 = vld [vmem:[#allocation41_spill] sm:$0xff] }
 0x3de   :  { %1555 = vmatprep.subr.mxu0 %v6129_v16  ;;  %1626 = vmatprep.subr.mxu1 %v6130_v17  ;;  %v6140_v16 = vld [vmem:[#allocation42_spill] sm:$0xff] }
 0x3df   :  { %1556 = vmatpush1.msra.mxu0 %v6131_v18  ;;  %1627 = vmatpush1.msra.mxu1 %v6132_v19  ;;  %v6141_v19 = vld [vmem:[#allocation43_spill] sm:$0xff] }
 0x3e0   :  { %1557 = vmatprep.subr.mxu0 %v6133_v20  ;;  %1628 = vmatprep.subr.mxu1 %v6134_v21  ;;  %v6142_v20 = vld [vmem:[#allocation44_spill] sm:$0xff] }
 0x3e1   :  { %1558 = vmatpush1.msra.mxu0 %v6135_v22  ;;  %1629 = vmatpush1.msra.mxu1 %v6136_v26 }
 0x3e2   :  { %1559 = vmatprep.subr.mxu0 %v6137_v40  ;;  %1630 = vmatprep.subr.mxu1 %v6138_v37 }
 0x3e3   :  { %1560 = vmatpush1.msra.mxu0 %v6139_v15  ;;  %1631 = vmatpush1.msra.mxu1 %v6140_v16 }
 0x3e4   :  { %1593 = vmatprep.mubr.f32.mxu0 %v5821_v56  ;;  %1664 = vmatprep.mubr.f32.mxu1 %v5821_v56 }
 0x3e5   :  { %1671 = vmatprep.subr.mxu0 %v6141_v19  ;;  %1742 = vmatprep.subr.mxu1 %v6142_v20 }
 0x462   :  { %v1268_v21 = vpop.f32.mrf.mxu0  ;;  %v1339_v22 = vpop.f32.mrf.mxu1 }
 0x464   :  { %v1270_v18 = vpop.f32.mrf.mxu0  ;;  %v1341_v17 = vpop.f32.mrf.mxu1 }
 0x483   :  { %v1410_v26 = vpop.f32.mrf.mxu0  ;;  %v1481_v15 = vpop.f32.mrf.mxu1 }
 0x484   :  { %v1411_v40 = vadd.f32 %v1410_v26, %v1268_v21  ;;  %v1482_v13 = vadd.f32 %v1481_v15, %v1339_v22  ;;  %v1520_v15 = vpop.permute.xlu1 %1519  ;;  %v6144_v22 = vld [vmem:[#allocation46_spill] sm:$0xff] }
 0x485   :  { %v1412_v42 = vpop.f32.mrf.mxu0  ;;  %v1483_v59 = vpop.f32.mrf.mxu1  ;;  %vm1521_vm11 = vcmp.eq.s32.totalorder %v1520_v15, 1  ;;  %v6157_v15 = vld [vmem:[#allocation64_spill] sm:$0xff] }
 0x486   :  { %v1486_v37 = vadd.f32 %v1411_v40, %v5983_v14  ;;  %v1413_v58 = vadd.f32 %v1412_v42, %v1270_v18  ;;  %v1484_v19 = vadd.f32 %v1483_v59, %v1341_v17  ;;  %v1488_v21 = vadd.f32 %v1482_v13, %v3908_v63 }
 0x488   :  { %v2867_v16 = vmul.f32 -1.442695, %v1486_v37  ;;  %v1487_v47 = vadd.f32 %v1413_v58, %v3901_v43  ;;  %v1489_v20 = vadd.f32 %v1484_v19, %v3905_v36 }
 0x48a   :  { %2949 = vpow2.f32 %v2867_v16  ;;  %v2868_v44 = vmul.f32 -1.442695, %v1487_v47  ;;  %v2869_v12 = vmul.f32 -1.442695, %v1489_v20  ;;  %v6143_v20 = vld [vmem:[#allocation45_spill] sm:$0xff] }
 0x48c   :  { %2951 = vpow2.f32 %v2868_v44 }
 0x48d   :  { %2953 = vpow2.f32 %v2869_v12 }
 0x497   :  { %v2950_v46 = vpop.eup %2949 }
 0x498   :  { %v1493_v26 = vadd.f32 1.0, %v2950_v46 }
 0x499   :  { %v2952_v57 = vpop.eup %2951 }
 0x49a   :  { %2955 = vrcp.f32 %v1493_v26  ;;  %v1499_v42 = vadd.f32 1.0, %v2952_v57  ;;  %v2954_v58 = vpop.eup %2953  ;;  %v6148_v26 = vld [vmem:[#allocation55_spill] sm:$0xff] }
 0x49b   :  { %2957 = vtanh.f32 %v1488_v21  ;;  %v1506_v44 = vadd.f32 1.0, %v2954_v58  ;;  %v6147_v21 = vld [vmem:[#allocation54_spill] sm:$0xff]  ;;  %v6150_v58 = vld [vmem:[#allocation57_spill] sm:$0xff] }
 0x49c   :  { %2959 = vrcp.f32 %v1499_v42  ;;  %v6149_v42 = vld [vmem:[#allocation56_spill] sm:$0xff] }
 0x49d   :  { %2961 = vrcp.f32 %v1506_v44  ;;  %v6154_v44 = vld [vmem:[#allocation61_spill] sm:$0xff] }
 0x4a7   :  { %v2956_v40 = vpop.eup %2955 }
 0x4a8   :  { %v2958_v47 = vpop.eup %2957 }
 0x4a9   :  { %v2960_v37 = vpop.eup %2959  ;;  %v1510_v59 = vmul.f32 %v2958_v47, %v2956_v40  ;;  %v6151_v40 = vld [vmem:[#allocation58_spill] sm:$0xff]  ;;  %v6152_v47 = vld [vmem:[#allocation59_spill] sm:$0xff] }
 0x4aa   :  { %v1509_v16 = vmul.f32 %v2960_v37, %v4339_v24  ;;  %v2962_v12 = vpop.eup %2961  ;;  %v6153_v37 = vld [vmem:[#allocation60_spill] sm:$0xff] }
 0x4ac   :  { %v1511_v17 = vadd.f32 %v1510_v59, %v1509_v16  ;;  %v6155_v59 = vld [vmem:[#allocation62_spill] sm:$0xff]  ;;  %v6156_v16 = vld [vmem:[#allocation63_spill] sm:$0xff] }
 0x4ae   :  { %2963 = vtanh.f32 %v1511_v17  ;;  %v4608_v46 = vsel %vm1521_vm11, %v1511_v17, %v4339_v24  ;;  %v6145_v24 = vld [vmem:[#allocation101_spill] sm:$0xff] }
 0x4af   :  { %v6158_v17 = vld [vmem:[#allocation65_spill] sm:$0xff] }
 0x4bb   :  { %v2964_v57 = vpop.eup %2963 }
 0x4bc   :  { %v1513_v13 = vmul.f32 %v2964_v57, %v2962_v12  ;;  %v6159_v12 = vld [vmem:[#allocation66_spill] sm:$0xff]  ;;  %v6160_v57 = vld [vmem:[#allocation67_spill] sm:$0xff] }
 0x4be   :  { %v1522_v18 = vsel %vm1521_vm11, %v1513_v13, 0.0  ;;  %v4611_v19 = vsel %vm1521_vm11, %v1513_v13, %v4342_v4  ;;  %v6146_v4 = vld [vmem:[#allocation103_spill] sm:$0xff]  ;;  %v6161_v13 = vld [vmem:[#allocation68_spill] sm:$0xff] }
 0x4bf   :  { %1524 = vst [vmem:[#allocation10 + $0x18] sm:$0xff] %v1522_v18  ;;  %1594 = vmatmul.mubr.f32.vlgmr.msra.gmra.mxu0 %v4611_v19  ;;  %1665 = vmatmul.mubr.f32.vlgmr.msra.gmra.mxu1 %v4611_v19  ;;  %v6162_v18 = vld [vmem:[#allocation69_spill] sm:$0xff] }
 0x4c0   :  { %1672 = vmatpush1.msra.mxu0 %v4346_v5  ;;  %1743 = vmatpush1.msra.mxu1 %v4349_v7 }
 0x4c1   :  { %1673 = vmatprep.subr.mxu0 %v4352_v6  ;;  %1744 = vmatprep.subr.mxu1 %v4355_v8 }
 0x4c2   :  { %1674 = vmatpush1.msra.mxu0 %v4358_v11  ;;  %1745 = vmatpush1.msra.mxu1 %v4361_v39 }
 0x4c3   :  { %1675 = vmatprep.subr.mxu0 %v4364_v33  ;;  %1746 = vmatprep.subr.mxu1 %v4367_v31 }
 0x4c4   :  { %1676 = vmatpush1.msra.mxu0 %v4370_v30  ;;  %1747 = vmatpush1.msra.mxu1 %v4373_v29 }
 0x4c5   :  { %1677 = vmatprep.subr.mxu0 %v4376_v34  ;;  %1748 = vmatprep.subr.mxu1 %v4379_v2 }
 0x4c6   :  { %1678 = vmatpush1.msra.mxu0 %v4382_v28  ;;  %1749 = vmatpush1.msra.mxu1 %v6143_v20 }
 0x4c7   :  { %1679 = vmatprep.subr.mxu0 %v6144_v22  ;;  %1750 = vmatprep.subr.mxu1 %v6145_v24 }
 0x4c8   :  { %1680 = vmatpush1.msra.mxu0 %v6146_v4  ;;  %1751 = vmatpush1.msra.mxu1 %v6147_v21 }
 0x4c9   :  { %1681 = vmatprep.subr.mxu0 %v6148_v26  ;;  %1752 = vmatprep.subr.mxu1 %v6149_v42 }
 0x4ca   :  { %1682 = vmatpush1.msra.mxu0 %v6150_v58  ;;  %1753 = vmatpush1.msra.mxu1 %v6151_v40 }
 0x4cb   :  { %1683 = vmatprep.subr.mxu0 %v6152_v47  ;;  %1754 = vmatprep.subr.mxu1 %v6153_v37  ;;  %v6163_v47 = vld [vmem:[#allocation70_spill] sm:$0xff]  ;;  %v6164_v37 = vld [vmem:[#allocation71_spill] sm:$0xff] }
 0x4cc   :  { %1684 = vmatpush1.msra.mxu0 %v6154_v44  ;;  %1755 = vmatpush1.msra.mxu1 %v6155_v59  ;;  %v6165_v44 = vld [vmem:[#allocation72_spill] sm:$0xff]  ;;  %v6166_v59 = vld [vmem:[#allocation73_spill] sm:$0xff] }
 0x4cd   :  { %1685 = vmatprep.subr.mxu0 %v6156_v16  ;;  %1756 = vmatprep.subr.mxu1 %v6157_v15  ;;  %v6167_v16 = vld [vmem:[#allocation74_spill] sm:$0xff]  ;;  %v6168_v15 = vld [vmem:[#allocation75_spill] sm:$0xff] }
 0x4ce   :  { %1686 = vmatpush1.msra.mxu0 %v6158_v17  ;;  %1757 = vmatpush1.msra.mxu1 %v6159_v12  ;;  %v6169_v17 = vld [vmem:[#allocation76_spill] sm:$0xff]  ;;  %v6170_v12 = vld [vmem:[#allocation77_spill] sm:$0xff] }
 0x4cf   :  { %1687 = vmatprep.subr.mxu0 %v6160_v57  ;;  %1758 = vmatprep.subr.mxu1 %v6161_v13  ;;  %v6171_v57 = vld [vmem:[#allocation78_spill] sm:$0xff]  ;;  %v6172_v13 = vld [vmem:[#allocation79_spill] sm:$0xff] }
 0x4d0   :  { %1688 = vmatpush1.msra.mxu0 %v6162_v18  ;;  %1759 = vmatpush1.msra.mxu1 %v6163_v47  ;;  %v6173_v18 = vld [vmem:[#allocation80_spill] sm:$0xff]  ;;  %v6174_v47 = vld [vmem:[#allocation81_spill] sm:$0xff] }
 0x4d1   :  { %1689 = vmatprep.subr.mxu0 %v6164_v37  ;;  %1760 = vmatprep.subr.mxu1 %v6165_v44  ;;  %v6175_v37 = vld [vmem:[#allocation82_spill] sm:$0xff]  ;;  %v6176_v44 = vld [vmem:[#allocation83_spill] sm:$0xff] }
 0x4d2   :  { %1690 = vmatpush1.msra.mxu0 %v6166_v59  ;;  %1761 = vmatpush1.msra.mxu1 %v6167_v16  ;;  %v6177_v59 = vld [vmem:[#allocation84_spill] sm:$0xff]  ;;  %v6178_v16 = vld [vmem:[#allocation85_spill] sm:$0xff] }
 0x4d3   :  { %1691 = vmatprep.subr.mxu0 %v6168_v15  ;;  %1762 = vmatprep.subr.mxu1 %v6169_v17  ;;  %v6179_v15 = vld [vmem:[#allocation87_spill] sm:$0xff]  ;;  %v6180_v17 = vld [vmem:[#allocation89_spill] sm:$0xff] }
 0x4d4   :  { %1692 = vmatpush1.msra.mxu0 %v6170_v12  ;;  %1763 = vmatpush1.msra.mxu1 %v6171_v57  ;;  %v6181_v12 = vld [vmem:[#allocation90_spill] sm:$0xff]  ;;  %v6182_v57 = vld [vmem:[#allocation91_spill] sm:$0xff] }
 0x4d5   :  { %1693 = vmatprep.subr.mxu0 %v6172_v13  ;;  %1764 = vmatprep.subr.mxu1 %v6173_v18  ;;  %v6183_v13 = vld [vmem:[#allocation95_spill] sm:$0xff]  ;;  %v6184_v18 = vld [vmem:[#allocation96_spill] sm:$0xff] }
 0x4d6   :  { %1694 = vmatpush1.msra.mxu0 %v6174_v47  ;;  %1765 = vmatpush1.msra.mxu1 %v6175_v37  ;;  %v6185_v37 = vld [vmem:[#allocation104_spill] sm:$0xff] }
 0x4d7   :  { %1695 = vmatprep.subr.mxu0 %v6176_v44  ;;  %1766 = vmatprep.subr.mxu1 %v6177_v59 }
 0x4d8   :  { %1696 = vmatpush1.msra.mxu0 %v6178_v16  ;;  %1767 = vmatpush1.msra.mxu1 %v6179_v15  ;;  %v1528_v15 = vld [vmem:[#allocation4 + $0x20] sm:$0xff] }
 0x4d9   :  { %1697 = vmatprep.subr.mxu0 %v6180_v17  ;;  %1768 = vmatprep.subr.mxu1 %v6181_v12 }
 0x4da   :  { %1698 = vmatpush1.msra.mxu0 %v6182_v57  ;;  %1769 = vmatpush1.msra.mxu1 %v6183_v13 }
 0x4db   :  { %1699 = vmatprep.subr.mxu0 %v6184_v18  ;;  %1770 = vmatprep.subr.mxu1 %v4511_v3 }
 0x4dc   :  { %1700 = vmatpush1.msra.mxu0 %v6185_v37  ;;  %1771 = vmatpush1.msra.mxu1 %v4517_v48 }
 0x4dd   :  { %1701 = vmatprep.subr.mxu0 %v4520_v25  ;;  %1772 = vmatprep.subr.mxu1 %v4523_v23 }
 0x4de   :  { %1702 = vmatpush1.msra.mxu0 %v4526_v27  ;;  %1735 = vmatprep.mubr.f32.mxu0 %v5821_v56 }
 0x4df   :  { %1773 = vmatpush1.msra.mxu1 %v4530_v32  ;;  %1806 = vmatprep.mubr.f32.mxu1 %v5821_v56 }
 0x4e0   :  { %1736 = vmatmul.mubr.f32.vlgmr.msra.gmra.mxu0 %v1528_v15  ;;  %1807 = vmatmul.mubr.f32.vlgmr.msra.gmra.mxu1 %v1528_v15  ;;  %v6204_v15 = vld [vmem:[#allocation15_spill] sm:$0xff] }
 0x4e1   :  { %1856 = vmatprep.subr.mxu0 %v4133_v0  ;;  %1927 = vmatprep.subr.mxu1 %v4136_v55  ;;  %v6186_v0 = vld [vmem:[#allocation47_spill] sm:$0xff]  ;;  %v6187_v55 = vld [vmem:[#allocation48_spill] sm:$0xff] }
 0x4e2   :  { %1857 = vmatpush1.msra.mxu0 %v4139_v1  ;;  %1928 = vmatpush1.msra.mxu1 %v4142_v53  ;;  %v6188_v1 = vld [vmem:[#allocation49_spill] sm:$0xff]  ;;  %v6189_v53 = vld [vmem:[#allocation50_spill] sm:$0xff] }
 0x4e3   :  { %1858 = vmatprep.subr.mxu0 %v4145_v60  ;;  %1929 = vmatprep.subr.mxu1 %v4148_v61  ;;  %v6190_v60 = vld [vmem:[#allocation51_spill] sm:$0xff]  ;;  %v6191_v61 = vld [vmem:[#allocation52_spill] sm:$0xff] }
 0x4e4   :  { %1859 = vmatpush1.msra.mxu0 %v4151_v62  ;;  %1930 = vmatpush1.msra.mxu1 %v4154_v38  ;;  %v6192_v62 = vld [vmem:[#allocation53_spill] sm:$0xff]  ;;  %v6193_v38 = vld [vmem:[#allocation86_spill] sm:$0xff] }
 0x4e5   :  { %1860 = vmatprep.subr.mxu0 %v4157_v41  ;;  %1931 = vmatprep.subr.mxu1 %v4160_v45  ;;  %v6194_v41 = vld [vmem:[#allocation88_spill] sm:$0xff] }
 0x4e6   :  { %1861 = vmatpush1.msra.mxu0 %v4163_v49  ;;  %1932 = vmatpush1.msra.mxu1 %v4166_v51  ;;  %v6195_v45 = vld [vmem:[#allocation92_spill] sm:$0xff]  ;;  %v6196_v49 = vld [vmem:[#allocation93_spill] sm:$0xff]  ;;  %v6197_v51 = vld [vmem:[#allocation94_spill] sm:$0xff] }
 0x4e7   :  { %1862 = vmatprep.subr.mxu0 %v4169_v35  ;;  %1933 = vmatprep.subr.mxu1 %v4172_v52  ;;  %v6198_v35 = vld [vmem:[#allocation97_spill] sm:$0xff]  ;;  %v6199_v52 = vld [vmem:[#allocation98_spill] sm:$0xff] }
 0x4e8   :  { %1863 = vmatpush1.msra.mxu0 %v4175_v54  ;;  %1934 = vmatpush1.msra.mxu1 %v4178_v50  ;;  %v6200_v54 = vld [vmem:[#allocation99_spill] sm:$0xff]  ;;  %v6201_v50 = vld [vmem:[#allocation100_spill] sm:$0xff] }
 0x4e9   :  { %1864 = vmatprep.subr.mxu0 %v4181_v9  ;;  %1935 = vmatprep.subr.mxu1 %v4184_v10  ;;  %v6202_v9 = vld [vmem:[#allocation102_spill] sm:$0xff] }
 0x4ea   :  { %1865 = vmatpush1.msra.mxu0 %v6186_v0  ;;  %1936 = vmatpush1.msra.mxu1 %v6187_v55  ;;  %v6203_v10 = vld [vmem:[#allocation14_spill] sm:$0xff]  ;;  %v6205_v0 = vld [vmem:[#allocation16_spill] sm:$0xff]  ;;  %v6206_v55 = vld [vmem:[#allocation17_spill] sm:$0xff] }
 0x4eb   :  { %1866 = vmatprep.subr.mxu0 %v6188_v1  ;;  %1937 = vmatprep.subr.mxu1 %v6189_v53  ;;  %v6207_v1 = vld [vmem:[#allocation18_spill] sm:$0xff]  ;;  %v6208_v53 = vld [vmem:[#allocation19_spill] sm:$0xff] }
 0x4ec   :  { %1867 = vmatpush1.msra.mxu0 %v6190_v60  ;;  %1938 = vmatpush1.msra.mxu1 %v6191_v61  ;;  %v6209_v60 = vld [vmem:[#allocation20_spill] sm:$0xff]  ;;  %v6210_v61 = vld [vmem:[#allocation21_spill] sm:$0xff] }
 0x4ed   :  { %1868 = vmatprep.subr.mxu0 %v6192_v62  ;;  %1939 = vmatprep.subr.mxu1 %v6193_v38  ;;  %v6211_v62 = vld [vmem:[#allocation22_spill] sm:$0xff]  ;;  %v6212_v38 = vld [vmem:[#allocation23_spill] sm:$0xff] }
 0x4ee   :  { %1869 = vmatpush1.msra.mxu0 %v6194_v41  ;;  %1940 = vmatpush1.msra.mxu1 %v6195_v45  ;;  %v6213_v41 = vld [vmem:[#allocation24_spill] sm:$0xff]  ;;  %v6214_v45 = vld [vmem:[#allocation25_spill] sm:$0xff] }
 0x4ef   :  { %1870 = vmatprep.subr.mxu0 %v6196_v49  ;;  %1941 = vmatprep.subr.mxu1 %v6197_v51  ;;  %v6215_v49 = vld [vmem:[#allocation26_spill] sm:$0xff]  ;;  %v6216_v51 = vld [vmem:[#allocation27_spill] sm:$0xff] }
 0x4f0   :  { %1871 = vmatpush1.msra.mxu0 %v6198_v35  ;;  %1942 = vmatpush1.msra.mxu1 %v6199_v52  ;;  %v6217_v35 = vld [vmem:[#allocation28_spill] sm:$0xff]  ;;  %v6218_v52 = vld [vmem:[#allocation29_spill] sm:$0xff] }
 0x4f1   :  { %1872 = vmatprep.subr.mxu0 %v6200_v54  ;;  %1943 = vmatprep.subr.mxu1 %v6201_v50  ;;  %v6219_v54 = vld [vmem:[#allocation30_spill] sm:$0xff]  ;;  %v6220_v50 = vld [vmem:[#allocation31_spill] sm:$0xff] }
 0x4f2   :  { %1873 = vmatpush1.msra.mxu0 %v6202_v9  ;;  %1944 = vmatpush1.msra.mxu1 %v6203_v10  ;;  %v6221_v9 = vld [vmem:[#allocation32_spill] sm:$0xff]  ;;  %v6222_v10 = vld [vmem:[#allocation33_spill] sm:$0xff] }
 0x4f3   :  { %1874 = vmatprep.subr.mxu0 %v6204_v15  ;;  %1945 = vmatprep.subr.mxu1 %v6205_v0  ;;  %v6223_v15 = vld [vmem:[#allocation34_spill] sm:$0xff]  ;;  %v6224_v0 = vld [vmem:[#allocation35_spill] sm:$0xff] }
 0x4f4   :  { %1875 = vmatpush1.msra.mxu0 %v6206_v55  ;;  %1946 = vmatpush1.msra.mxu1 %v6207_v1  ;;  %v6225_v55 = vld [vmem:[#allocation36_spill] sm:$0xff]  ;;  %v6226_v1 = vld [vmem:[#allocation37_spill] sm:$0xff] }
 0x4f5   :  { %1876 = vmatprep.subr.mxu0 %v6208_v53  ;;  %1947 = vmatprep.subr.mxu1 %v6209_v60  ;;  %v6227_v53 = vld [vmem:[#allocation38_spill] sm:$0xff]  ;;  %v6228_v60 = vld [vmem:[#allocation39_spill] sm:$0xff] }
 0x4f6   :  { %1877 = vmatpush1.msra.mxu0 %v6210_v61  ;;  %1948 = vmatpush1.msra.mxu1 %v6211_v62  ;;  %v6229_v61 = vld [vmem:[#allocation40_spill] sm:$0xff]  ;;  %v6230_v62 = vld [vmem:[#allocation41_spill] sm:$0xff] }
 0x4f7   :  { %1878 = vmatprep.subr.mxu0 %v6212_v38  ;;  %1949 = vmatprep.subr.mxu1 %v6213_v41  ;;  %v6231_v38 = vld [vmem:[#allocation42_spill] sm:$0xff]  ;;  %v6232_v41 = vld [vmem:[#allocation43_spill] sm:$0xff] }
 0x4f8   :  { %1879 = vmatpush1.msra.mxu0 %v6214_v45  ;;  %1950 = vmatpush1.msra.mxu1 %v6215_v49  ;;  %v6233_v45 = vld [vmem:[#allocation44_spill] sm:$0xff] }
 0x4f9   :  { %1880 = vmatprep.subr.mxu0 %v6216_v51  ;;  %1951 = vmatprep.subr.mxu1 %v6217_v35 }
 0x4fa   :  { %1881 = vmatpush1.msra.mxu0 %v6218_v52  ;;  %1952 = vmatpush1.msra.mxu1 %v6219_v54 }
 0x4fb   :  { %1882 = vmatprep.subr.mxu0 %v6220_v50  ;;  %1953 = vmatprep.subr.mxu1 %v6221_v9 }
 0x4fc   :  { %1883 = vmatpush1.msra.mxu0 %v6222_v10  ;;  %1954 = vmatpush1.msra.mxu1 %v6223_v15 }
 0x4fd   :  { %1884 = vmatprep.subr.mxu0 %v6224_v0  ;;  %1955 = vmatprep.subr.mxu1 %v6225_v55 }
 0x4fe   :  { %1885 = vmatpush1.msra.mxu0 %v6226_v1  ;;  %1956 = vmatpush1.msra.mxu1 %v6227_v53 }
 0x4ff   :  { %1886 = vmatprep.subr.mxu0 %v6228_v60  ;;  %1957 = vmatprep.subr.mxu1 %v6229_v61 }
 0x500   :  { %1887 = vmatpush1.msra.mxu0 %v6230_v62  ;;  %1958 = vmatpush1.msra.mxu1 %v6231_v38 }
 0x501   :  { %1920 = vmatprep.mubr.f32.mxu0 %v5821_v56  ;;  %1991 = vmatprep.mubr.f32.mxu1 %v5821_v56 }
 0x502   :  { %1998 = vmatprep.subr.mxu0 %v6232_v41  ;;  %2069 = vmatprep.subr.mxu1 %v6233_v45 }
 0x57f   :  { %v1595_v49 = vpop.f32.mrf.mxu0  ;;  %v1666_v51 = vpop.f32.mrf.mxu1 }
 0x581   :  { %v1597_v35 = vpop.f32.mrf.mxu0  ;;  %v1668_v54 = vpop.f32.mrf.mxu1 }
 0x5a0   :  { %v1737_v52 = vpop.f32.mrf.mxu0  ;;  %v1808_v15 = vpop.f32.mrf.mxu1 }
 0x5a1   :  { %v1738_v50 = vadd.f32 %v1737_v52, %v1595_v49  ;;  %v1809_v38 = vadd.f32 %v1808_v15, %v1666_v51  ;;  %v1847_v51 = vpop.permute.xlu0 %1846 }
 0x5a2   :  { %v1739_v9 = vpop.f32.mrf.mxu0  ;;  %v1810_v60 = vpop.f32.mrf.mxu1  ;;  %vm1848_vm12 = vcmp.eq.s32.totalorder %v1847_v51, 1  ;;  %v4899_v51 = vld [vmem:[#allocation9 + $0x138] sm:$0xff] }
 0x5a3   :  { %v1813_v10 = vadd.f32 %v1738_v50, %v5983_v14  ;;  %v1740_v0 = vadd.f32 %v1739_v9, %v1597_v35  ;;  %v1811_v61 = vadd.f32 %v1810_v60, %v1668_v54  ;;  %v1815_v49 = vadd.f32 %v1809_v38, %v3908_v63 }
 0x5a5   :  { %v2871_v55 = vmul.f32 -1.442695, %v1813_v10  ;;  %v1814_v1 = vadd.f32 %v1740_v0, %v3901_v43  ;;  %v1816_v62 = vadd.f32 %v1811_v61, %v3905_v36 }
 0x5a7   :  { %2965 = vpow2.f32 %v2871_v55  ;;  %v2872_v53 = vmul.f32 -1.442695, %v1814_v1  ;;  %v2873_v41 = vmul.f32 -1.442695, %v1816_v62 }
 0x5a9   :  { %2967 = vpow2.f32 %v2872_v53 }
 0x5aa   :  { %2969 = vpow2.f32 %v2873_v41  ;;  %v4863_v41 = vld [vmem:[#allocation9 + $0x198] sm:$0xff] }
 0x5b4   :  { %v2966_v45 = vpop.eup %2965 }
 0x5b5   :  { %v1820_v52 = vadd.f32 1.0, %v2966_v45  ;;  %v4866_v45 = vld [vmem:[#allocation9 + $0x180] sm:$0xff] }
 0x5b6   :  { %v2968_v32 = vpop.eup %2967 }
 0x5b7   :  { %2971 = vrcp.f32 %v1820_v52  ;;  %v1826_v35 = vadd.f32 1.0, %v2968_v32  ;;  %v2970_v50 = vpop.eup %2969  ;;  %v4872_v52 = vld [vmem:[#allocation9 + $0x168] sm:$0xff] }
 0x5b8   :  { %2973 = vtanh.f32 %v1815_v49  ;;  %v1833_v55 = vadd.f32 1.0, %v2970_v50  ;;  %v4869_v49 = vld [vmem:[#allocation9 + $0x190] sm:$0xff]  ;;  %v4878_v50 = vld [vmem:[#allocation9 + $0x160] sm:$0xff] }
 0x5b9   :  { %2975 = vrcp.f32 %v1826_v35  ;;  %v4875_v35 = vld [vmem:[#allocation9 + $0x178] sm:$0xff] }
 0x5ba   :  { %2977 = vrcp.f32 %v1833_v55  ;;  %v4890_v55 = vld [vmem:[#allocation9 + $0x140] sm:$0xff] }
 0x5c4   :  { %v2972_v9 = vpop.eup %2971 }
 0x5c5   :  { %v2974_v10 = vpop.eup %2973 }
 0x5c6   :  { %v2976_v0 = vpop.eup %2975  ;;  %v1837_v54 = vmul.f32 %v2974_v10, %v2972_v9  ;;  %v4881_v9 = vld [vmem:[#allocation9 + $0x170] sm:$0xff]  ;;  %v4884_v10 = vld [vmem:[#allocation9 + $0x148] sm:$0xff] }
 0x5c7   :  { %v1836_v1 = vmul.f32 %v2976_v0, %v4608_v46  ;;  %v2978_v60 = vpop.eup %2977  ;;  %v4887_v0 = vld [vmem:[#allocation9 + $0x158] sm:$0xff] }
 0x5c9   :  { %v1838_v15 = vadd.f32 %v1837_v54, %v1836_v1  ;;  %v4893_v54 = vld [vmem:[#allocation9 + $0x150] sm:$0xff]  ;;  %v4896_v1 = vld [vmem:[#allocation9 + $0x128] sm:$0xff] }
 0x5cb   :  { %2979 = vtanh.f32 %v1838_v15  ;;  %v4753_v53 = vsel %vm1848_vm12, %v1838_v15, %v4608_v46  ;;  %v6247_v46 = vld [vmem:[#allocation72_spill] sm:$0xff]  ;;  %v4902_v15 = vld [vmem:[#allocation9 + $0x120] sm:$0xff] }
 0x5d8   :  { %v2980_v32 = vpop.eup %2979 }
 0x5d9   :  { %v1840_v61 = vmul.f32 %v2980_v32, %v2978_v60  ;;  %v4905_v60 = vld [vmem:[#allocation9 + $0x130] sm:$0xff]  ;;  %v4908_v32 = vld [vmem:[#allocation9 + $0x108] sm:$0xff] }
 0x5db   :  { %v1849_v62 = vsel %vm1848_vm12, %v1840_v61, 0.0  ;;  %v4756_v38 = vsel %vm1848_vm12, %v1840_v61, %v4611_v19  ;;  %v6248_v19 = vld [vmem:[#allocation73_spill] sm:$0xff] }
 0x5dc   :  { %1851 = vst [vmem:[#allocation10 + $0x20] sm:$0xff] %v1849_v62  ;;  %1921 = vmatmul.mubr.f32.vlgmr.msra.gmra.mxu0 %v4756_v38  ;;  %1992 = vmatmul.mubr.f32.vlgmr.msra.gmra.mxu1 %v4756_v38  ;;  %v4911_v61 = vld [vmem:[#allocation9 + $0x118] sm:$0xff]  ;;  %v4914_v62 = vld [vmem:[#allocation9 + $0x100] sm:$0xff] }
 0x5dd   :  { %1999 = vmatpush1.msra.mxu0 %v4346_v5  ;;  %2070 = vmatpush1.msra.mxu1 %v4349_v7  ;;  %v6234_v5 = vld [vmem:[#allocation59_spill] sm:$0xff]  ;;  %v6235_v7 = vld [vmem:[#allocation60_spill] sm:$0xff] }
 0x5de   :  { %2000 = vmatprep.subr.mxu0 %v4352_v6  ;;  %2071 = vmatprep.subr.mxu1 %v4355_v8  ;;  %v6236_v6 = vld [vmem:[#allocation61_spill] sm:$0xff]  ;;  %v6237_v8 = vld [vmem:[#allocation62_spill] sm:$0xff] }
 0x5df   :  { %2001 = vmatpush1.msra.mxu0 %v4358_v11  ;;  %2072 = vmatpush1.msra.mxu1 %v4361_v39  ;;  %v6238_v11 = vld [vmem:[#allocation63_spill] sm:$0xff]  ;;  %v6239_v39 = vld [vmem:[#allocation64_spill] sm:$0xff] }
 0x5e0   :  { %2002 = vmatprep.subr.mxu0 %v4364_v33  ;;  %2073 = vmatprep.subr.mxu1 %v4367_v31  ;;  %v6240_v33 = vld [vmem:[#allocation65_spill] sm:$0xff]  ;;  %v6241_v31 = vld [vmem:[#allocation66_spill] sm:$0xff] }
 0x5e1   :  { %2003 = vmatpush1.msra.mxu0 %v4370_v30  ;;  %2074 = vmatpush1.msra.mxu1 %v4373_v29  ;;  %v6242_v30 = vld [vmem:[#allocation67_spill] sm:$0xff]  ;;  %v6243_v29 = vld [vmem:[#allocation68_spill] sm:$0xff] }
 0x5e2   :  { %2004 = vmatprep.subr.mxu0 %v4376_v34  ;;  %2075 = vmatprep.subr.mxu1 %v4379_v2  ;;  %v6244_v34 = vld [vmem:[#allocation69_spill] sm:$0xff]  ;;  %v6245_v2 = vld [vmem:[#allocation70_spill] sm:$0xff] }
 0x5e3   :  { %2005 = vmatpush1.msra.mxu0 %v4382_v28  ;;  %2076 = vmatpush1.msra.mxu1 %v6143_v20  ;;  %v6246_v28 = vld [vmem:[#allocation71_spill] sm:$0xff]  ;;  %v6249_v20 = vld [vmem:[#allocation74_spill] sm:$0xff] }
 0x5e4   :  { %2006 = vmatprep.subr.mxu0 %v6144_v22  ;;  %2077 = vmatprep.subr.mxu1 %v6145_v24  ;;  %v6250_v22 = vld [vmem:[#allocation75_spill] sm:$0xff]  ;;  %v6251_v24 = vld [vmem:[#allocation76_spill] sm:$0xff] }
 0x5e5   :  { %2007 = vmatpush1.msra.mxu0 %v6146_v4  ;;  %2078 = vmatpush1.msra.mxu1 %v6147_v21  ;;  %v6252_v4 = vld [vmem:[#allocation77_spill] sm:$0xff]  ;;  %v6253_v21 = vld [vmem:[#allocation78_spill] sm:$0xff] }
 0x5e6   :  { %2008 = vmatprep.subr.mxu0 %v6148_v26  ;;  %2079 = vmatprep.subr.mxu1 %v6149_v42  ;;  %v6254_v26 = vld [vmem:[#allocation79_spill] sm:$0xff]  ;;  %v6255_v42 = vld [vmem:[#allocation80_spill] sm:$0xff] }
 0x5e7   :  { %2009 = vmatpush1.msra.mxu0 %v6150_v58  ;;  %2080 = vmatpush1.msra.mxu1 %v6151_v40  ;;  %v6256_v58 = vld [vmem:[#allocation82_spill] sm:$0xff]  ;;  %v6257_v40 = vld [vmem:[#allocation87_spill] sm:$0xff] }
 0x5e8   :  { %2010 = vmatprep.subr.mxu0 %v6234_v5  ;;  %2081 = vmatprep.subr.mxu1 %v6235_v7  ;;  %v4917_v5 = vld [vmem:[#allocation9 + $0x110] sm:$0xff]  ;;  %v4920_v7 = vld [vmem:[#allocation9 + $0xe8] sm:$0xff] }
 0x5e9   :  { %2011 = vmatpush1.msra.mxu0 %v6236_v6  ;;  %2082 = vmatpush1.msra.mxu1 %v6237_v8  ;;  %v4923_v6 = vld [vmem:[#allocation9 + $0xf8] sm:$0xff]  ;;  %v4926_v8 = vld [vmem:[#allocation9 + $0xe0] sm:$0xff] }
 0x5ea   :  { %2012 = vmatprep.subr.mxu0 %v6238_v11  ;;  %2083 = vmatprep.subr.mxu1 %v6239_v39  ;;  %v4929_v11 = vld [vmem:[#allocation9 + $0xf0] sm:$0xff]  ;;  %v4932_v39 = vld [vmem:[#allocation9 + $0xc8] sm:$0xff] }
 0x5eb   :  { %2013 = vmatpush1.msra.mxu0 %v6240_v33  ;;  %2084 = vmatpush1.msra.mxu1 %v6241_v31  ;;  %v4935_v33 = vld [vmem:[#allocation9 + $0xd8] sm:$0xff]  ;;  %v4938_v31 = vld [vmem:[#allocation9 + $0xc0] sm:$0xff] }
 0x5ec   :  { %2014 = vmatprep.subr.mxu0 %v6242_v30  ;;  %2085 = vmatprep.subr.mxu1 %v6243_v29  ;;  %6259 = vst [vmem:[#allocation45_spill] sm:$0xff] %v4935_v33  ;;  %6260 = vst [vmem:[#allocation46_spill] sm:$0xff] %v4938_v31  ;;  %v4941_v30 = vld [vmem:[#allocation9 + $0xd0] sm:$0xff]  ;;  %v4944_v29 = vld [vmem:[#allocation9 + $0xa8] sm:$0xff] }
 0x5ed   :  { %2015 = vmatpush1.msra.mxu0 %v6244_v34  ;;  %2086 = vmatpush1.msra.mxu1 %v6245_v2  ;;  %6261 = vst [vmem:[#allocation101_spill] sm:$0xff] %v4941_v30  ;;  %6262 = vst [vmem:[#allocation103_spill] sm:$0xff] %v4944_v29  ;;  %v4947_v34 = vld [vmem:[#allocation9 + $0xb8] sm:$0xff]  ;;  %v4950_v2 = vld [vmem:[#allocation9 + $0xa0] sm:$0xff] }
 0x5ee   :  { %2016 = vmatprep.subr.mxu0 %v6246_v28  ;;  %2087 = vmatprep.subr.mxu1 %v6247_v46  ;;  %6263 = vst [vmem:[#allocation54_spill] sm:$0xff] %v4947_v34  ;;  %6264 = vst [vmem:[#allocation55_spill] sm:$0xff] %v4950_v2  ;;  %v4953_v28 = vld [vmem:[#allocation9 + $0xb0] sm:$0xff]  ;;  %v4956_v46 = vld [vmem:[#allocation9 + $0x88] sm:$0xff] }
 0x5ef   :  { %2017 = vmatpush1.msra.mxu0 %v6248_v19  ;;  %2088 = vmatpush1.msra.mxu1 %v6249_v20  ;;  %6265 = vst [vmem:[#allocation56_spill] sm:$0xff] %v4953_v28  ;;  %6266 = vst [vmem:[#allocation57_spill] sm:$0xff] %v4956_v46  ;;  %v4959_v19 = vld [vmem:[#allocation9 + $0x98] sm:$0xff]  ;;  %v4962_v20 = vld [vmem:[#allocation9 + $0x80] sm:$0xff] }
 0x5f0   :  { %2018 = vmatprep.subr.mxu0 %v6250_v22  ;;  %2089 = vmatprep.subr.mxu1 %v6251_v24  ;;  %6267 = vst [vmem:[#allocation58_spill] sm:$0xff] %v4959_v19  ;;  %6268 = vst [vmem:[#allocation81_spill] sm:$0xff] %v4962_v20  ;;  %v4965_v22 = vld [vmem:[#allocation9 + $0x90] sm:$0xff]  ;;  %v4968_v24 = vld [vmem:[#allocation9 + $0x68] sm:$0xff] }
 0x5f1   :  { %2019 = vmatpush1.msra.mxu0 %v6252_v4  ;;  %2090 = vmatpush1.msra.mxu1 %v6253_v21  ;;  %6269 = vst [vmem:[#allocation83_spill] sm:$0xff] %v4965_v22  ;;  %6270 = vst [vmem:[#allocation84_spill] sm:$0xff] %v4968_v24  ;;  %v4971_v4 = vld [vmem:[#allocation9 + $0x78] sm:$0xff]  ;;  %v4974_v21 = vld [vmem:[#allocation9 + $0x60] sm:$0xff] }
 0x5f2   :  { %2020 = vmatprep.subr.mxu0 %v6254_v26  ;;  %2091 = vmatprep.subr.mxu1 %v6255_v42  ;;  %6271 = vst [vmem:[#allocation85_spill] sm:$0xff] %v4971_v4  ;;  %6272 = vst [vmem:[#allocation89_spill] sm:$0xff] %v4974_v21  ;;  %v4977_v26 = vld [vmem:[#allocation9 + $0x70] sm:$0xff]  ;;  %v4980_v42 = vld [vmem:[#allocation9 + $0x48] sm:$0xff] }
 0x5f3   :  { %2021 = vmatpush1.msra.mxu0 %v6174_v47  ;;  %2092 = vmatpush1.msra.mxu1 %v6256_v58  ;;  %v1855_v47 = vld [vmem:[#allocation4 + $0x28] sm:$0xff]  ;;  %6273 = vst [vmem:[#allocation90_spill] sm:$0xff] %v4977_v26  ;;  %6274 = vst [vmem:[#allocation91_spill] sm:$0xff] %v4980_v42  ;;  %v4983_v58 = vld [vmem:[#allocation9 + $0x58] sm:$0xff] }
 0x5f4   :  { %2022 = vmatprep.subr.mxu0 %v6176_v44  ;;  %2093 = vmatprep.subr.mxu1 %v6177_v59  ;;  %v6258_v44 = vld [vmem:[#allocation105_spill] sm:$0xff]  ;;  %v4842_v59 = vld [vmem:[#allocation9 + $0x1c0] sm:$0xff]  ;;  %6275 = vst [vmem:[#allocation95_spill] sm:$0xff] %v4983_v58 }
 0x5f5   :  { %2023 = vmatpush1.msra.mxu0 %v6178_v16  ;;  %2094 = vmatpush1.msra.mxu1 %v6257_v40  ;;  %v4845_v16 = vld [vmem:[#allocation9 + $0x1d0] sm:$0xff]  ;;  %v4986_v40 = vld [vmem:[#allocation9 + $0x40] sm:$0xff] }
 0x5f6   :  { %2024 = vmatprep.subr.mxu0 %v6180_v17  ;;  %2095 = vmatprep.subr.mxu1 %v6181_v12  ;;  %v4848_v17 = vld [vmem:[#allocation9 + $0x1a8] sm:$0xff]  ;;  %v4851_v12 = vld [vmem:[#allocation9 + $0x1b8] sm:$0xff]  ;;  %6276 = vst [vmem:[#allocation96_spill] sm:$0xff] %v4986_v40 }
 0x5f7   :  { %2025 = vmatpush1.msra.mxu0 %v6182_v57  ;;  %2096 = vmatpush1.msra.mxu1 %v6183_v13  ;;  %v4854_v57 = vld [vmem:[#allocation9 + $0x1a0] sm:$0xff]  ;;  %v4857_v13 = vld [vmem:[#allocation9 + $0x1b0] sm:$0xff] }
 0x5f8   :  { %2026 = vmatprep.subr.mxu0 %v6184_v18  ;;  %2097 = vmatprep.subr.mxu1 %v4511_v3  ;;  %v4824_v3 = vld [vmem:[#allocation9 + $0x1e8] sm:$0xff] }
 0x5f9   :  { %2027 = vmatpush1.msra.mxu0 %v6185_v37  ;;  %2098 = vmatpush1.msra.mxu1 %v4517_v48  ;;  %v4827_v48 = vld [vmem:[#allocation9 + $0x1f8] sm:$0xff]  ;;  %v4860_v18 = vld [vmem:[#allocation9 + $0x188] sm:$0xff] }
 0x5fa   :  { %2028 = vmatprep.subr.mxu0 %v4520_v25  ;;  %2099 = vmatprep.subr.mxu1 %v4523_v23  ;;  %v4830_v25 = vld [vmem:[#allocation9 + $0x1e0] sm:$0xff]  ;;  %v4836_v23 = vld [vmem:[#allocation9 + $0x1c8] sm:$0xff]  ;;  %v4839_v37 = vld [vmem:[#allocation9 + $0x1d8] sm:$0xff] }
 0x5fb   :  { %2029 = vmatpush1.msra.mxu0 %v4526_v27  ;;  %2062 = vmatprep.mubr.f32.mxu0 %v5821_v56  ;;  %v4833_v27 = vld [vmem:[#allocation9 + $0x1f0] sm:$0xff] }
 0x5fc   :  { %2100 = vmatpush1.msra.mxu1 %v6258_v44  ;;  %2133 = vmatprep.mubr.f32.mxu1 %v5821_v56  ;;  %v4992_v44 = vld [vmem:[#allocation9 + $0x28] sm:$0xff] }
 0x5fd   :  { %2063 = vmatmul.mubr.f32.vlgmr.msra.gmra.mxu0 %v1855_v47  ;;  %2134 = vmatmul.mubr.f32.vlgmr.msra.gmra.mxu1 %v1855_v47  ;;  %v4989_v47 = vld [vmem:[#allocation9 + $0x50] sm:$0xff]  ;;  %6278 = vst [vmem:[#allocation47_spill] sm:$0xff] %v4992_v44 }
 0x5fe   :  { %2183 = vmatprep.subr.mxu0 %v4824_v3  ;;  %2254 = vmatprep.subr.mxu1 %v4827_v48  ;;  %6277 = vst [vmem:[#allocation104_spill] sm:$0xff] %v4989_v47 }
 0x5ff   :  { %2184 = vmatpush1.msra.mxu0 %v4830_v25  ;;  %2255 = vmatpush1.msra.mxu1 %v4833_v27 }
 0x600   :  { %2185 = vmatprep.subr.mxu0 %v4836_v23  ;;  %2256 = vmatprep.subr.mxu1 %v4839_v37 }
 0x601   :  { %2186 = vmatpush1.msra.mxu0 %v4842_v59  ;;  %2257 = vmatpush1.msra.mxu1 %v4845_v16 }
 0x602   :  { %2187 = vmatprep.subr.mxu0 %v4848_v17  ;;  %2258 = vmatprep.subr.mxu1 %v4851_v12 }
 0x603   :  { %2188 = vmatpush1.msra.mxu0 %v4854_v57  ;;  %2259 = vmatpush1.msra.mxu1 %v4857_v13 }
 0x604   :  { %2189 = vmatprep.subr.mxu0 %v4860_v18  ;;  %2260 = vmatprep.subr.mxu1 %v4863_v41 }
 0x605   :  { %2190 = vmatpush1.msra.mxu0 %v4866_v45  ;;  %2261 = vmatpush1.msra.mxu1 %v4869_v49 }
 0x606   :  { %2191 = vmatprep.subr.mxu0 %v4872_v52  ;;  %2262 = vmatprep.subr.mxu1 %v4875_v35 }
 0x607   :  { %2192 = vmatpush1.msra.mxu0 %v4878_v50  ;;  %2263 = vmatpush1.msra.mxu1 %v4881_v9 }
 0x608   :  { %2193 = vmatprep.subr.mxu0 %v4884_v10  ;;  %2264 = vmatprep.subr.mxu1 %v4887_v0 }
 0x609   :  { %2194 = vmatpush1.msra.mxu0 %v4890_v55  ;;  %2265 = vmatpush1.msra.mxu1 %v4893_v54 }
 0x60a   :  { %2195 = vmatprep.subr.mxu0 %v4896_v1  ;;  %2266 = vmatprep.subr.mxu1 %v4899_v51 }
 0x60b   :  { %2196 = vmatpush1.msra.mxu0 %v4902_v15  ;;  %2267 = vmatpush1.msra.mxu1 %v4905_v60 }
 0x60c   :  { %2197 = vmatprep.subr.mxu0 %v4908_v32  ;;  %2268 = vmatprep.subr.mxu1 %v4911_v61 }
 0x60d   :  { %2198 = vmatpush1.msra.mxu0 %v4914_v62  ;;  %2269 = vmatpush1.msra.mxu1 %v4917_v5 }
 0x60e   :  { %2199 = vmatprep.subr.mxu0 %v4920_v7  ;;  %2270 = vmatprep.subr.mxu1 %v4923_v6 }
 0x60f   :  { %2200 = vmatpush1.msra.mxu0 %v4926_v8  ;;  %2271 = vmatpush1.msra.mxu1 %v4929_v11 }
 0x610   :  { %2201 = vmatprep.subr.mxu0 %v4932_v39  ;;  %2272 = vmatprep.subr.mxu1 %v4935_v33 }
 0x611   :  { %2202 = vmatpush1.msra.mxu0 %v4938_v31  ;;  %2273 = vmatpush1.msra.mxu1 %v4941_v30 }
 0x612   :  { %2203 = vmatprep.subr.mxu0 %v4944_v29  ;;  %2274 = vmatprep.subr.mxu1 %v4947_v34 }
 0x613   :  { %2204 = vmatpush1.msra.mxu0 %v4950_v2  ;;  %2275 = vmatpush1.msra.mxu1 %v4953_v28 }
 0x614   :  { %2205 = vmatprep.subr.mxu0 %v4956_v46  ;;  %2276 = vmatprep.subr.mxu1 %v4959_v19 }
 0x615   :  { %2206 = vmatpush1.msra.mxu0 %v4962_v20  ;;  %2277 = vmatpush1.msra.mxu1 %v4965_v22 }
 0x616   :  { %2207 = vmatprep.subr.mxu0 %v4968_v24  ;;  %2278 = vmatprep.subr.mxu1 %v4971_v4 }
 0x617   :  { %2208 = vmatpush1.msra.mxu0 %v4974_v21  ;;  %2279 = vmatpush1.msra.mxu1 %v4977_v26  ;;  %v4995_v26 = vld [vmem:[#allocation9 + $0x38] sm:$0xff] }
 0x618   :  { %2209 = vmatprep.subr.mxu0 %v4980_v42  ;;  %2280 = vmatprep.subr.mxu1 %v4983_v58  ;;  %6279 = vst [vmem:[#allocation48_spill] sm:$0xff] %v4995_v26  ;;  %v4998_v42 = vld [vmem:[#allocation9 + $0x20] sm:$0xff]  ;;  %v5001_v58 = vld [vmem:[#allocation9 + $0x30] sm:$0xff] }
 0x619   :  { %2210 = vmatpush1.msra.mxu0 %v4986_v40  ;;  %2281 = vmatpush1.msra.mxu1 %v4989_v47  ;;  %6280 = vst [vmem:[#allocation49_spill] sm:$0xff] %v4998_v42  ;;  %6281 = vst [vmem:[#allocation50_spill] sm:$0xff] %v5001_v58  ;;  %v5004_v40 = vld [vmem:[#allocation9 + $0x8] sm:$0xff]  ;;  %v5007_v47 = vld [vmem:[#allocation9 + $0x18] sm:$0xff] }
 0x61a   :  { %2211 = vmatprep.subr.mxu0 %v4992_v44  ;;  %2282 = vmatprep.subr.mxu1 %v4995_v26  ;;  %6282 = vst [vmem:[#allocation51_spill] sm:$0xff] %v5004_v40  ;;  %6283 = vst [vmem:[#allocation52_spill] sm:$0xff] %v5007_v47  ;;  %v5010_v44 = vld [vmem:[#allocation9] sm:$0xff]  ;;  %v5013_v26 = vld [vmem:[#allocation9 + $0x10] sm:$0xff] }
 0x61b   :  { %2212 = vmatpush1.msra.mxu0 %v4998_v42  ;;  %2283 = vmatpush1.msra.mxu1 %v5001_v58  ;;  %6284 = vst [vmem:[#allocation53_spill] sm:$0xff] %v5010_v44  ;;  %6285 = vst [vmem:[#allocation86_spill] sm:$0xff] %v5013_v26  ;;  %v5018_v58 = vld [vmem:[#allocation7 + $0x1e8] sm:$0xff] }
 0x61c   :  { %2213 = vmatprep.subr.mxu0 %v5004_v40  ;;  %2284 = vmatprep.subr.mxu1 %v5007_v47  ;;  %6286 = vst [vmem:[#allocation88_spill] sm:$0xff] %v5018_v58  ;;  %v5021_v40 = vld [vmem:[#allocation7 + $0x1f8] sm:$0xff] }
 0x61d   :  { %2214 = vmatpush1.msra.mxu0 %v5010_v44  ;;  %2285 = vmatpush1.msra.mxu1 %v5013_v26  ;;  %6287 = vst [vmem:[#allocation92_spill] sm:$0xff] %v5021_v40 }
 0x61e   :  { %2247 = vmatprep.mubr.f32.mxu0 %v5821_v56  ;;  %2318 = vmatprep.mubr.f32.mxu1 %v5821_v56 }
 0x61f   :  { %2325 = vmatprep.subr.mxu0 %v5018_v58  ;;  %2396 = vmatprep.subr.mxu1 %v5021_v40 }
 0x69c   :  { %v1922_v47 = vpop.f32.mrf.mxu0  ;;  %v1993_v42 = vpop.f32.mrf.mxu1 }
 0x69e   :  { %v1924_v21 = vpop.f32.mrf.mxu0  ;;  %v1995_v4 = vpop.f32.mrf.mxu1 }
 0x6bd   :  { %v2064_v44 = vpop.f32.mrf.mxu0  ;;  %v2135_v20 = vpop.f32.mrf.mxu1 }
 0x6be   :  { %v2065_v24 = vadd.f32 %v2064_v44, %v1922_v47  ;;  %v2136_v29 = vadd.f32 %v2135_v20, %v1993_v42  ;;  %v2174_v20 = vpop.permute.xlu1 %2173 }
 0x6bf   :  { %v2066_v22 = vpop.f32.mrf.mxu0  ;;  %v2137_v2 = vpop.f32.mrf.mxu1  ;;  %vm2175_vm13 = vcmp.eq.s32.totalorder %v2174_v20, 1  ;;  %v5079_v20 = vld [vmem:[#allocation7 + $0x168] sm:$0xff] }
 0x6c0   :  { %v2140_v26 = vadd.f32 %v2065_v24, %v5983_v14  ;;  %v2067_v19 = vadd.f32 %v2066_v22, %v1924_v21  ;;  %v2138_v34 = vadd.f32 %v2137_v2, %v1995_v4  ;;  %v2142_v47 = vadd.f32 %v2136_v29, %v3908_v63  ;;  %6289 = vst [vmem:[#allocation94_spill] sm:$0xff] %v5079_v20 }
 0x6c2   :  { %v2875_v46 = vmul.f32 -1.442695, %v2140_v26  ;;  %v2141_v28 = vadd.f32 %v2067_v19, %v3901_v43  ;;  %v2143_v40 = vadd.f32 %v2138_v34, %v3905_v36 }
 0x6c4   :  { %2981 = vpow2.f32 %v2875_v46  ;;  %v2876_v58 = vmul.f32 -1.442695, %v2141_v28  ;;  %v2877_v30 = vmul.f32 -1.442695, %v2143_v40  ;;  %v5040_v40 = vld [vmem:[#allocation7 + $0x1f0] sm:$0xff] }
 0x6c6   :  { %2983 = vpow2.f32 %v2876_v58  ;;  %v5037_v58 = vld [vmem:[#allocation7 + $0x1e0] sm:$0xff] }
 0x6c7   :  { %2985 = vpow2.f32 %v2877_v30 }
 0x6d1   :  { %v2982_v31 = vpop.eup %2981 }
 0x6d2   :  { %v2147_v44 = vadd.f32 1.0, %v2982_v31 }
 0x6d3   :  { %v2984_v33 = vpop.eup %2983 }
 0x6d4   :  { %2987 = vrcp.f32 %v2147_v44  ;;  %v2153_v22 = vadd.f32 1.0, %v2984_v33  ;;  %v2986_v19 = vpop.eup %2985  ;;  %v5052_v44 = vld [vmem:[#allocation7 + $0x1d0] sm:$0xff] }
 0x6d5   :  { %2989 = vtanh.f32 %v2142_v47  ;;  %v2160_v21 = vadd.f32 1.0, %v2986_v19  ;;  %v5046_v47 = vld [vmem:[#allocation7 + $0x1d8] sm:$0xff] }
 0x6d6   :  { %2991 = vrcp.f32 %v2153_v22  ;;  %v5055_v22 = vld [vmem:[#allocation7 + $0x1a8] sm:$0xff]  ;;  %v5058_v19 = vld [vmem:[#allocation7 + $0x1b8] sm:$0xff] }
 0x6d7   :  { %2993 = vrcp.f32 %v2160_v21  ;;  %v5070_v21 = vld [vmem:[#allocation7 + $0x198] sm:$0xff] }
 0x6e1   :  { %v2988_v46 = vpop.eup %2987 }
 0x6e2   :  { %v2990_v28 = vpop.eup %2989 }
 0x6e3   :  { %v2992_v24 = vpop.eup %2991  ;;  %v2164_v2 = vmul.f32 %v2990_v28, %v2988_v46  ;;  %v5061_v46 = vld [vmem:[#allocation7 + $0x1a0] sm:$0xff]  ;;  %v5064_v28 = vld [vmem:[#allocation7 + $0x1b0] sm:$0xff] }
 0x6e4   :  { %v2163_v34 = vmul.f32 %v2992_v24, %v4753_v53  ;;  %v2994_v30 = vpop.eup %2993  ;;  %v5067_v24 = vld [vmem:[#allocation7 + $0x188] sm:$0xff] }
 0x6e6   :  { %v2165_v4 = vadd.f32 %v2164_v2, %v2163_v34  ;;  %v5073_v2 = vld [vmem:[#allocation7 + $0x180] sm:$0xff]  ;;  %v5076_v34 = vld [vmem:[#allocation7 + $0x190] sm:$0xff] }
 0x6e7   :  { %6288 = vst [vmem:[#allocation93_spill] sm:$0xff] %v5076_v34 }
 0x6e8   :  { %2995 = vtanh.f32 %v2165_v4  ;;  %v5030_v31 = vsel %vm2175_vm13, %v2165_v4, %v4753_v53  ;;  %v5043_v53 = vld [vmem:[#allocation7 + $0x1c8] sm:$0xff]  ;;  %v5082_v4 = vld [vmem:[#allocation7 + $0x178] sm:$0xff] }
 0x6e9   :  { %6290 = vst [vmem:[#allocation97_spill] sm:$0xff] %v5082_v4 }
 0x6f5   :  { %v2996_v33 = vpop.eup %2995 }
 0x6f6   :  { %v2167_v29 = vmul.f32 %v2996_v33, %v2994_v30  ;;  %v5085_v30 = vld [vmem:[#allocation7 + $0x160] sm:$0xff]  ;;  %v5088_v33 = vld [vmem:[#allocation7 + $0x170] sm:$0xff] }
 0x6f7   :  { %6291 = vst [vmem:[#allocation98_spill] sm:$0xff] %v5085_v30  ;;  %6292 = vst [vmem:[#allocation99_spill] sm:$0xff] %v5088_v33 }
 0x6f8   :  { %v2176_v26 = vsel %vm2175_vm13, %v2167_v29, 0.0  ;;  %v5033_v42 = vsel %vm2175_vm13, %v2167_v29, %v4756_v38  ;;  %v5049_v38 = vld [vmem:[#allocation7 + $0x1c0] sm:$0xff]  ;;  %v5091_v29 = vld [vmem:[#allocation7 + $0x148] sm:$0xff] }
 0x6f9   :  { %2178 = vst [vmem:[#allocation10 + $0x28] sm:$0xff] %v2176_v26  ;;  %2248 = vmatmul.mubr.f32.vlgmr.msra.gmra.mxu0 %v5033_v42  ;;  %2319 = vmatmul.mubr.f32.vlgmr.msra.gmra.mxu1 %v5033_v42  ;;  %6293 = vst [vmem:[#allocation100_spill] sm:$0xff] %v5091_v29  ;;  %v5094_v26 = vld [vmem:[#allocation7 + $0x158] sm:$0xff] }
 0x6fa   :  { %2326 = vmatpush1.msra.mxu0 %v5037_v58  ;;  %2397 = vmatpush1.msra.mxu1 %v5040_v40  ;;  %6294 = vst [vmem:[#allocation102_spill] sm:$0xff] %v5094_v26 }
 0x6fb   :  { %2327 = vmatprep.subr.mxu0 %v5043_v53  ;;  %2398 = vmatprep.subr.mxu1 %v5046_v47 }
 0x6fc   :  { %2328 = vmatpush1.msra.mxu0 %v5049_v38  ;;  %2399 = vmatpush1.msra.mxu1 %v5052_v44 }
 0x6fd   :  { %2329 = vmatprep.subr.mxu0 %v5055_v22  ;;  %2400 = vmatprep.subr.mxu1 %v5058_v19 }
 0x6fe   :  { %2330 = vmatpush1.msra.mxu0 %v5061_v46  ;;  %2401 = vmatpush1.msra.mxu1 %v5064_v28 }
 0x6ff   :  { %2331 = vmatprep.subr.mxu0 %v5067_v24  ;;  %2402 = vmatprep.subr.mxu1 %v5070_v21 }
 0x700   :  { %2332 = vmatpush1.msra.mxu0 %v5073_v2  ;;  %2403 = vmatpush1.msra.mxu1 %v5076_v34  ;;  %v5217_v34 = vld [vmem:[#allocation7] sm:$0xff] }
 0x701   :  { %2333 = vmatprep.subr.mxu0 %v5079_v20  ;;  %2404 = vmatprep.subr.mxu1 %v5082_v4  ;;  %v5097_v20 = vld [vmem:[#allocation7 + $0x140] sm:$0xff]  ;;  %v5100_v4 = vld [vmem:[#allocation7 + $0x150] sm:$0xff] }
 0x702   :  { %2334 = vmatpush1.msra.mxu0 %v5085_v30  ;;  %2405 = vmatpush1.msra.mxu1 %v5088_v33  ;;  %6295 = vst [vmem:[#allocation14_spill] sm:$0xff] %v5097_v20  ;;  %6296 = vst [vmem:[#allocation15_spill] sm:$0xff] %v5100_v4  ;;  %v5103_v30 = vld [vmem:[#allocation7 + $0x128] sm:$0xff]  ;;  %v5106_v33 = vld [vmem:[#allocation7 + $0x138] sm:$0xff] }
 0x703   :  { %2335 = vmatprep.subr.mxu0 %v5091_v29  ;;  %2406 = vmatprep.subr.mxu1 %v5094_v26  ;;  %6297 = vst [vmem:[#allocation16_spill] sm:$0xff] %v5103_v30  ;;  %6298 = vst [vmem:[#allocation17_spill] sm:$0xff] %v5106_v33  ;;  %v5109_v29 = vld [vmem:[#allocation7 + $0x120] sm:$0xff]  ;;  %v5112_v26 = vld [vmem:[#allocation7 + $0x130] sm:$0xff] }
 0x704   :  { %2336 = vmatpush1.msra.mxu0 %v5097_v20  ;;  %2407 = vmatpush1.msra.mxu1 %v5100_v4  ;;  %6299 = vst [vmem:[#allocation18_spill] sm:$0xff] %v5109_v29  ;;  %6300 = vst [vmem:[#allocation19_spill] sm:$0xff] %v5112_v26  ;;  %v5115_v20 = vld [vmem:[#allocation7 + $0x108] sm:$0xff]  ;;  %v5118_v4 = vld [vmem:[#allocation7 + $0x118] sm:$0xff] }
 0x705   :  { %2337 = vmatprep.subr.mxu0 %v5103_v30  ;;  %2408 = vmatprep.subr.mxu1 %v5106_v33  ;;  %6301 = vst [vmem:[#allocation20_spill] sm:$0xff] %v5115_v20  ;;  %6302 = vst [vmem:[#allocation21_spill] sm:$0xff] %v5118_v4  ;;  %v5121_v30 = vld [vmem:[#allocation7 + $0x100] sm:$0xff]  ;;  %v5124_v33 = vld [vmem:[#allocation7 + $0x110] sm:$0xff] }
 0x706   :  { %2338 = vmatpush1.msra.mxu0 %v5109_v29  ;;  %2409 = vmatpush1.msra.mxu1 %v5112_v26  ;;  %6303 = vst [vmem:[#allocation22_spill] sm:$0xff] %v5121_v30  ;;  %6304 = vst [vmem:[#allocation23_spill] sm:$0xff] %v5124_v33  ;;  %v5127_v29 = vld [vmem:[#allocation7 + $0xe8] sm:$0xff]  ;;  %v5130_v26 = vld [vmem:[#allocation7 + $0xf8] sm:$0xff] }
 0x707   :  { %2339 = vmatprep.subr.mxu0 %v5115_v20  ;;  %2410 = vmatprep.subr.mxu1 %v5118_v4  ;;  %6305 = vst [vmem:[#allocation24_spill] sm:$0xff] %v5127_v29  ;;  %6306 = vst [vmem:[#allocation25_spill] sm:$0xff] %v5130_v26  ;;  %v5133_v20 = vld [vmem:[#allocation7 + $0xe0] sm:$0xff]  ;;  %v5136_v4 = vld [vmem:[#allocation7 + $0xf0] sm:$0xff] }
 0x708   :  { %2340 = vmatpush1.msra.mxu0 %v5121_v30  ;;  %2411 = vmatpush1.msra.mxu1 %v5124_v33  ;;  %6307 = vst [vmem:[#allocation26_spill] sm:$0xff] %v5133_v20  ;;  %6308 = vst [vmem:[#allocation27_spill] sm:$0xff] %v5136_v4  ;;  %v5139_v30 = vld [vmem:[#allocation7 + $0xc8] sm:$0xff]  ;;  %v5142_v33 = vld [vmem:[#allocation7 + $0xd8] sm:$0xff] }
 0x709   :  { %2341 = vmatprep.subr.mxu0 %v5127_v29  ;;  %2412 = vmatprep.subr.mxu1 %v5130_v26  ;;  %6309 = vst [vmem:[#allocation28_spill] sm:$0xff] %v5139_v30  ;;  %6310 = vst [vmem:[#allocation29_spill] sm:$0xff] %v5142_v33  ;;  %v5145_v29 = vld [vmem:[#allocation7 + $0xc0] sm:$0xff]  ;;  %v5148_v26 = vld [vmem:[#allocation7 + $0xd0] sm:$0xff] }
 0x70a   :  { %2342 = vmatpush1.msra.mxu0 %v5133_v20  ;;  %2413 = vmatpush1.msra.mxu1 %v5136_v4  ;;  %6311 = vst [vmem:[#allocation30_spill] sm:$0xff] %v5145_v29  ;;  %6312 = vst [vmem:[#allocation31_spill] sm:$0xff] %v5148_v26  ;;  %v5151_v20 = vld [vmem:[#allocation7 + $0xa8] sm:$0xff]  ;;  %v5154_v4 = vld [vmem:[#allocation7 + $0xb8] sm:$0xff] }
 0x70b   :  { %2343 = vmatprep.subr.mxu0 %v5139_v30  ;;  %2414 = vmatprep.subr.mxu1 %v5142_v33  ;;  %6313 = vst [vmem:[#allocation32_spill] sm:$0xff] %v5151_v20  ;;  %6314 = vst [vmem:[#allocation33_spill] sm:$0xff] %v5154_v4  ;;  %v5157_v30 = vld [vmem:[#allocation7 + $0xa0] sm:$0xff]  ;;  %v5160_v33 = vld [vmem:[#allocation7 + $0xb0] sm:$0xff] }
 0x70c   :  { %2344 = vmatpush1.msra.mxu0 %v5145_v29  ;;  %2415 = vmatpush1.msra.mxu1 %v5148_v26  ;;  %6315 = vst [vmem:[#allocation34_spill] sm:$0xff] %v5157_v30  ;;  %6316 = vst [vmem:[#allocation35_spill] sm:$0xff] %v5160_v33  ;;  %v5163_v29 = vld [vmem:[#allocation7 + $0x88] sm:$0xff]  ;;  %v5166_v26 = vld [vmem:[#allocation7 + $0x98] sm:$0xff] }
 0x70d   :  { %2345 = vmatprep.subr.mxu0 %v5151_v20  ;;  %2416 = vmatprep.subr.mxu1 %v5154_v4  ;;  %6317 = vst [vmem:[#allocation36_spill] sm:$0xff] %v5163_v29  ;;  %6318 = vst [vmem:[#allocation37_spill] sm:$0xff] %v5166_v26  ;;  %v5169_v20 = vld [vmem:[#allocation7 + $0x80] sm:$0xff]  ;;  %v5172_v4 = vld [vmem:[#allocation7 + $0x90] sm:$0xff] }
 0x70e   :  { %2346 = vmatpush1.msra.mxu0 %v5157_v30  ;;  %2417 = vmatpush1.msra.mxu1 %v5160_v33  ;;  %6319 = vst [vmem:[#allocation38_spill] sm:$0xff] %v5169_v20  ;;  %6320 = vst [vmem:[#allocation39_spill] sm:$0xff] %v5172_v4  ;;  %v5175_v30 = vld [vmem:[#allocation7 + $0x68] sm:$0xff]  ;;  %v5178_v33 = vld [vmem:[#allocation7 + $0x78] sm:$0xff] }
 0x70f   :  { %2347 = vmatprep.subr.mxu0 %v5163_v29  ;;  %2418 = vmatprep.subr.mxu1 %v5166_v26  ;;  %6321 = vst [vmem:[#allocation40_spill] sm:$0xff] %v5175_v30  ;;  %6322 = vst [vmem:[#allocation41_spill] sm:$0xff] %v5178_v33  ;;  %v5181_v29 = vld [vmem:[#allocation7 + $0x60] sm:$0xff]  ;;  %v5184_v26 = vld [vmem:[#allocation7 + $0x70] sm:$0xff] }
 0x710   :  { %2348 = vmatpush1.msra.mxu0 %v5169_v20  ;;  %2419 = vmatpush1.msra.mxu1 %v5172_v4  ;;  %6323 = vst [vmem:[#allocation42_spill] sm:$0xff] %v5181_v29  ;;  %6324 = vst [vmem:[#allocation43_spill] sm:$0xff] %v5184_v26  ;;  %v5187_v20 = vld [vmem:[#allocation7 + $0x48] sm:$0xff]  ;;  %v5190_v4 = vld [vmem:[#allocation7 + $0x58] sm:$0xff] }
 0x711   :  { %2349 = vmatprep.subr.mxu0 %v5175_v30  ;;  %2420 = vmatprep.subr.mxu1 %v5178_v33  ;;  %6325 = vst [vmem:[#allocation44_spill] sm:$0xff] %v5187_v20  ;;  %6326 = vst [vmem:[#allocation59_spill] sm:$0xff] %v5190_v4  ;;  %v5193_v30 = vld [vmem:[#allocation7 + $0x40] sm:$0xff]  ;;  %v5196_v33 = vld [vmem:[#allocation7 + $0x50] sm:$0xff] }
 0x712   :  { %2350 = vmatpush1.msra.mxu0 %v5181_v29  ;;  %2421 = vmatpush1.msra.mxu1 %v5184_v26  ;;  %6327 = vst [vmem:[#allocation60_spill] sm:$0xff] %v5193_v30  ;;  %6328 = vst [vmem:[#allocation61_spill] sm:$0xff] %v5196_v33  ;;  %v5199_v29 = vld [vmem:[#allocation7 + $0x28] sm:$0xff]  ;;  %v5202_v26 = vld [vmem:[#allocation7 + $0x38] sm:$0xff] }
 0x713   :  { %2351 = vmatprep.subr.mxu0 %v5187_v20  ;;  %2422 = vmatprep.subr.mxu1 %v5190_v4  ;;  %6329 = vst [vmem:[#allocation62_spill] sm:$0xff] %v5199_v29  ;;  %v5205_v20 = vld [vmem:[#allocation7 + $0x20] sm:$0xff]  ;;  %v5208_v4 = vld [vmem:[#allocation7 + $0x30] sm:$0xff] }
 0x714   :  { %2352 = vmatpush1.msra.mxu0 %v5193_v30  ;;  %2423 = vmatpush1.msra.mxu1 %v5196_v33  ;;  %6330 = vst [vmem:[#allocation63_spill] sm:$0xff] %v5205_v20  ;;  %v5211_v30 = vld [vmem:[#allocation7 + $0x8] sm:$0xff]  ;;  %v5214_v33 = vld [vmem:[#allocation7 + $0x18] sm:$0xff] }
 0x715   :  { %2353 = vmatprep.subr.mxu0 %v5199_v29  ;;  %2424 = vmatprep.subr.mxu1 %v5202_v26  ;;  %v2182_v29 = vld [vmem:[#allocation4 + $0x30] sm:$0xff] }
 0x716   :  { %2354 = vmatpush1.msra.mxu0 %v5205_v20  ;;  %2425 = vmatpush1.msra.mxu1 %v5208_v4  ;;  %v5221_v20 = vld [vmem:[#allocation7 + $0x10] sm:$0xff] }
 0x717   :  { %2355 = vmatprep.subr.mxu0 %v5211_v30  ;;  %2426 = vmatprep.subr.mxu1 %v5214_v33 }
 0x718   :  { %2356 = vmatpush1.msra.mxu0 %v5217_v34  ;;  %2389 = vmatprep.mubr.f32.mxu0 %v5821_v56 }
 0x719   :  { %2427 = vmatpush1.msra.mxu1 %v5221_v20  ;;  %2460 = vmatprep.mubr.f32.mxu1 %v5821_v56 }
 0x71a   :  { %2390 = vmatmul.mubr.f32.vlgmr.msra.gmra.mxu0 %v2182_v29  ;;  %2461 = vmatmul.mubr.f32.vlgmr.msra.gmra.mxu1 %v2182_v29 }
 0x71b   :  { %2510 = vmatprep.subr.mxu0 %v4824_v3  ;;  %2581 = vmatprep.subr.mxu1 %v4827_v48  ;;  %v6331_v3 = vld [vmem:[#allocation45_spill] sm:$0xff]  ;;  %v6332_v48 = vld [vmem:[#allocation46_spill] sm:$0xff] }
 0x71c   :  { %2511 = vmatpush1.msra.mxu0 %v4830_v25  ;;  %2582 = vmatpush1.msra.mxu1 %v4833_v27  ;;  %v6333_v25 = vld [vmem:[#allocation101_spill] sm:$0xff]  ;;  %v6334_v27 = vld [vmem:[#allocation103_spill] sm:$0xff] }
 0x71d   :  { %2512 = vmatprep.subr.mxu0 %v4836_v23  ;;  %2583 = vmatprep.subr.mxu1 %v4839_v37  ;;  %v6335_v23 = vld [vmem:[#allocation54_spill] sm:$0xff]  ;;  %v6336_v37 = vld [vmem:[#allocation55_spill] sm:$0xff] }
 0x71e   :  { %2513 = vmatpush1.msra.mxu0 %v4842_v59  ;;  %2584 = vmatpush1.msra.mxu1 %v4845_v16  ;;  %v6337_v59 = vld [vmem:[#allocation56_spill] sm:$0xff]  ;;  %v6338_v16 = vld [vmem:[#allocation57_spill] sm:$0xff] }
 0x71f   :  { %2514 = vmatprep.subr.mxu0 %v4848_v17  ;;  %2585 = vmatprep.subr.mxu1 %v4851_v12  ;;  %v6339_v17 = vld [vmem:[#allocation58_spill] sm:$0xff]  ;;  %v6340_v12 = vld [vmem:[#allocation81_spill] sm:$0xff] }
 0x720   :  { %2515 = vmatpush1.msra.mxu0 %v4854_v57  ;;  %2586 = vmatpush1.msra.mxu1 %v4857_v13  ;;  %v6341_v57 = vld [vmem:[#allocation83_spill] sm:$0xff]  ;;  %v6342_v13 = vld [vmem:[#allocation84_spill] sm:$0xff] }
 0x721   :  { %2516 = vmatprep.subr.mxu0 %v4860_v18  ;;  %2587 = vmatprep.subr.mxu1 %v4863_v41  ;;  %v6343_v18 = vld [vmem:[#allocation85_spill] sm:$0xff] }
 0x722   :  { %2517 = vmatpush1.msra.mxu0 %v4866_v45  ;;  %2588 = vmatpush1.msra.mxu1 %v4869_v49  ;;  %v6344_v41 = vld [vmem:[#allocation89_spill] sm:$0xff]  ;;  %v6345_v45 = vld [vmem:[#allocation90_spill] sm:$0xff]  ;;  %v6346_v49 = vld [vmem:[#allocation91_spill] sm:$0xff] }
 0x723   :  { %2518 = vmatprep.subr.mxu0 %v4872_v52  ;;  %2589 = vmatprep.subr.mxu1 %v4875_v35  ;;  %v6347_v52 = vld [vmem:[#allocation95_spill] sm:$0xff]  ;;  %v6348_v35 = vld [vmem:[#allocation96_spill] sm:$0xff] }
 0x724   :  { %2519 = vmatpush1.msra.mxu0 %v4878_v50  ;;  %2590 = vmatpush1.msra.mxu1 %v4881_v9  ;;  %v6349_v50 = vld [vmem:[#allocation104_spill] sm:$0xff]  ;;  %v6350_v9 = vld [vmem:[#allocation47_spill] sm:$0xff] }
 0x725   :  { %2520 = vmatprep.subr.mxu0 %v4884_v10  ;;  %2591 = vmatprep.subr.mxu1 %v4887_v0  ;;  %v6351_v10 = vld [vmem:[#allocation48_spill] sm:$0xff]  ;;  %v6352_v0 = vld [vmem:[#allocation49_spill] sm:$0xff] }
 0x726   :  { %2521 = vmatpush1.msra.mxu0 %v4890_v55  ;;  %2592 = vmatpush1.msra.mxu1 %v4893_v54  ;;  %v6353_v55 = vld [vmem:[#allocation50_spill] sm:$0xff]  ;;  %v6354_v54 = vld [vmem:[#allocation51_spill] sm:$0xff] }
 0x727   :  { %2522 = vmatprep.subr.mxu0 %v4896_v1  ;;  %2593 = vmatprep.subr.mxu1 %v4899_v51  ;;  %v6355_v1 = vld [vmem:[#allocation52_spill] sm:$0xff]  ;;  %v6356_v51 = vld [vmem:[#allocation53_spill] sm:$0xff] }
 0x728   :  { %2523 = vmatpush1.msra.mxu0 %v4902_v15  ;;  %2594 = vmatpush1.msra.mxu1 %v4905_v60  ;;  %v6357_v15 = vld [vmem:[#allocation86_spill] sm:$0xff]  ;;  %v6358_v60 = vld [vmem:[#allocation88_spill] sm:$0xff] }
 0x729   :  { %2524 = vmatprep.subr.mxu0 %v4908_v32  ;;  %2595 = vmatprep.subr.mxu1 %v4911_v61  ;;  %v6359_v32 = vld [vmem:[#allocation92_spill] sm:$0xff] }
 0x72a   :  { %2525 = vmatpush1.msra.mxu0 %v4914_v62  ;;  %2596 = vmatpush1.msra.mxu1 %v4917_v5 }
 0x72b   :  { %2526 = vmatprep.subr.mxu0 %v4920_v7  ;;  %2597 = vmatprep.subr.mxu1 %v4923_v6 }
 0x72c   :  { %2527 = vmatpush1.msra.mxu0 %v4926_v8  ;;  %2598 = vmatpush1.msra.mxu1 %v4929_v11 }
 0x72d   :  { %2528 = vmatprep.subr.mxu0 %v4932_v39  ;;  %2599 = vmatprep.subr.mxu1 %v6331_v3 }
 0x72e   :  { %2529 = vmatpush1.msra.mxu0 %v6332_v48  ;;  %2600 = vmatpush1.msra.mxu1 %v6333_v25 }
 0x72f   :  { %2530 = vmatprep.subr.mxu0 %v6334_v27  ;;  %2601 = vmatprep.subr.mxu1 %v6335_v23 }
 0x730   :  { %2531 = vmatpush1.msra.mxu0 %v6336_v37  ;;  %2602 = vmatpush1.msra.mxu1 %v6337_v59 }
 0x731   :  { %2532 = vmatprep.subr.mxu0 %v6338_v16  ;;  %2603 = vmatprep.subr.mxu1 %v6339_v17 }
 0x732   :  { %2533 = vmatpush1.msra.mxu0 %v6340_v12  ;;  %2604 = vmatpush1.msra.mxu1 %v6341_v57 }
 0x733   :  { %2534 = vmatprep.subr.mxu0 %v6342_v13  ;;  %2605 = vmatprep.subr.mxu1 %v6343_v18 }
 0x734   :  { %2535 = vmatpush1.msra.mxu0 %v6344_v41  ;;  %2606 = vmatpush1.msra.mxu1 %v6345_v45 }
 0x735   :  { %2536 = vmatprep.subr.mxu0 %v6346_v49  ;;  %2607 = vmatprep.subr.mxu1 %v6347_v52 }
 0x736   :  { %2537 = vmatpush1.msra.mxu0 %v6348_v35  ;;  %2608 = vmatpush1.msra.mxu1 %v6349_v50 }
 0x737   :  { %2538 = vmatprep.subr.mxu0 %v6350_v9  ;;  %2609 = vmatprep.subr.mxu1 %v6351_v10  ;;  %v2501_v9 = vpop.permute.xlu0 %2500 }
 0x738   :  { %2539 = vmatpush1.msra.mxu0 %v6352_v0  ;;  %2610 = vmatpush1.msra.mxu1 %v6353_v55  ;;  %vm2502_vm14 = vcmp.eq.s32.totalorder %v2501_v9, 1  ;;  %v2509_v9 = vld [vmem:[#allocation4 + $0x38] sm:$0xff] }
 0x739   :  { %2540 = vmatprep.subr.mxu0 %v6354_v54  ;;  %2611 = vmatprep.subr.mxu1 %v6355_v1 }
 0x73a   :  { %2541 = vmatpush1.msra.mxu0 %v6356_v51  ;;  %2612 = vmatpush1.msra.mxu1 %v6357_v15 }
 0x73b   :  { %2574 = vmatprep.mubr.f32.mxu0 %v5821_v56  ;;  %2645 = vmatprep.mubr.f32.mxu1 %v5821_v56 }
 0x73c   :  { %2652 = vmatprep.subr.mxu0 %v6358_v60  ;;  %2723 = vmatprep.subr.mxu1 %v6359_v32 }
 0x7b9   :  { %v2249_v61 = vpop.f32.mrf.mxu0  ;;  %v2320_v62 = vpop.f32.mrf.mxu1 }
 0x7bb   :  { %v2251_v5 = vpop.f32.mrf.mxu0  ;;  %v2322_v6 = vpop.f32.mrf.mxu1 }
 0x7da   :  { %v2391_v7 = vpop.f32.mrf.mxu0  ;;  %v2462_v29 = vpop.f32.mrf.mxu1 }
 0x7db   :  { %v2392_v8 = vadd.f32 %v2391_v7, %v2249_v61  ;;  %v2463_v16 = vadd.f32 %v2462_v29, %v2320_v62  ;;  %v6375_v61 = vld [vmem:[#allocation22_spill] sm:$0xff]  ;;  %v6376_v62 = vld [vmem:[#allocation23_spill] sm:$0xff]  ;;  %v6378_v7 = vld [vmem:[#allocation25_spill] sm:$0xff] }
 0x7dc   :  { %v2393_v11 = vpop.f32.mrf.mxu0  ;;  %v2464_v23 = vpop.f32.mrf.mxu1  ;;  %v6383_v29 = vld [vmem:[#allocation30_spill] sm:$0xff] }
 0x7dd   :  { %v2467_v39 = vadd.f32 %v2392_v8, %v5983_v14  ;;  %v2394_v3 = vadd.f32 %v2393_v11, %v2251_v5  ;;  %v2465_v37 = vadd.f32 %v2464_v23, %v2322_v6  ;;  %v2469_v57 = vadd.f32 %v2463_v16, %v3908_v63  ;;  %v6377_v5 = vld [vmem:[#allocation24_spill] sm:$0xff]  ;;  %v6379_v6 = vld [vmem:[#allocation26_spill] sm:$0xff]  ;;  %v6380_v8 = vld [vmem:[#allocation27_spill] sm:$0xff] }
 0x7de   :  { %v6381_v11 = vld [vmem:[#allocation28_spill] sm:$0xff]  ;;  %v6388_v23 = vld [vmem:[#allocation35_spill] sm:$0xff]  ;;  %v6391_v16 = vld [vmem:[#allocation38_spill] sm:$0xff] }
 0x7df   :  { %v2879_v48 = vmul.f32 -1.442695, %v2467_v39  ;;  %v2468_v25 = vadd.f32 %v2394_v3, %v3901_v43  ;;  %v2470_v59 = vadd.f32 %v2465_v37, %v3905_v36  ;;  %v6382_v39 = vld [vmem:[#allocation29_spill] sm:$0xff]  ;;  %v6384_v3 = vld [vmem:[#allocation31_spill] sm:$0xff]  ;;  %v6389_v37 = vld [vmem:[#allocation36_spill] sm:$0xff] }
 0x7e1   :  { %2997 = vpow2.f32 %v2879_v48  ;;  %v2880_v27 = vmul.f32 -1.442695, %v2468_v25  ;;  %v2881_v17 = vmul.f32 -1.442695, %v2470_v59  ;;  %v6385_v48 = vld [vmem:[#allocation32_spill] sm:$0xff]  ;;  %v6386_v25 = vld [vmem:[#allocation33_spill] sm:$0xff] }
 0x7e2   :  { %v6390_v59 = vld [vmem:[#allocation37_spill] sm:$0xff] }
 0x7e3   :  { %2999 = vpow2.f32 %v2880_v27  ;;  %v6387_v27 = vld [vmem:[#allocation34_spill] sm:$0xff] }
 0x7e4   :  { %3001 = vpow2.f32 %v2881_v17  ;;  %v6392_v17 = vld [vmem:[#allocation39_spill] sm:$0xff] }
 0x7ee   :  { %v2998_v12 = vpop.eup %2997 }
 0x7ef   :  { %v2474_v13 = vadd.f32 1.0, %v2998_v12  ;;  %v6393_v12 = vld [vmem:[#allocation40_spill] sm:$0xff] }
 0x7f0   :  { %v3000_v18 = vpop.eup %2999 }
 0x7f1   :  { %3003 = vrcp.f32 %v2474_v13  ;;  %v2480_v41 = vadd.f32 1.0, %v3000_v18  ;;  %v3002_v45 = vpop.eup %3001  ;;  %v6395_v13 = vld [vmem:[#allocation42_spill] sm:$0xff]  ;;  %v6396_v18 = vld [vmem:[#allocation43_spill] sm:$0xff] }
 0x7f2   :  { %3005 = vtanh.f32 %v2469_v57  ;;  %v2487_v50 = vadd.f32 1.0, %v3002_v45  ;;  %v6394_v57 = vld [vmem:[#allocation41_spill] sm:$0xff]  ;;  %v6398_v45 = vld [vmem:[#allocation59_spill] sm:$0xff] }
 0x7f3   :  { %3007 = vrcp.f32 %v2480_v41  ;;  %v6397_v41 = vld [vmem:[#allocation44_spill] sm:$0xff] }
 0x7f4   :  { %3009 = vrcp.f32 %v2487_v50  ;;  %v6402_v50 = vld [vmem:[#allocation63_spill] sm:$0xff] }
 0x7fe   :  { %v3004_v49 = vpop.eup %3003 }
 0x7ff   :  { %v3006_v52 = vpop.eup %3005 }
 0x800   :  { %v3008_v35 = vpop.eup %3007  ;;  %v2491_v10 = vmul.f32 %v3006_v52, %v3004_v49  ;;  %v6399_v49 = vld [vmem:[#allocation60_spill] sm:$0xff]  ;;  %v6400_v52 = vld [vmem:[#allocation61_spill] sm:$0xff] }
 0x801   :  { %v2490_v0 = vmul.f32 %v3008_v35, %v5030_v31  ;;  %v3010_v1 = vpop.eup %3009  ;;  %v6401_v35 = vld [vmem:[#allocation62_spill] sm:$0xff] }
 0x803   :  { %v2492_v55 = vadd.f32 %v2491_v10, %v2490_v0 }
 0x805   :  { %3011 = vtanh.f32 %v2492_v55  ;;  %v5299_v54 = vsel %vm2502_vm14, %v2492_v55, %v5030_v31  ;;  %v6360_v31 = vld [vmem:[#allocation93_spill] sm:$0xff] }
 0x812   :  { %v3012_v51 = vpop.eup %3011 }
 0x813   :  { %v2494_v15 = vmul.f32 %v3012_v51, %v3010_v1 }
 0x815   :  { %v2503_v60 = vsel %vm2502_vm14, %v2494_v15, 0.0  ;;  %v2506_v32 = vsel %vm2502_vm14, %v2494_v15, %v5033_v42  ;;  %v6361_v42 = vld [vmem:[#allocation94_spill] sm:$0xff] }
 0x816   :  { %2505 = vst [vmem:[#allocation10 + $0x30] sm:$0xff] %v2503_v60  ;;  %2575 = vmatmul.mubr.f32.vlgmr.msra.gmra.mxu0 %v2506_v32  ;;  %2646 = vmatmul.mubr.f32.vlgmr.msra.gmra.mxu1 %v2506_v32 }
 0x817   :  { %2653 = vmatpush1.msra.mxu0 %v5037_v58  ;;  %2724 = vmatpush1.msra.mxu1 %v5040_v40  ;;  %v6362_v58 = vld [vmem:[#allocation97_spill] sm:$0xff]  ;;  %v6363_v40 = vld [vmem:[#allocation98_spill] sm:$0xff] }
 0x818   :  { %2654 = vmatprep.subr.mxu0 %v5043_v53  ;;  %2725 = vmatprep.subr.mxu1 %v5046_v47  ;;  %v6364_v53 = vld [vmem:[#allocation99_spill] sm:$0xff]  ;;  %v6365_v47 = vld [vmem:[#allocation100_spill] sm:$0xff] }
 0x819   :  { %2655 = vmatpush1.msra.mxu0 %v5049_v38  ;;  %2726 = vmatpush1.msra.mxu1 %v5052_v44  ;;  %v6366_v38 = vld [vmem:[#allocation102_spill] sm:$0xff] }
 0x81a   :  { %2656 = vmatprep.subr.mxu0 %v5055_v22  ;;  %2727 = vmatprep.subr.mxu1 %v5058_v19  ;;  %v6367_v44 = vld [vmem:[#allocation14_spill] sm:$0xff]  ;;  %v6368_v22 = vld [vmem:[#allocation15_spill] sm:$0xff]  ;;  %v6369_v19 = vld [vmem:[#allocation16_spill] sm:$0xff] }
 0x81b   :  { %2657 = vmatpush1.msra.mxu0 %v5061_v46  ;;  %2728 = vmatpush1.msra.mxu1 %v5064_v28  ;;  %v6370_v46 = vld [vmem:[#allocation17_spill] sm:$0xff]  ;;  %v6371_v28 = vld [vmem:[#allocation18_spill] sm:$0xff] }
 0x81c   :  { %2658 = vmatprep.subr.mxu0 %v5067_v24  ;;  %2729 = vmatprep.subr.mxu1 %v5070_v21  ;;  %v6372_v24 = vld [vmem:[#allocation19_spill] sm:$0xff]  ;;  %v6373_v21 = vld [vmem:[#allocation20_spill] sm:$0xff] }
 0x81d   :  { %2659 = vmatpush1.msra.mxu0 %v5073_v2  ;;  %2730 = vmatpush1.msra.mxu1 %v6360_v31  ;;  %v6374_v2 = vld [vmem:[#allocation21_spill] sm:$0xff] }
 0x81e   :  { %2660 = vmatprep.subr.mxu0 %v6361_v42  ;;  %2731 = vmatprep.subr.mxu1 %v6362_v58 }
 0x81f   :  { %2661 = vmatpush1.msra.mxu0 %v6363_v40  ;;  %2732 = vmatpush1.msra.mxu1 %v6364_v53 }
 0x820   :  { %2662 = vmatprep.subr.mxu0 %v6365_v47  ;;  %2733 = vmatprep.subr.mxu1 %v6366_v38 }
 0x821   :  { %2663 = vmatpush1.msra.mxu0 %v6367_v44  ;;  %2734 = vmatpush1.msra.mxu1 %v6368_v22 }
 0x822   :  { %2664 = vmatprep.subr.mxu0 %v6369_v19  ;;  %2735 = vmatprep.subr.mxu1 %v6370_v46 }
 0x823   :  { %2665 = vmatpush1.msra.mxu0 %v6371_v28  ;;  %2736 = vmatpush1.msra.mxu1 %v6372_v24 }
 0x824   :  { %2666 = vmatprep.subr.mxu0 %v6373_v21  ;;  %2737 = vmatprep.subr.mxu1 %v6374_v2 }
 0x825   :  { %2667 = vmatpush1.msra.mxu0 %v6375_v61  ;;  %2738 = vmatpush1.msra.mxu1 %v6376_v62 }
 0x826   :  { %2668 = vmatprep.subr.mxu0 %v6377_v5  ;;  %2739 = vmatprep.subr.mxu1 %v6378_v7 }
 0x827   :  { %2669 = vmatpush1.msra.mxu0 %v6379_v6  ;;  %2740 = vmatpush1.msra.mxu1 %v6380_v8 }
 0x828   :  { %2670 = vmatprep.subr.mxu0 %v6381_v11  ;;  %2741 = vmatprep.subr.mxu1 %v6382_v39 }
 0x829   :  { %2671 = vmatpush1.msra.mxu0 %v6383_v29  ;;  %2742 = vmatpush1.msra.mxu1 %v6384_v3 }
 0x82a   :  { %2672 = vmatprep.subr.mxu0 %v6385_v48  ;;  %2743 = vmatprep.subr.mxu1 %v6386_v25 }
 0x82b   :  { %2673 = vmatpush1.msra.mxu0 %v6387_v27  ;;  %2744 = vmatpush1.msra.mxu1 %v6388_v23 }
 0x82c   :  { %2674 = vmatprep.subr.mxu0 %v6389_v37  ;;  %2745 = vmatprep.subr.mxu1 %v6390_v59 }
 0x82d   :  { %2675 = vmatpush1.msra.mxu0 %v6391_v16  ;;  %2746 = vmatpush1.msra.mxu1 %v6392_v17 }
 0x82e   :  { %2676 = vmatprep.subr.mxu0 %v6393_v12  ;;  %2747 = vmatprep.subr.mxu1 %v6394_v57 }
 0x82f   :  { %2677 = vmatpush1.msra.mxu0 %v6395_v13  ;;  %2748 = vmatpush1.msra.mxu1 %v6396_v18 }
 0x830   :  { %2678 = vmatprep.subr.mxu0 %v6397_v41  ;;  %2749 = vmatprep.subr.mxu1 %v6398_v45 }
 0x831   :  { %2679 = vmatpush1.msra.mxu0 %v6399_v49  ;;  %2750 = vmatpush1.msra.mxu1 %v6400_v52 }
 0x832   :  { %2680 = vmatprep.subr.mxu0 %v6401_v35  ;;  %2751 = vmatprep.subr.mxu1 %v5202_v26 }
 0x833   :  { %2681 = vmatpush1.msra.mxu0 %v6402_v50  ;;  %2752 = vmatpush1.msra.mxu1 %v5208_v4 }
 0x834   :  { %2682 = vmatprep.subr.mxu0 %v5211_v30  ;;  %2753 = vmatprep.subr.mxu1 %v5214_v33 }
 0x835   :  { %2683 = vmatpush1.msra.mxu0 %v5217_v34  ;;  %2716 = vmatprep.mubr.f32.mxu0 %v5821_v56 }
 0x836   :  { %2754 = vmatpush1.msra.mxu1 %v5221_v20  ;;  %2787 = vmatprep.mubr.f32.mxu1 %v5821_v56 }
 0x837   :  { %2717 = vmatmul.mubr.f32.vlgmr.msra.gmra.mxu0 %v2509_v9  ;;  %2788 = vmatmul.mubr.f32.vlgmr.msra.gmra.mxu1 %v2509_v9 }
 0x8d6   :  { %v2576_v26 = vpop.f32.mrf.mxu0  ;;  %v2647_v10 = vpop.f32.mrf.mxu1 }
 0x8d8   :  { %v2578_v0 = vpop.f32.mrf.mxu0  ;;  %v2649_v4 = vpop.f32.mrf.mxu1 }
 0x8f7   :  { %v2718_v55 = vpop.f32.mrf.mxu0  ;;  %v2789_v51 = vpop.f32.mrf.mxu1 }
 0x8f8   :  { %v2719_v1 = vadd.f32 %v2718_v55, %v2576_v26  ;;  %v2790_v42 = vadd.f32 %v2789_v51, %v2647_v10 }
 0x8f9   :  { %v2720_v30 = vpop.f32.mrf.mxu0  ;;  %v2791_v32 = vpop.f32.mrf.mxu1 }
 0x8fa   :  { %v2794_v33 = vadd.f32 %v2719_v1, %v5983_v14  ;;  %v2721_v15 = vadd.f32 %v2720_v30, %v2578_v0  ;;  %v2792_v56 = vadd.f32 %v2791_v32, %v2649_v4  ;;  %v2796_v53 = vadd.f32 %v2790_v42, %v3908_v63  ;;  %v2828_v63 = vpop.permute.xlu1 %2827 }
 0x8fb   :  { %vm2829_vm15 = vcmp.eq.s32.totalorder %v2828_v63, 1 }
 0x8fc   :  { %v2883_v34 = vmul.f32 -1.442695, %v2794_v33  ;;  %v2795_v60 = vadd.f32 %v2721_v15, %v3901_v43  ;;  %v2797_v31 = vadd.f32 %v2792_v56, %v3905_v36 }
 0x8fe   :  { %3013 = vpow2.f32 %v2883_v34  ;;  %v2884_v20 = vmul.f32 -1.442695, %v2795_v60  ;;  %v2885_v58 = vmul.f32 -1.442695, %v2797_v31 }
 0x900   :  { %3015 = vpow2.f32 %v2884_v20 }
 0x901   :  { %3017 = vpow2.f32 %v2885_v58 }
 0x90b   :  { %v3014_v40 = vpop.eup %3013 }
 0x90c   :  { %v2801_v47 = vadd.f32 1.0, %v3014_v40 }
 0x90d   :  { %v3016_v38 = vpop.eup %3015 }
 0x90e   :  { %3019 = vrcp.f32 %v2801_v47  ;;  %v2807_v14 = vadd.f32 1.0, %v3016_v38  ;;  %v3018_v43 = vpop.eup %3017 }
 0x90f   :  { %3021 = vtanh.f32 %v2796_v53  ;;  %v2814_v46 = vadd.f32 1.0, %v3018_v43 }
 0x910   :  { %3023 = vrcp.f32 %v2807_v14 }
 0x911   :  { %3025 = vrcp.f32 %v2814_v46 }
 0x91b   :  { %v3020_v44 = vpop.eup %3019 }
 0x91c   :  { %v3022_v22 = vpop.eup %3021 }
 0x91d   :  { %v3024_v19 = vpop.eup %3023  ;;  %v2818_v28 = vmul.f32 %v3022_v22, %v3020_v44 }
 0x91e   :  { %v2817_v36 = vmul.f32 %v3024_v19, %v5299_v54  ;;  %v3026_v21 = vpop.eup %3025 }
 0x920   :  { %v2819_v24 = vadd.f32 %v2818_v28, %v2817_v36 }
 0x922   :  { %3027 = vtanh.f32 %v2819_v24 }
 0x92f   :  { %v3028_v2 = vpop.eup %3027 }
 0x930   :  { %v2821_v61 = vmul.f32 %v3028_v2, %v3026_v21 }
 0x932   :  { %v2830_v62 = vsel %vm2829_vm15, %v2821_v61, 0.0 }
 0x933   :  { %2832 = vst [vmem:[#allocation10 + $0x38] sm:$0xff] %v2830_v62 }
 0x934   :  { %3356 = shalt.err (!%p3353_p5)
}
 0x935   :  { %2848 = dma.vmem_to_hbm [thread:$0]  %s2843_s12, 1024, %s5382_s5, [#allocation6], %s3375_s28, %s3375_s28, %s3376_s29  }
 0x936   :  { %3369 = dma.done.wait [#allocation6], 1024  }
 0x937   :  { %3370 = vsyncadd [#allocation6], 4294966272 }
 0x938   :  { %2852 = vsyncpa [#allocation5], 1 }
 0x939   :  { %2853 = vsyncpa [#allocation8], 1 }
 0x93a   :  { %2854 = vsyncpa [#allocation6], 1 }

</bundles_post_ra>
